<compile_context>
chip_gen: v7x
topology: tpu7x:2x2x1
jax: 0.10.0
libtpu: 0.0.40
codegen_flags: <defaults>
</compile_context>

<pallas_src>
import math
from functools import partial

import jax
import jax.numpy as jnp
import numpy as np
from jax.experimental import pallas as pl
from jax.experimental.pallas import tpu as pltpu

EPS = 1e-5

PARAM_ORDER = [
    "g1", "b1", "g2", "b2",
    "wq_a", "wk_a", "wv_a", "wo_a",
    "wq_c", "wk_c", "wv_c", "wo_c",
    "fc1_w", "fc1_b", "fc2_w", "fc2_b",
]


# ----------------------------- in-kernel math helpers -----------------------------

def _layernorm(x, gamma, beta):
    mean = jnp.mean(x, axis=-1, keepdims=True)
    var = jnp.mean(jnp.square(x - mean), axis=-1, keepdims=True)
    return (x - mean) * jax.lax.rsqrt(var + EPS) * gamma + beta


def _erf(x):
    # Abramowitz & Stegun 7.1.26 rational approximation (|err| <= ~1e-4 with approx recip).
    a1, a2, a3, a4, a5 = (0.254829592, -0.284496736, 1.421413741,
                          -1.453152027, 1.061405429)
    p = 0.3275911
    ax = jnp.abs(x)
    # divide over the widest elementwise tensor in the kernel -> EUP approx reciprocal
    t = pl.reciprocal(1.0 + p * ax, approx=True)
    poly = t * (a1 + t * (a2 + t * (a3 + t * (a4 + t * a5))))
    y = 1.0 - poly * jnp.exp(-ax * ax)
    return jnp.where(x < 0.0, -y, y)


def _gelu_exact(x):
    # matches torch.nn.GELU() (erf form) to ~1e-4
    return 0.5 * x * (1.0 + _erf(x * (1.0 / math.sqrt(2.0))))


def _gated_attention(xn_q, xn_kv, wq, wk, wv, wo, *, H, nb, Lq, Lk, thresh, bf16_pv):
    """Gated multi-head attention with combined projections.

    xn_q : (nb*Lq, Dq)   layernormed queries (batch folded into rows)
    xn_kv: (nb*Lk, Dkv)  layernormed keys/values
    wq   : (Dq,  H*d)    W_q with 1/sqrt(d_head) folded in (original layout)
    wk   : (Dkv, H*d)    W_k (original layout)
    wv   : (Dkv, H*d)    W_v (original layout)
    wo   : (H*d, Dq)     full W_o  (d_head % 128 == 0 -> lane-concat path), or
           (H, d, Dq)    head-major W_o (accumulate over heads, avoids mid-vreg concat)
    Returns (nb*Lq, Dq) in f32.
    """
    Dtot = wq.shape[1]
    d = Dtot // H

    # Combined full-width projections: one MXU matmul each instead of H head-sized pushes.
    q = jnp.dot(xn_q, wq, preferred_element_type=jnp.float32)     # (nb*Lq, H*d)
    k = jnp.dot(xn_kv, wk, preferred_element_type=jnp.float32)    # (nb*Lk, H*d)
    v = jnp.dot(xn_kv, wv, preferred_element_type=jnp.float32)    # (nb*Lk, H*d)

    # Head split into ONE (H*nb)-batched tensor: the softmax/gate pass below covers all
    # heads and all batch elements at once (no per-batch Python unroll).
    def split_heads(t, Lt):
        t3 = t.reshape(nb, Lt, Dtot)
        return jnp.concatenate([t3[:, :, h * d:(h + 1) * d] for h in range(H)], axis=0)

    qh = split_heads(q, Lq)     # (H*nb, Lq, d), row index = h*nb + b
    kh = split_heads(k, Lk)     # (H*nb, Lk, d)
    vh = split_heads(v, Lk)     # (H*nb, Lk, d)

    # Scores stay f32: the gate is a hard compare at s ~ thresh (flip-sensitive).
    s = jnp.einsum('bqe,bke->bqk', qh, kh, preferred_element_type=jnp.float32)
    m = jnp.max(s, axis=-1, keepdims=True)
    e = jnp.exp(s - m)
    probs = e * pl.reciprocal(jnp.sum(e, axis=-1, keepdims=True), approx=True)
    gated = jnp.where(s > thresh, probs, 0.0)          # == sigmoid(s) > rate

    if bf16_pv:                                        # post-gate -> bf16 operands are safe
        gated = gated.astype(jnp.bfloat16)
        vh = vh.astype(jnp.bfloat16)
    o = jnp.einsum('bqk,bke->bqe', gated, vh,
                   preferred_element_type=jnp.float32)  # (H*nb, Lq, d), f32 accum

    if wo.ndim == 2:
        # d_head multiple of 128: per-head lane blocks are whole vreg tiles, so the concat
        # back to (nb*Lq, H*d) is whole-tile and a SINGLE W_o matmul replaces the per-head
        # matmuls + cross-head reduce.
        o_cat = jnp.concatenate([o[h * nb:(h + 1) * nb] for h in range(H)], axis=-1)
        o2 = o_cat.reshape(nb * Lq, Dtot)
        if bf16_pv:
            o2 = o2.astype(wo.dtype)
        return jnp.dot(o2, wo, preferred_element_type=jnp.float32)          # (nb*Lq, Dq)
    else:
        # d_head = 64 (cross attention): lane concat would be a mid-vreg relayout; accumulate
        # through head-major W_o instead (head-batched matmul + reduce over heads).
        o4 = o.reshape(H, nb * Lq, d)
        if bf16_pv:
            o4 = o4.astype(wo.dtype)
        per = jnp.einsum('hme,hed->hmd', o4, wo, preferred_element_type=jnp.float32)
        return jnp.sum(per, axis=0)                                          # (nb*Lq, Dq)


# ----------------------------------- kernel ---------------------------------------

def _decoder_block_kernel(x_ref, z_ref,
                          g1_ref, b1_ref, g2_ref, b2_ref,
                          wq_a_ref, wk_a_ref, wv_a_ref, wo_a_ref,
                          wq_c_ref, wk_c_ref, wv_c_ref, wo_c_ref,
                          fc1_w_ref, fc1_b_ref, fc2_w_ref, fc2_b_ref,
                          out_ref,
                          *, nb, L, Lz, Hs, Hc, thresh):
    Dq = x_ref.shape[-1]
    Dz = z_ref.shape[-1]
    x = x_ref[...].reshape(nb * L, Dq)       # fold batch into rows (sublane-aligned merge)
    z = z_ref[...].reshape(nb * Lz, Dz)
    g1, b1 = g1_ref[...], b1_ref[...]
    g2, b2 = g2_ref[...], b2_ref[...]

    # --- block 1: gated multi-head self attention + residual (dropout = identity) ---
    # f32 end-to-end: its output feeds block-2's flip-sensitive gate through the residual.
    xn = _layernorm(x, g1, b1)
    x = x + _gated_attention(xn, xn,
                             wq_a_ref[...], wk_a_ref[...], wv_a_ref[...], wo_a_ref[...],
                             H=Hs, nb=nb, Lq=L, Lk=L, thresh=thresh, bf16_pv=False)

    # --- block 2: gated cross attention with Zelta + residual ---
    # scores f32 (gate), PV / W_o in bf16 (nothing gate-sensitive downstream).
    xn = _layernorm(x, g1, b1)
    zn = _layernorm(z, g2, b2)
    x = x + _gated_attention(xn, zn,
                             wq_c_ref[...], wk_c_ref[...], wv_c_ref[...], wo_c_ref[...],
                             H=Hc, nb=nb, Lq=L, Lk=Lz, thresh=thresh, bf16_pv=True)

    # --- block 3: Mlp (fc1 -> GELU -> fc2) + residual; bf16 MXU operands, f32 accum ---
    xn = _layernorm(x, g1, b1)
    h = _gelu_exact(jnp.dot(xn.astype(jnp.bfloat16), fc1_w_ref[...],
                            preferred_element_type=jnp.float32) + fc1_b_ref[...])
    x = x + (jnp.dot(h.astype(jnp.bfloat16), fc2_w_ref[...],
                     preferred_element_type=jnp.float32) + fc2_b_ref[...])

    out_ref[...] = x.reshape(nb, L, Dq)


# ------------------------------ parameter preparation ------------------------------

def prepare_decoder_params(params, *, num_heads_self, num_heads_cross):
    """One-time transform:
       * 1/sqrt(d_head) folded into W_q (self + cross)
       * W_o kept full (H*d, Dq) when d_head % 128 == 0 (lane-concat path),
         otherwise reshaped head-major (H, d, Dq)
       * weights on non-gate-critical matmul paths (cross W_o, MLP fc1/fc2) pre-cast to bf16
    """
    p = dict(params)

    def fold_q_scale(w, H):
        d = w.shape[1] // H
        return w * (1.0 / math.sqrt(d))        # reference: scores / sqrt(query.shape[-1])

    def o_layout(w, H):
        dtot, dq = w.shape
        d = dtot // H
        return w if d % 128 == 0 else w.reshape(H, d, dq)

    return {
        "g1": p["g1"], "b1": p["b1"], "g2": p["g2"], "b2": p["b2"],
        # self-attention: combined projections, f32 (feeds block-2's gate)
        "wq_a": fold_q_scale(p["wq_a"], num_heads_self),
        "wk_a": p["wk_a"],
        "wv_a": p["wv_a"],
        "wo_a": o_layout(p["wo_a"], num_heads_self),
        # cross-attention: combined projections f32 (scores feed the gate); W_o bf16
        "wq_c": fold_q_scale(p["wq_c"], num_heads_cross),
        "wk_c": p["wk_c"],
        "wv_c": p["wv_c"],
        "wo_c": o_layout(p["wo_c"], num_heads_cross).astype(jnp.bfloat16),
        # MLP: bf16 MXU operands, f32 accumulation + f32 bias
        "fc1_w": p["fc1_w"].astype(jnp.bfloat16), "fc1_b": p["fc1_b"],
        "fc2_w": p["fc2_w"].astype(jnp.bfloat16), "fc2_b": p["fc2_b"],
    }


# ----------------------------------- wrapper ---------------------------------------

_SINGLE_TC_KINDS = ("v5 lite", "v5e", "v5litepod", "v6 lite", "v6e")


def _batch_block_for_device(B):
    """v5e/v6e (1 TensorCore): fold the whole batch into ONE grid step (per-step overhead
    ~0.35us and the per-batch bodies are tiny).  Multi-TC chips (v7x): nb = B/2 so each
    TensorCore runs exactly one grid step with larger (nb*L, .) M-dims per MXU push."""
    try:
        kind = jax.devices()[0].device_kind.lower()
    except Exception:
        return B
    if any(t in kind for t in _SINGLE_TC_KINDS):
        return B
    if B % 2 == 0:
        return max(1, B // 2)
    return 1


def decoder_block(X, Zelta, prepared_params, *, num_heads_self, num_heads_cross,
                  rate=0.5, batch_block=None):
    B, L, Dq = X.shape
    _, Lz, Dz = Zelta.shape
    nb = batch_block if batch_block is not None else _batch_block_for_device(B)
    if nb <= 0 or B % nb != 0:
        nb = 1

    # sigmoid(s) > rate  <=>  s > logit(rate); guard the degenerate endpoints.
    if rate <= 0.0:
        thresh = float("-inf")      # gate always open
    elif rate >= 1.0:
        thresh = float("inf")       # gate always closed
    else:
        thresh = float(math.log(rate / (1.0 - rate)))

    param_list = [prepared_params[k] for k in PARAM_ORDER]

    in_specs = [
        pl.BlockSpec((nb, L, Dq), lambda b: (b, 0, 0)),    # X: nb batch elements per grid step
        pl.BlockSpec((nb, Lz, Dz), lambda b: (b, 0, 0)),   # Zelta
    ]
    # Weights: full array, constant block index -> VMEM-resident, no per-step re-fetch.
    for p in param_list:
        in_specs.append(pl.BlockSpec(p.shape, lambda b, nd=p.ndim: (0,) * nd))

    kernel = partial(_decoder_block_kernel, nb=nb, L=L, Lz=Lz,
                     Hs=num_heads_self, Hc=num_heads_cross, thresh=thresh)

    return pl.pallas_call(
        kernel,
        out_shape=jax.ShapeDtypeStruct((B, L, Dq), jnp.float32),
        grid=(B // nb,),
        in_specs=in_specs,
        out_specs=pl.BlockSpec((nb, L, Dq), lambda b: (b, 0, 0)),
        compiler_params=pltpu.CompilerParams(dimension_semantics=("parallel",)),
    )(X, Zelta, *param_list)


# ------------------------------ pure-JAX reference --------------------------------

def _ln_ref(x, g, b):
    m = jnp.mean(x, axis=-1, keepdims=True)
    v = jnp.mean(jnp.square(x - m), axis=-1, keepdims=True)
    return (x - m) / jnp.sqrt(v + EPS) * g + b


def _transpose_qkv(x, H):
    B, L, D = x.shape
    return x.reshape(B, L, H, D // H).transpose(0, 2, 1, 3).reshape(B * H, L, D // H)


def _transpose_output(x, H):
    BH, L, d = x.shape
    return x.reshape(-1, H, L, d).transpose(0, 2, 1, 3).reshape(-1, L, H * d)


def _attn_ref(Xq, Xk, Xv, wq, wk, wv, wo, H, rate):
    q = _transpose_qkv(Xq @ wq, H)
    k = _transpose_qkv(Xk @ wk, H)
    v = _transpose_qkv(Xv @ wv, H)
    s = jnp.matmul(q, jnp.swapaxes(k, -2, -1)) / math.sqrt(q.shape[-1])
    pr = jax.nn.softmax(s, axis=-1)
    g = jnp.where(jax.nn.sigmoid(s) > rate, pr, 0.0)
    o = _transpose_output(jnp.matmul(g, v), H)
    return o @ wo


def decoder_block_ref(X, Z, p, Hs, Hc, rate=0.5):
    n1 = lambda t: _ln_ref(t, p["g1"], p["b1"])
    n2 = lambda t: _ln_ref(t, p["g2"], p["b2"])
    X = X + _attn_ref(n1(X), n1(X), n1(X),
                      p["wq_a"], p["wk_a"], p["wv_a"], p["wo_a"], Hs, rate)
    X = X + _attn_ref(n1(X), n2(Z), n2(Z),
                      p["wq_c"], p["wk_c"], p["wv_c"], p["wo_c"], Hc, rate)
    Xn = n1(X)
    h = jax.nn.gelu(Xn @ p["fc1_w"] + p["fc1_b"], approximate=False)
    X = X + (h @ p["fc2_w"] + p["fc2_b"])
    return X


# ------------------------------------- main ----------------------------------------

if __name__ == "__main__":
    B, L, Lz = 2, 8, 8
    query_size = 32
    z_size = 100           # hard-coded by norm2 / TopMulticrossAttention(key_size=value_size=100)
    num_hiddens = 512      # forced by the hard-coded 512 inside TopMulticrossAttention
    num_heads_self = 4     # d_head = 128 -> lane-concat output path
    num_heads_cross = 8    # hard-coded in DecoderBlock.__init__ (d_head = 64 -> head-major W_o)

    key = jax.random.PRNGKey(0)
    ks = list(jax.random.split(key, 20))

    def nrm(k, shape, scale=0.05):
        return (scale * jax.random.normal(k, shape)).astype(jnp.float32)

    X = jax.random.normal(ks[0], (B, L, query_size), jnp.float32)
    Zelta = jax.random.normal(ks[1], (B, Lz, z_size), jnp.float32)

    params = {
        "g1": 1.0 + nrm(ks[2], (1, query_size), 0.1),
        "b1": nrm(ks[3], (1, query_size), 0.1),
        "g2": 1.0 + nrm(ks[4], (1, z_size), 0.1),
        "b2": nrm(ks[5], (1, z_size), 0.1),
        # TopMultiAttention (bias=False)
        "wq_a": nrm(ks[6], (query_size, num_hiddens)),
        "wk_a": nrm(ks[7], (query_size, num_hiddens)),
        "wv_a": nrm(ks[8], (query_size, num_hiddens)),
        "wo_a": nrm(ks[9], (num_hiddens, query_size)),
        # TopMulticrossAttention (bias=False; W_k/W_v map 100 -> 512)
        "wq_c": nrm(ks[10], (query_size, num_hiddens)),
        "wk_c": nrm(ks[11], (z_size, 512)),
        "wv_c": nrm(ks[12], (z_size, 512)),
        "wo_c": nrm(ks[13], (num_hiddens, query_size)),
        # Mlp (bias=True)
        "fc1_w": nrm(ks[14], (query_size, num_hiddens)),
        "fc1_b": nrm(ks[15], (1, num_hiddens), 0.1),
        "fc2_w": nrm(ks[16], (num_hiddens, query_size)),
        "fc2_b": nrm(ks[17], (1, query_size), 0.1),
    }

    prepared = prepare_decoder_params(params,
                                      num_heads_self=num_heads_self,
                                      num_heads_cross=num_heads_cross)

    out = decoder_block(X, Zelta, prepared,
                        num_heads_self=num_heads_self,
                        num_heads_cross=num_heads_cross,
                        rate=0.5)
    out = jax.block_until_ready(out)

    ref = decoder_block_ref(X, Zelta, params, num_heads_self, num_heads_cross, 0.5)
    # Tolerance sized for bf16 MXU operands on the non-gate-critical matmuls (cross-attn PV/W_o
    # and MLP fc1/fc2); all gate-critical score paths stay f32 so threshold decisions match.
    np.testing.assert_allclose(np.asarray(out), np.asarray(ref), rtol=1e-2, atol=1e-2)
    print("KERNEL_OK")
</pallas_src>

<mosaic_0001>
module attributes {stable_mosaic.version = 11 : i64} {
  func.func @_decoder_block_kernel(%arg0: i32, %arg1: memref<1x8x32xf32, #tpu.memory_space<vmem>>, %arg2: memref<1x8x100xf32, #tpu.memory_space<vmem>>, %arg3: memref<1x32xf32, #tpu.memory_space<vmem>>, %arg4: memref<1x32xf32, #tpu.memory_space<vmem>>, %arg5: memref<1x100xf32, #tpu.memory_space<vmem>>, %arg6: memref<1x100xf32, #tpu.memory_space<vmem>>, %arg7: memref<32x512xf32, #tpu.memory_space<vmem>>, %arg8: memref<32x512xf32, #tpu.memory_space<vmem>>, %arg9: memref<32x512xf32, #tpu.memory_space<vmem>>, %arg10: memref<512x32xf32, #tpu.memory_space<vmem>>, %arg11: memref<32x512xf32, #tpu.memory_space<vmem>>, %arg12: memref<100x512xf32, #tpu.memory_space<vmem>>, %arg13: memref<100x512xf32, #tpu.memory_space<vmem>>, %arg14: memref<8x64x32xbf16, #tpu.memory_space<vmem>>, %arg15: memref<32x512xbf16, #tpu.memory_space<vmem>>, %arg16: memref<1x512xf32, #tpu.memory_space<vmem>>, %arg17: memref<512x32xbf16, #tpu.memory_space<vmem>>, %arg18: memref<1x32xf32, #tpu.memory_space<vmem>>, %arg19: memref<1x8x32xf32, #tpu.memory_space<vmem>>) attributes {dimension_semantics = [#tpu.dimension_semantics<parallel>], iteration_bounds = array<i64: 2>, scalar_prefetch = 0 : i64, scratch_operands = 0 : i64, tpu.core_type = #tpu.core_type<tc>, window_params = [{transform_indices = @transform_0, window_bounds = array<i64: 1, 8, 32>}, {transform_indices = @transform_1, window_bounds = array<i64: 1, 8, 100>}, {pipeline_mode = #tpu.pipeline_mode<synchronous>, transform_indices = @transform_2, window_bounds = array<i64: 1, 32>}, {pipeline_mode = #tpu.pipeline_mode<synchronous>, transform_indices = @transform_3, window_bounds = array<i64: 1, 32>}, {pipeline_mode = #tpu.pipeline_mode<synchronous>, transform_indices = @transform_4, window_bounds = array<i64: 1, 100>}, {pipeline_mode = #tpu.pipeline_mode<synchronous>, transform_indices = @transform_5, window_bounds = array<i64: 1, 100>}, {pipeline_mode = #tpu.pipeline_mode<synchronous>, transform_indices = @transform_6, window_bounds = array<i64: 32, 512>}, {pipeline_mode = #tpu.pipeline_mode<synchronous>, transform_indices = @transform_7, window_bounds = array<i64: 32, 512>}, {pipeline_mode = #tpu.pipeline_mode<synchronous>, transform_indices = @transform_8, window_bounds = array<i64: 32, 512>}, {pipeline_mode = #tpu.pipeline_mode<synchronous>, transform_indices = @transform_9, window_bounds = array<i64: 512, 32>}, {pipeline_mode = #tpu.pipeline_mode<synchronous>, transform_indices = @transform_10, window_bounds = array<i64: 32, 512>}, {pipeline_mode = #tpu.pipeline_mode<synchronous>, transform_indices = @transform_11, window_bounds = array<i64: 100, 512>}, {pipeline_mode = #tpu.pipeline_mode<synchronous>, transform_indices = @transform_12, window_bounds = array<i64: 100, 512>}, {pipeline_mode = #tpu.pipeline_mode<synchronous>, transform_indices = @transform_13, window_bounds = array<i64: 8, 64, 32>}, {pipeline_mode = #tpu.pipeline_mode<synchronous>, transform_indices = @transform_14, window_bounds = array<i64: 32, 512>}, {pipeline_mode = #tpu.pipeline_mode<synchronous>, transform_indices = @transform_15, window_bounds = array<i64: 1, 512>}, {pipeline_mode = #tpu.pipeline_mode<synchronous>, transform_indices = @transform_16, window_bounds = array<i64: 512, 32>}, {pipeline_mode = #tpu.pipeline_mode<synchronous>, transform_indices = @transform_17, window_bounds = array<i64: 1, 32>}, {transform_indices = @transform_18, window_bounds = array<i64: 1, 8, 32>}]} {
    %c0 = arith.constant 0 : index
    %c0_0 = arith.constant 0 : index
    %c0_1 = arith.constant 0 : index
    %0 = vector.load %arg1[%c0, %c0_0, %c0_1] : memref<1x8x32xf32, #tpu.memory_space<vmem>>, vector<1x8x32xf32>
    %1 = vector.shape_cast %0 : vector<1x8x32xf32> to vector<8x32xf32>
    %c0_2 = arith.constant 0 : index
    %c0_3 = arith.constant 0 : index
    %c0_4 = arith.constant 0 : index
    %2 = vector.load %arg2[%c0_2, %c0_3, %c0_4] : memref<1x8x100xf32, #tpu.memory_space<vmem>>, vector<1x8x100xf32>
    %3 = vector.shape_cast %2 : vector<1x8x100xf32> to vector<8x100xf32>
    %c0_5 = arith.constant 0 : index
    %c0_6 = arith.constant 0 : index
    %4 = vector.load %arg3[%c0_5, %c0_6] : memref<1x32xf32, #tpu.memory_space<vmem>>, vector<1x32xf32>
    %c0_7 = arith.constant 0 : index
    %c0_8 = arith.constant 0 : index
    %5 = vector.load %arg4[%c0_7, %c0_8] : memref<1x32xf32, #tpu.memory_space<vmem>>, vector<1x32xf32>
    %c0_9 = arith.constant 0 : index
    %c0_10 = arith.constant 0 : index
    %6 = vector.load %arg5[%c0_9, %c0_10] : memref<1x100xf32, #tpu.memory_space<vmem>>, vector<1x100xf32>
    %c0_11 = arith.constant 0 : index
    %c0_12 = arith.constant 0 : index
    %7 = vector.load %arg6[%c0_11, %c0_12] : memref<1x100xf32, #tpu.memory_space<vmem>>, vector<1x100xf32>
    %cst = arith.constant dense<0.000000e+00> : vector<8xf32>
    %8 = vector.multi_reduction <add>, %1, %cst [1] : vector<8x32xf32> to vector<8xf32>
    %9 = vector.shape_cast %8 : vector<8xf32> to vector<8x1xf32>
    %cst_13 = arith.constant 3.200000e+01 : f32
    %10 = vector.broadcast %cst_13 : f32 to vector<8x1xf32>
    %11 = arith.divf %9, %10 : vector<8x1xf32>
    %12 = vector.broadcast %11 : vector<8x1xf32> to vector<8x32xf32>
    %13 = arith.subf %1, %12 : vector<8x32xf32>
    %14 = arith.mulf %13, %13 : vector<8x32xf32>
    %cst_14 = arith.constant dense<0.000000e+00> : vector<8xf32>
    %15 = vector.multi_reduction <add>, %14, %cst_14 [1] : vector<8x32xf32> to vector<8xf32>
    %16 = vector.shape_cast %15 : vector<8xf32> to vector<8x1xf32>
    %cst_15 = arith.constant 3.200000e+01 : f32
    %17 = vector.broadcast %cst_15 : f32 to vector<8x1xf32>
    %18 = arith.divf %16, %17 : vector<8x1xf32>
    %19 = vector.broadcast %11 : vector<8x1xf32> to vector<8x32xf32>
    %20 = arith.subf %1, %19 : vector<8x32xf32>
    %cst_16 = arith.constant 9.99999974E-6 : f32
    %21 = vector.broadcast %cst_16 : f32 to vector<8x1xf32>
    %22 = arith.addf %18, %21 : vector<8x1xf32>
    %23 = math.rsqrt %22 : vector<8x1xf32>
    %24 = vector.broadcast %23 : vector<8x1xf32> to vector<8x32xf32>
    %25 = arith.mulf %20, %24 : vector<8x32xf32>
    %26 = vector.broadcast %4 : vector<1x32xf32> to vector<8x32xf32>
    %27 = arith.mulf %25, %26 : vector<8x32xf32>
    %28 = vector.broadcast %5 : vector<1x32xf32> to vector<8x32xf32>
    %29 = arith.addf %27, %28 : vector<8x32xf32>
    %c0_17 = arith.constant 0 : index
    %c0_18 = arith.constant 0 : index
    %30 = vector.load %arg7[%c0_17, %c0_18] : memref<32x512xf32, #tpu.memory_space<vmem>>, vector<32x512xf32>
    %c0_19 = arith.constant 0 : index
    %c0_20 = arith.constant 0 : index
    %31 = vector.load %arg8[%c0_19, %c0_20] : memref<32x512xf32, #tpu.memory_space<vmem>>, vector<32x512xf32>
    %c0_21 = arith.constant 0 : index
    %c0_22 = arith.constant 0 : index
    %32 = vector.load %arg9[%c0_21, %c0_22] : memref<32x512xf32, #tpu.memory_space<vmem>>, vector<32x512xf32>
    %c0_23 = arith.constant 0 : index
    %c0_24 = arith.constant 0 : index
    %33 = vector.load %arg10[%c0_23, %c0_24] : memref<512x32xf32, #tpu.memory_space<vmem>>, vector<512x32xf32>
    %cst_25 = arith.constant dense<0.000000e+00> : vector<8x512xf32>
    %34 = tpu.matmul %29, %30, %cst_25 {dimension_numbers = #tpu.dot_dimension_numbers<[1], [0], [0], [1], [0, 0, 1, 1], [], []>} : vector<8x32xf32>, vector<32x512xf32>, vector<8x512xf32> -> vector<8x512xf32>
    %cst_26 = arith.constant dense<0.000000e+00> : vector<8x512xf32>
    %35 = tpu.matmul %29, %31, %cst_26 {dimension_numbers = #tpu.dot_dimension_numbers<[1], [0], [0], [1], [0, 0, 1, 1], [], []>} : vector<8x32xf32>, vector<32x512xf32>, vector<8x512xf32> -> vector<8x512xf32>
    %cst_27 = arith.constant dense<0.000000e+00> : vector<8x512xf32>
    %36 = tpu.matmul %29, %32, %cst_27 {dimension_numbers = #tpu.dot_dimension_numbers<[1], [0], [0], [1], [0, 0, 1, 1], [], []>} : vector<8x32xf32>, vector<32x512xf32>, vector<8x512xf32> -> vector<8x512xf32>
    %37 = vector.shape_cast %34 : vector<8x512xf32> to vector<1x8x512xf32>
    %38 = vector.extract_strided_slice %37 {offsets = [0, 0, 0], sizes = [1, 8, 128], strides = [1, 1, 1]} : vector<1x8x512xf32> to vector<1x8x128xf32>
    %39 = vector.extract_strided_slice %37 {offsets = [0, 0, 128], sizes = [1, 8, 128], strides = [1, 1, 1]} : vector<1x8x512xf32> to vector<1x8x128xf32>
    %40 = vector.extract_strided_slice %37 {offsets = [0, 0, 256], sizes = [1, 8, 128], strides = [1, 1, 1]} : vector<1x8x512xf32> to vector<1x8x128xf32>
    %41 = vector.extract_strided_slice %37 {offsets = [0, 0, 384], sizes = [1, 8, 128], strides = [1, 1, 1]} : vector<1x8x512xf32> to vector<1x8x128xf32>
    %42 = tpu.concatenate %38, %39, %40, %41 in 0 : vector<1x8x128xf32>, vector<1x8x128xf32>, vector<1x8x128xf32>, vector<1x8x128xf32> -> vector<4x8x128xf32>
    %43 = vector.shape_cast %35 : vector<8x512xf32> to vector<1x8x512xf32>
    %44 = vector.extract_strided_slice %43 {offsets = [0, 0, 0], sizes = [1, 8, 128], strides = [1, 1, 1]} : vector<1x8x512xf32> to vector<1x8x128xf32>
    %45 = vector.extract_strided_slice %43 {offsets = [0, 0, 128], sizes = [1, 8, 128], strides = [1, 1, 1]} : vector<1x8x512xf32> to vector<1x8x128xf32>
    %46 = vector.extract_strided_slice %43 {offsets = [0, 0, 256], sizes = [1, 8, 128], strides = [1, 1, 1]} : vector<1x8x512xf32> to vector<1x8x128xf32>
    %47 = vector.extract_strided_slice %43 {offsets = [0, 0, 384], sizes = [1, 8, 128], strides = [1, 1, 1]} : vector<1x8x512xf32> to vector<1x8x128xf32>
    %48 = tpu.concatenate %44, %45, %46, %47 in 0 : vector<1x8x128xf32>, vector<1x8x128xf32>, vector<1x8x128xf32>, vector<1x8x128xf32> -> vector<4x8x128xf32>
    %49 = vector.shape_cast %36 : vector<8x512xf32> to vector<1x8x512xf32>
    %50 = vector.extract_strided_slice %49 {offsets = [0, 0, 0], sizes = [1, 8, 128], strides = [1, 1, 1]} : vector<1x8x512xf32> to vector<1x8x128xf32>
    %51 = vector.extract_strided_slice %49 {offsets = [0, 0, 128], sizes = [1, 8, 128], strides = [1, 1, 1]} : vector<1x8x512xf32> to vector<1x8x128xf32>
    %52 = vector.extract_strided_slice %49 {offsets = [0, 0, 256], sizes = [1, 8, 128], strides = [1, 1, 1]} : vector<1x8x512xf32> to vector<1x8x128xf32>
    %53 = vector.extract_strided_slice %49 {offsets = [0, 0, 384], sizes = [1, 8, 128], strides = [1, 1, 1]} : vector<1x8x512xf32> to vector<1x8x128xf32>
    %54 = tpu.concatenate %50, %51, %52, %53 in 0 : vector<1x8x128xf32>, vector<1x8x128xf32>, vector<1x8x128xf32>, vector<1x8x128xf32> -> vector<4x8x128xf32>
    "tpu.trace_start"() <{level = 10 : i32, message = "bqe,bke->bqk"}> : () -> ()
    %cst_28 = arith.constant dense<0.000000e+00> : vector<4x8x8xf32>
    %55 = tpu.matmul %42, %48, %cst_28 {dimension_numbers = #tpu.dot_dimension_numbers<[2], [2], [1], [1], [0, 0, 0, 1, 1, 1], [0], [0]>} : vector<4x8x128xf32>, vector<4x8x128xf32>, vector<4x8x8xf32> -> vector<4x8x8xf32>
    "tpu.trace_stop"() : () -> ()
    %cst_29 = arith.constant dense<0xFF800000> : vector<4x8xf32>
    %56 = vector.multi_reduction <maximumf>, %55, %cst_29 [2] : vector<4x8x8xf32> to vector<4x8xf32>
    %57 = vector.shape_cast %56 : vector<4x8xf32> to vector<4x8x1xf32>
    %58 = vector.broadcast %57 : vector<4x8x1xf32> to vector<4x8x8xf32>
    %59 = arith.subf %55, %58 : vector<4x8x8xf32>
    %60 = math.exp %59 : vector<4x8x8xf32>
    %cst_30 = arith.constant dense<0.000000e+00> : vector<4x8xf32>
    %61 = vector.multi_reduction <add>, %60, %cst_30 [2] : vector<4x8x8xf32> to vector<4x8xf32>
    %62 = vector.shape_cast %61 : vector<4x8xf32> to vector<4x8x1xf32>
    %63 = tpu.reciprocal %62 {approx = true} : vector<4x8x1xf32> -> vector<4x8x1xf32>
    %64 = vector.broadcast %63 : vector<4x8x1xf32> to vector<4x8x8xf32>
    %65 = arith.mulf %60, %64 : vector<4x8x8xf32>
    %cst_31 = arith.constant 0.000000e+00 : f32
    %66 = vector.broadcast %cst_31 : f32 to vector<4x8x8xf32>
    %67 = arith.cmpf ogt, %55, %66 : vector<4x8x8xf32>
    %cst_32 = arith.constant 0.000000e+00 : f32
    %68 = vector.broadcast %cst_32 : f32 to vector<4x8x8xf32>
    %69 = arith.select %67, %65, %68 : vector<4x8x8xi1>, vector<4x8x8xf32>
    "tpu.trace_start"() <{level = 10 : i32, message = "bqk,bke->bqe"}> : () -> ()
    %cst_33 = arith.constant dense<0.000000e+00> : vector<4x8x128xf32>
    %70 = tpu.matmul %69, %54, %cst_33 {dimension_numbers = #tpu.dot_dimension_numbers<[2], [1], [1], [2], [0, 0, 0, 1, 1, 2], [0], [0]>} : vector<4x8x8xf32>, vector<4x8x128xf32>, vector<4x8x128xf32> -> vector<4x8x128xf32>
    "tpu.trace_stop"() : () -> ()
    %71 = vector.extract_strided_slice %70 {offsets = [0, 0, 0], sizes = [1, 8, 128], strides = [1, 1, 1]} : vector<4x8x128xf32> to vector<1x8x128xf32>
    %72 = vector.extract_strided_slice %70 {offsets = [1, 0, 0], sizes = [1, 8, 128], strides = [1, 1, 1]} : vector<4x8x128xf32> to vector<1x8x128xf32>
    %73 = vector.extract_strided_slice %70 {offsets = [2, 0, 0], sizes = [1, 8, 128], strides = [1, 1, 1]} : vector<4x8x128xf32> to vector<1x8x128xf32>
    %74 = vector.extract_strided_slice %70 {offsets = [3, 0, 0], sizes = [1, 8, 128], strides = [1, 1, 1]} : vector<4x8x128xf32> to vector<1x8x128xf32>
    %75 = tpu.concatenate %71, %72, %73, %74 in 2 : vector<1x8x128xf32>, vector<1x8x128xf32>, vector<1x8x128xf32>, vector<1x8x128xf32> -> vector<1x8x512xf32>
    %76 = vector.shape_cast %75 : vector<1x8x512xf32> to vector<8x512xf32>
    %cst_34 = arith.constant dense<0.000000e+00> : vector<8x32xf32>
    %77 = tpu.matmul %76, %33, %cst_34 {dimension_numbers = #tpu.dot_dimension_numbers<[1], [0], [0], [1], [0, 0, 1, 1], [], []>} : vector<8x512xf32>, vector<512x32xf32>, vector<8x32xf32> -> vector<8x32xf32>
    %78 = arith.addf %1, %77 : vector<8x32xf32>
    %cst_35 = arith.constant dense<0.000000e+00> : vector<8xf32>
    %79 = vector.multi_reduction <add>, %78, %cst_35 [1] : vector<8x32xf32> to vector<8xf32>
    %80 = vector.shape_cast %79 : vector<8xf32> to vector<8x1xf32>
    %cst_36 = arith.constant 3.200000e+01 : f32
    %81 = vector.broadcast %cst_36 : f32 to vector<8x1xf32>
    %82 = arith.divf %80, %81 : vector<8x1xf32>
    %83 = vector.broadcast %82 : vector<8x1xf32> to vector<8x32xf32>
    %84 = arith.subf %78, %83 : vector<8x32xf32>
    %85 = arith.mulf %84, %84 : vector<8x32xf32>
    %cst_37 = arith.constant dense<0.000000e+00> : vector<8xf32>
    %86 = vector.multi_reduction <add>, %85, %cst_37 [1] : vector<8x32xf32> to vector<8xf32>
    %87 = vector.shape_cast %86 : vector<8xf32> to vector<8x1xf32>
    %cst_38 = arith.constant 3.200000e+01 : f32
    %88 = vector.broadcast %cst_38 : f32 to vector<8x1xf32>
    %89 = arith.divf %87, %88 : vector<8x1xf32>
    %90 = vector.broadcast %82 : vector<8x1xf32> to vector<8x32xf32>
    %91 = arith.subf %78, %90 : vector<8x32xf32>
    %cst_39 = arith.constant 9.99999974E-6 : f32
    %92 = vector.broadcast %cst_39 : f32 to vector<8x1xf32>
    %93 = arith.addf %89, %92 : vector<8x1xf32>
    %94 = math.rsqrt %93 : vector<8x1xf32>
    %95 = vector.broadcast %94 : vector<8x1xf32> to vector<8x32xf32>
    %96 = arith.mulf %91, %95 : vector<8x32xf32>
    %97 = vector.broadcast %4 : vector<1x32xf32> to vector<8x32xf32>
    %98 = arith.mulf %96, %97 : vector<8x32xf32>
    %99 = vector.broadcast %5 : vector<1x32xf32> to vector<8x32xf32>
    %100 = arith.addf %98, %99 : vector<8x32xf32>
    %cst_40 = arith.constant dense<0.000000e+00> : vector<8xf32>
    %101 = vector.multi_reduction <add>, %3, %cst_40 [1] : vector<8x100xf32> to vector<8xf32>
    %102 = vector.shape_cast %101 : vector<8xf32> to vector<8x1xf32>
    %cst_41 = arith.constant 1.000000e+02 : f32
    %103 = vector.broadcast %cst_41 : f32 to vector<8x1xf32>
    %104 = arith.divf %102, %103 : vector<8x1xf32>
    %105 = vector.broadcast %104 : vector<8x1xf32> to vector<8x100xf32>
    %106 = arith.subf %3, %105 : vector<8x100xf32>
    %107 = arith.mulf %106, %106 : vector<8x100xf32>
    %cst_42 = arith.constant dense<0.000000e+00> : vector<8xf32>
    %108 = vector.multi_reduction <add>, %107, %cst_42 [1] : vector<8x100xf32> to vector<8xf32>
    %109 = vector.shape_cast %108 : vector<8xf32> to vector<8x1xf32>
    %cst_43 = arith.constant 1.000000e+02 : f32
    %110 = vector.broadcast %cst_43 : f32 to vector<8x1xf32>
    %111 = arith.divf %109, %110 : vector<8x1xf32>
    %112 = vector.broadcast %104 : vector<8x1xf32> to vector<8x100xf32>
    %113 = arith.subf %3, %112 : vector<8x100xf32>
    %cst_44 = arith.constant 9.99999974E-6 : f32
    %114 = vector.broadcast %cst_44 : f32 to vector<8x1xf32>
    %115 = arith.addf %111, %114 : vector<8x1xf32>
    %116 = math.rsqrt %115 : vector<8x1xf32>
    %117 = vector.broadcast %116 : vector<8x1xf32> to vector<8x100xf32>
    %118 = arith.mulf %113, %117 : vector<8x100xf32>
    %119 = vector.broadcast %6 : vector<1x100xf32> to vector<8x100xf32>
    %120 = arith.mulf %118, %119 : vector<8x100xf32>
    %121 = vector.broadcast %7 : vector<1x100xf32> to vector<8x100xf32>
    %122 = arith.addf %120, %121 : vector<8x100xf32>
    %c0_45 = arith.constant 0 : index
    %c0_46 = arith.constant 0 : index
    %123 = vector.load %arg11[%c0_45, %c0_46] : memref<32x512xf32, #tpu.memory_space<vmem>>, vector<32x512xf32>
    %c0_47 = arith.constant 0 : index
    %c0_48 = arith.constant 0 : index
    %124 = vector.load %arg12[%c0_47, %c0_48] : memref<100x512xf32, #tpu.memory_space<vmem>>, vector<100x512xf32>
    %c0_49 = arith.constant 0 : index
    %c0_50 = arith.constant 0 : index
    %125 = vector.load %arg13[%c0_49, %c0_50] : memref<100x512xf32, #tpu.memory_space<vmem>>, vector<100x512xf32>
    %c0_51 = arith.constant 0 : index
    %c0_52 = arith.constant 0 : index
    %c0_53 = arith.constant 0 : index
    %126 = vector.load %arg14[%c0_51, %c0_52, %c0_53] : memref<8x64x32xbf16, #tpu.memory_space<vmem>>, vector<8x64x32xbf16>
    %cst_54 = arith.constant dense<0.000000e+00> : vector<8x512xf32>
    %127 = tpu.matmul %100, %123, %cst_54 {dimension_numbers = #tpu.dot_dimension_numbers<[1], [0], [0], [1], [0, 0, 1, 1], [], []>} : vector<8x32xf32>, vector<32x512xf32>, vector<8x512xf32> -> vector<8x512xf32>
    %cst_55 = arith.constant dense<0.000000e+00> : vector<8x512xf32>
    %128 = tpu.matmul %122, %124, %cst_55 {dimension_numbers = #tpu.dot_dimension_numbers<[1], [0], [0], [1], [0, 0, 1, 1], [], []>} : vector<8x100xf32>, vector<100x512xf32>, vector<8x512xf32> -> vector<8x512xf32>
    %cst_56 = arith.constant dense<0.000000e+00> : vector<8x512xf32>
    %129 = tpu.matmul %122, %125, %cst_56 {dimension_numbers = #tpu.dot_dimension_numbers<[1], [0], [0], [1], [0, 0, 1, 1], [], []>} : vector<8x100xf32>, vector<100x512xf32>, vector<8x512xf32> -> vector<8x512xf32>
    %130 = vector.shape_cast %127 : vector<8x512xf32> to vector<1x8x512xf32>
    %131 = vector.extract_strided_slice %130 {offsets = [0, 0, 0], sizes = [1, 8, 64], strides = [1, 1, 1]} : vector<1x8x512xf32> to vector<1x8x64xf32>
    %132 = vector.extract_strided_slice %130 {offsets = [0, 0, 64], sizes = [1, 8, 64], strides = [1, 1, 1]} : vector<1x8x512xf32> to vector<1x8x64xf32>
    %133 = vector.extract_strided_slice %130 {offsets = [0, 0, 128], sizes = [1, 8, 64], strides = [1, 1, 1]} : vector<1x8x512xf32> to vector<1x8x64xf32>
    %134 = vector.extract_strided_slice %130 {offsets = [0, 0, 192], sizes = [1, 8, 64], strides = [1, 1, 1]} : vector<1x8x512xf32> to vector<1x8x64xf32>
    %135 = vector.extract_strided_slice %130 {offsets = [0, 0, 256], sizes = [1, 8, 64], strides = [1, 1, 1]} : vector<1x8x512xf32> to vector<1x8x64xf32>
    %136 = vector.extract_strided_slice %130 {offsets = [0, 0, 320], sizes = [1, 8, 64], strides = [1, 1, 1]} : vector<1x8x512xf32> to vector<1x8x64xf32>
    %137 = vector.extract_strided_slice %130 {offsets = [0, 0, 384], sizes = [1, 8, 64], strides = [1, 1, 1]} : vector<1x8x512xf32> to vector<1x8x64xf32>
    %138 = vector.extract_strided_slice %130 {offsets = [0, 0, 448], sizes = [1, 8, 64], strides = [1, 1, 1]} : vector<1x8x512xf32> to vector<1x8x64xf32>
    %139 = tpu.concatenate %131, %132, %133, %134, %135, %136, %137, %138 in 0 : vector<1x8x64xf32>, vector<1x8x64xf32>, vector<1x8x64xf32>, vector<1x8x64xf32>, vector<1x8x64xf32>, vector<1x8x64xf32>, vector<1x8x64xf32>, vector<1x8x64xf32> -> vector<8x8x64xf32>
    %140 = vector.shape_cast %128 : vector<8x512xf32> to vector<1x8x512xf32>
    %141 = vector.extract_strided_slice %140 {offsets = [0, 0, 0], sizes = [1, 8, 64], strides = [1, 1, 1]} : vector<1x8x512xf32> to vector<1x8x64xf32>
    %142 = vector.extract_strided_slice %140 {offsets = [0, 0, 64], sizes = [1, 8, 64], strides = [1, 1, 1]} : vector<1x8x512xf32> to vector<1x8x64xf32>
    %143 = vector.extract_strided_slice %140 {offsets = [0, 0, 128], sizes = [1, 8, 64], strides = [1, 1, 1]} : vector<1x8x512xf32> to vector<1x8x64xf32>
    %144 = vector.extract_strided_slice %140 {offsets = [0, 0, 192], sizes = [1, 8, 64], strides = [1, 1, 1]} : vector<1x8x512xf32> to vector<1x8x64xf32>
    %145 = vector.extract_strided_slice %140 {offsets = [0, 0, 256], sizes = [1, 8, 64], strides = [1, 1, 1]} : vector<1x8x512xf32> to vector<1x8x64xf32>
    %146 = vector.extract_strided_slice %140 {offsets = [0, 0, 320], sizes = [1, 8, 64], strides = [1, 1, 1]} : vector<1x8x512xf32> to vector<1x8x64xf32>
    %147 = vector.extract_strided_slice %140 {offsets = [0, 0, 384], sizes = [1, 8, 64], strides = [1, 1, 1]} : vector<1x8x512xf32> to vector<1x8x64xf32>
    %148 = vector.extract_strided_slice %140 {offsets = [0, 0, 448], sizes = [1, 8, 64], strides = [1, 1, 1]} : vector<1x8x512xf32> to vector<1x8x64xf32>
    %149 = tpu.concatenate %141, %142, %143, %144, %145, %146, %147, %148 in 0 : vector<1x8x64xf32>, vector<1x8x64xf32>, vector<1x8x64xf32>, vector<1x8x64xf32>, vector<1x8x64xf32>, vector<1x8x64xf32>, vector<1x8x64xf32>, vector<1x8x64xf32> -> vector<8x8x64xf32>
    %150 = vector.shape_cast %129 : vector<8x512xf32> to vector<1x8x512xf32>
    %151 = vector.extract_strided_slice %150 {offsets = [0, 0, 0], sizes = [1, 8, 64], strides = [1, 1, 1]} : vector<1x8x512xf32> to vector<1x8x64xf32>
    %152 = vector.extract_strided_slice %150 {offsets = [0, 0, 64], sizes = [1, 8, 64], strides = [1, 1, 1]} : vector<1x8x512xf32> to vector<1x8x64xf32>
    %153 = vector.extract_strided_slice %150 {offsets = [0, 0, 128], sizes = [1, 8, 64], strides = [1, 1, 1]} : vector<1x8x512xf32> to vector<1x8x64xf32>
    %154 = vector.extract_strided_slice %150 {offsets = [0, 0, 192], sizes = [1, 8, 64], strides = [1, 1, 1]} : vector<1x8x512xf32> to vector<1x8x64xf32>
    %155 = vector.extract_strided_slice %150 {offsets = [0, 0, 256], sizes = [1, 8, 64], strides = [1, 1, 1]} : vector<1x8x512xf32> to vector<1x8x64xf32>
    %156 = vector.extract_strided_slice %150 {offsets = [0, 0, 320], sizes = [1, 8, 64], strides = [1, 1, 1]} : vector<1x8x512xf32> to vector<1x8x64xf32>
    %157 = vector.extract_strided_slice %150 {offsets = [0, 0, 384], sizes = [1, 8, 64], strides = [1, 1, 1]} : vector<1x8x512xf32> to vector<1x8x64xf32>
    %158 = vector.extract_strided_slice %150 {offsets = [0, 0, 448], sizes = [1, 8, 64], strides = [1, 1, 1]} : vector<1x8x512xf32> to vector<1x8x64xf32>
    %159 = tpu.concatenate %151, %152, %153, %154, %155, %156, %157, %158 in 0 : vector<1x8x64xf32>, vector<1x8x64xf32>, vector<1x8x64xf32>, vector<1x8x64xf32>, vector<1x8x64xf32>, vector<1x8x64xf32>, vector<1x8x64xf32>, vector<1x8x64xf32> -> vector<8x8x64xf32>
    "tpu.trace_start"() <{level = 10 : i32, message = "bqe,bke->bqk"}> : () -> ()
    %cst_57 = arith.constant dense<0.000000e+00> : vector<8x8x8xf32>
    %160 = tpu.matmul %139, %149, %cst_57 {dimension_numbers = #tpu.dot_dimension_numbers<[2], [2], [1], [1], [0, 0, 0, 1, 1, 1], [0], [0]>} : vector<8x8x64xf32>, vector<8x8x64xf32>, vector<8x8x8xf32> -> vector<8x8x8xf32>
    "tpu.trace_stop"() : () -> ()
    %cst_58 = arith.constant dense<0xFF800000> : vector<8x8xf32>
    %161 = vector.multi_reduction <maximumf>, %160, %cst_58 [2] : vector<8x8x8xf32> to vector<8x8xf32>
    %162 = vector.shape_cast %161 : vector<8x8xf32> to vector<8x8x1xf32>
    %163 = vector.broadcast %162 : vector<8x8x1xf32> to vector<8x8x8xf32>
    %164 = arith.subf %160, %163 : vector<8x8x8xf32>
    %165 = math.exp %164 : vector<8x8x8xf32>
    %cst_59 = arith.constant dense<0.000000e+00> : vector<8x8xf32>
    %166 = vector.multi_reduction <add>, %165, %cst_59 [2] : vector<8x8x8xf32> to vector<8x8xf32>
    %167 = vector.shape_cast %166 : vector<8x8xf32> to vector<8x8x1xf32>
    %168 = tpu.reciprocal %167 {approx = true} : vector<8x8x1xf32> -> vector<8x8x1xf32>
    %169 = vector.broadcast %168 : vector<8x8x1xf32> to vector<8x8x8xf32>
    %170 = arith.mulf %165, %169 : vector<8x8x8xf32>
    %cst_60 = arith.constant 0.000000e+00 : f32
    %171 = vector.broadcast %cst_60 : f32 to vector<8x8x8xf32>
    %172 = arith.cmpf ogt, %160, %171 : vector<8x8x8xf32>
    %cst_61 = arith.constant 0.000000e+00 : f32
    %173 = vector.broadcast %cst_61 : f32 to vector<8x8x8xf32>
    %174 = arith.select %172, %170, %173 : vector<8x8x8xi1>, vector<8x8x8xf32>
    %175 = arith.truncf %174 : vector<8x8x8xf32> to vector<8x8x8xbf16>
    %176 = arith.truncf %159 : vector<8x8x64xf32> to vector<8x8x64xbf16>
    "tpu.trace_start"() <{level = 10 : i32, message = "bqk,bke->bqe"}> : () -> ()
    %cst_62 = arith.constant dense<0.000000e+00> : vector<8x8x64xf32>
    %177 = tpu.matmul %175, %176, %cst_62 {dimension_numbers = #tpu.dot_dimension_numbers<[2], [1], [1], [2], [0, 0, 0, 1, 1, 2], [0], [0]>} : vector<8x8x8xbf16>, vector<8x8x64xbf16>, vector<8x8x64xf32> -> vector<8x8x64xf32>
    "tpu.trace_stop"() : () -> ()
    %178 = arith.truncf %177 : vector<8x8x64xf32> to vector<8x8x64xbf16>
    "tpu.trace_start"() <{level = 10 : i32, message = "hme,hed->hmd"}> : () -> ()
    %cst_63 = arith.constant dense<0.000000e+00> : vector<8x8x32xf32>
    %179 = tpu.matmul %178, %126, %cst_63 {dimension_numbers = #tpu.dot_dimension_numbers<[2], [1], [1], [2], [0, 0, 0, 1, 1, 2], [0], [0]>} : vector<8x8x64xbf16>, vector<8x64x32xbf16>, vector<8x8x32xf32> -> vector<8x8x32xf32>
    "tpu.trace_stop"() : () -> ()
    %cst_64 = arith.constant dense<0.000000e+00> : vector<8x32xf32>
    %180 = vector.multi_reduction <add>, %179, %cst_64 [0] : vector<8x8x32xf32> to vector<8x32xf32>
    %181 = arith.addf %78, %180 : vector<8x32xf32>
    %cst_65 = arith.constant dense<0.000000e+00> : vector<8xf32>
    %182 = vector.multi_reduction <add>, %181, %cst_65 [1] : vector<8x32xf32> to vector<8xf32>
    %183 = vector.shape_cast %182 : vector<8xf32> to vector<8x1xf32>
    %cst_66 = arith.constant 3.200000e+01 : f32
    %184 = vector.broadcast %cst_66 : f32 to vector<8x1xf32>
    %185 = arith.divf %183, %184 : vector<8x1xf32>
    %186 = vector.broadcast %185 : vector<8x1xf32> to vector<8x32xf32>
    %187 = arith.subf %181, %186 : vector<8x32xf32>
    %188 = arith.mulf %187, %187 : vector<8x32xf32>
    %cst_67 = arith.constant dense<0.000000e+00> : vector<8xf32>
    %189 = vector.multi_reduction <add>, %188, %cst_67 [1] : vector<8x32xf32> to vector<8xf32>
    %190 = vector.shape_cast %189 : vector<8xf32> to vector<8x1xf32>
    %cst_68 = arith.constant 3.200000e+01 : f32
    %191 = vector.broadcast %cst_68 : f32 to vector<8x1xf32>
    %192 = arith.divf %190, %191 : vector<8x1xf32>
    %193 = vector.broadcast %185 : vector<8x1xf32> to vector<8x32xf32>
    %194 = arith.subf %181, %193 : vector<8x32xf32>
    %cst_69 = arith.constant 9.99999974E-6 : f32
    %195 = vector.broadcast %cst_69 : f32 to vector<8x1xf32>
    %196 = arith.addf %192, %195 : vector<8x1xf32>
    %197 = math.rsqrt %196 : vector<8x1xf32>
    %198 = vector.broadcast %197 : vector<8x1xf32> to vector<8x32xf32>
    %199 = arith.mulf %194, %198 : vector<8x32xf32>
    %200 = vector.broadcast %4 : vector<1x32xf32> to vector<8x32xf32>
    %201 = arith.mulf %199, %200 : vector<8x32xf32>
    %202 = vector.broadcast %5 : vector<1x32xf32> to vector<8x32xf32>
    %203 = arith.addf %201, %202 : vector<8x32xf32>
    %204 = arith.truncf %203 : vector<8x32xf32> to vector<8x32xbf16>
    %c0_70 = arith.constant 0 : index
    %c0_71 = arith.constant 0 : index
    %205 = vector.load %arg15[%c0_70, %c0_71] : memref<32x512xbf16, #tpu.memory_space<vmem>>, vector<32x512xbf16>
    %cst_72 = arith.constant dense<0.000000e+00> : vector<8x512xf32>
    %206 = tpu.matmul %204, %205, %cst_72 {dimension_numbers = #tpu.dot_dimension_numbers<[1], [0], [0], [1], [0, 0, 1, 1], [], []>} : vector<8x32xbf16>, vector<32x512xbf16>, vector<8x512xf32> -> vector<8x512xf32>
    %c0_73 = arith.constant 0 : index
    %c0_74 = arith.constant 0 : index
    %207 = vector.load %arg16[%c0_73, %c0_74] : memref<1x512xf32, #tpu.memory_space<vmem>>, vector<1x512xf32>
    %208 = vector.broadcast %207 : vector<1x512xf32> to vector<8x512xf32>
    %209 = arith.addf %206, %208 : vector<8x512xf32>
    %cst_75 = arith.constant 5.000000e-01 : f32
    %210 = vector.broadcast %cst_75 : f32 to vector<8x512xf32>
    %211 = arith.mulf %210, %209 : vector<8x512xf32>
    %cst_76 = arith.constant 0.707106769 : f32
    %212 = vector.broadcast %cst_76 : f32 to vector<8x512xf32>
    %213 = arith.mulf %209, %212 : vector<8x512xf32>
    %214 = math.absf %213 : vector<8x512xf32>
    %cst_77 = arith.constant 0.327591091 : f32
    %215 = vector.broadcast %cst_77 : f32 to vector<8x512xf32>
    %216 = arith.mulf %215, %214 : vector<8x512xf32>
    %cst_78 = arith.constant 1.000000e+00 : f32
    %217 = vector.broadcast %cst_78 : f32 to vector<8x512xf32>
    %218 = arith.addf %217, %216 : vector<8x512xf32>
    %219 = tpu.reciprocal %218 {approx = true} : vector<8x512xf32> -> vector<8x512xf32>
    %cst_79 = arith.constant 1.06140542 : f32
    %220 = vector.broadcast %cst_79 : f32 to vector<8x512xf32>
    %221 = arith.mulf %219, %220 : vector<8x512xf32>
    %cst_80 = arith.constant -1.45315206 : f32
    %222 = vector.broadcast %cst_80 : f32 to vector<8x512xf32>
    %223 = arith.addf %222, %221 : vector<8x512xf32>
    %224 = arith.mulf %219, %223 : vector<8x512xf32>
    %cst_81 = arith.constant 1.42141378 : f32
    %225 = vector.broadcast %cst_81 : f32 to vector<8x512xf32>
    %226 = arith.addf %225, %224 : vector<8x512xf32>
    %227 = arith.mulf %219, %226 : vector<8x512xf32>
    %cst_82 = arith.constant -0.284496725 : f32
    %228 = vector.broadcast %cst_82 : f32 to vector<8x512xf32>
    %229 = arith.addf %228, %227 : vector<8x512xf32>
    %230 = arith.mulf %219, %229 : vector<8x512xf32>
    %cst_83 = arith.constant 0.254829586 : f32
    %231 = vector.broadcast %cst_83 : f32 to vector<8x512xf32>
    %232 = arith.addf %231, %230 : vector<8x512xf32>
    %233 = arith.mulf %219, %232 : vector<8x512xf32>
    %cst_84 = arith.constant 0.000000e+00 : f32
    %234 = vector.broadcast %cst_84 : f32 to vector<8x512xf32>
    %235 = arith.subf %234, %214 : vector<8x512xf32>
    %236 = arith.mulf %235, %214 : vector<8x512xf32>
    %237 = math.exp %236 : vector<8x512xf32>
    %238 = arith.mulf %233, %237 : vector<8x512xf32>
    %cst_85 = arith.constant 1.000000e+00 : f32
    %239 = vector.broadcast %cst_85 : f32 to vector<8x512xf32>
    %240 = arith.subf %239, %238 : vector<8x512xf32>
    %cst_86 = arith.constant 0.000000e+00 : f32
    %241 = vector.broadcast %cst_86 : f32 to vector<8x512xf32>
    %242 = arith.cmpf olt, %213, %241 : vector<8x512xf32>
    %cst_87 = arith.constant 0.000000e+00 : f32
    %243 = vector.broadcast %cst_87 : f32 to vector<8x512xf32>
    %244 = arith.subf %243, %240 : vector<8x512xf32>
    %245 = arith.select %242, %244, %240 : vector<8x512xi1>, vector<8x512xf32>
    %cst_88 = arith.constant 1.000000e+00 : f32
    %246 = vector.broadcast %cst_88 : f32 to vector<8x512xf32>
    %247 = arith.addf %246, %245 : vector<8x512xf32>
    %248 = arith.mulf %211, %247 : vector<8x512xf32>
    %249 = arith.truncf %248 : vector<8x512xf32> to vector<8x512xbf16>
    %c0_89 = arith.constant 0 : index
    %c0_90 = arith.constant 0 : index
    %250 = vector.load %arg17[%c0_89, %c0_90] : memref<512x32xbf16, #tpu.memory_space<vmem>>, vector<512x32xbf16>
    %cst_91 = arith.constant dense<0.000000e+00> : vector<8x32xf32>
    %251 = tpu.matmul %249, %250, %cst_91 {dimension_numbers = #tpu.dot_dimension_numbers<[1], [0], [0], [1], [0, 0, 1, 1], [], []>} : vector<8x512xbf16>, vector<512x32xbf16>, vector<8x32xf32> -> vector<8x32xf32>
    %c0_92 = arith.constant 0 : index
    %c0_93 = arith.constant 0 : index
    %252 = vector.load %arg18[%c0_92, %c0_93] : memref<1x32xf32, #tpu.memory_space<vmem>>, vector<1x32xf32>
    %253 = vector.broadcast %252 : vector<1x32xf32> to vector<8x32xf32>
    %254 = arith.addf %251, %253 : vector<8x32xf32>
    %255 = arith.addf %181, %254 : vector<8x32xf32>
    %256 = vector.shape_cast %255 : vector<8x32xf32> to vector<1x8x32xf32>
    %c0_94 = arith.constant 0 : index
    %c0_95 = arith.constant 0 : index
    %c0_96 = arith.constant 0 : index
    %257 = vector.load %arg19[%c0_94, %c0_95, %c0_96] : memref<1x8x32xf32, #tpu.memory_space<vmem>>, vector<1x8x32xf32>
    tpu.vector_store %arg19[%c0_94, %c0_95, %c0_96], %256 {strides = array<i32>} : memref<1x8x32xf32, #tpu.memory_space<vmem>>, vector<1x8x32xf32>,
    return
  }
  func.func @transform_0(%arg0: i32) -> (i32, i32, i32) {
    %c0_i32 = arith.constant 0 : i32
    %c0_i32_0 = arith.constant 0 : i32
    %c0_i32_1 = arith.constant 0 : i32
    return %arg0, %c0_i32, %c0_i32_0 : i32, i32, i32
  }
  func.func @transform_1(%arg0: i32) -> (i32, i32, i32) {
    %c0_i32 = arith.constant 0 : i32
    %c0_i32_0 = arith.constant 0 : i32
    %c0_i32_1 = arith.constant 0 : i32
    return %arg0, %c0_i32, %c0_i32_0 : i32, i32, i32
  }
  func.func @transform_2(%arg0: i32) -> (i32, i32) {
    %c0_i32 = arith.constant 0 : i32
    %c0_i32_0 = arith.constant 0 : i32
    %c0_i32_1 = arith.constant 0 : i32
    return %c0_i32, %c0_i32_0 : i32, i32
  }
  func.func @transform_3(%arg0: i32) -> (i32, i32) {
    %c0_i32 = arith.constant 0 : i32
    %c0_i32_0 = arith.constant 0 : i32
    %c0_i32_1 = arith.constant 0 : i32
    return %c0_i32, %c0_i32_0 : i32, i32
  }
  func.func @transform_4(%arg0: i32) -> (i32, i32) {
    %c0_i32 = arith.constant 0 : i32
    %c0_i32_0 = arith.constant 0 : i32
    %c0_i32_1 = arith.constant 0 : i32
    return %c0_i32, %c0_i32_0 : i32, i32
  }
  func.func @transform_5(%arg0: i32) -> (i32, i32) {
    %c0_i32 = arith.constant 0 : i32
    %c0_i32_0 = arith.constant 0 : i32
    %c0_i32_1 = arith.constant 0 : i32
    return %c0_i32, %c0_i32_0 : i32, i32
  }
  func.func @transform_6(%arg0: i32) -> (i32, i32) {
    %c0_i32 = arith.constant 0 : i32
    %c0_i32_0 = arith.constant 0 : i32
    %c0_i32_1 = arith.constant 0 : i32
    return %c0_i32, %c0_i32_0 : i32, i32
  }
  func.func @transform_7(%arg0: i32) -> (i32, i32) {
    %c0_i32 = arith.constant 0 : i32
    %c0_i32_0 = arith.constant 0 : i32
    %c0_i32_1 = arith.constant 0 : i32
    return %c0_i32, %c0_i32_0 : i32, i32
  }
  func.func @transform_8(%arg0: i32) -> (i32, i32) {
    %c0_i32 = arith.constant 0 : i32
    %c0_i32_0 = arith.constant 0 : i32
    %c0_i32_1 = arith.constant 0 : i32
    return %c0_i32, %c0_i32_0 : i32, i32
  }
  func.func @transform_9(%arg0: i32) -> (i32, i32) {
    %c0_i32 = arith.constant 0 : i32
    %c0_i32_0 = arith.constant 0 : i32
    %c0_i32_1 = arith.constant 0 : i32
    return %c0_i32, %c0_i32_0 : i32, i32
  }
  func.func @transform_10(%arg0: i32) -> (i32, i32) {
    %c0_i32 = arith.constant 0 : i32
    %c0_i32_0 = arith.constant 0 : i32
    %c0_i32_1 = arith.constant 0 : i32
    return %c0_i32, %c0_i32_0 : i32, i32
  }
  func.func @transform_11(%arg0: i32) -> (i32, i32) {
    %c0_i32 = arith.constant 0 : i32
    %c0_i32_0 = arith.constant 0 : i32
    %c0_i32_1 = arith.constant 0 : i32
    return %c0_i32, %c0_i32_0 : i32, i32
  }
  func.func @transform_12(%arg0: i32) -> (i32, i32) {
    %c0_i32 = arith.constant 0 : i32
    %c0_i32_0 = arith.constant 0 : i32
    %c0_i32_1 = arith.constant 0 : i32
    return %c0_i32, %c0_i32_0 : i32, i32
  }
  func.func @transform_13(%arg0: i32) -> (i32, i32, i32) {
    %c0_i32 = arith.constant 0 : i32
    %c0_i32_0 = arith.constant 0 : i32
    %c0_i32_1 = arith.constant 0 : i32
    %c0_i32_2 = arith.constant 0 : i32
    return %c0_i32, %c0_i32_0, %c0_i32_1 : i32, i32, i32
  }
  func.func @transform_14(%arg0: i32) -> (i32, i32) {
    %c0_i32 = arith.constant 0 : i32
    %c0_i32_0 = arith.constant 0 : i32
    %c0_i32_1 = arith.constant 0 : i32
    return %c0_i32, %c0_i32_0 : i32, i32
  }
  func.func @transform_15(%arg0: i32) -> (i32, i32) {
    %c0_i32 = arith.constant 0 : i32
    %c0_i32_0 = arith.constant 0 : i32
    %c0_i32_1 = arith.constant 0 : i32
    return %c0_i32, %c0_i32_0 : i32, i32
  }
  func.func @transform_16(%arg0: i32) -> (i32, i32) {
    %c0_i32 = arith.constant 0 : i32
    %c0_i32_0 = arith.constant 0 : i32
    %c0_i32_1 = arith.constant 0 : i32
    return %c0_i32, %c0_i32_0 : i32, i32
  }
  func.func @transform_17(%arg0: i32) -> (i32, i32) {
    %c0_i32 = arith.constant 0 : i32
    %c0_i32_0 = arith.constant 0 : i32
    %c0_i32_1 = arith.constant 0 : i32
    return %c0_i32, %c0_i32_0 : i32, i32
  }
  func.func @transform_18(%arg0: i32) -> (i32, i32, i32) {
    %c0_i32 = arith.constant 0 : i32
    %c0_i32_0 = arith.constant 0 : i32
    %c0_i32_1 = arith.constant 0 : i32
    return %arg0, %c0_i32, %c0_i32_0 : i32, i32, i32
  }
}

</mosaic_0001>

<bundles_post_ra>
// kernel: tpu_custom_call.1
= control target key start
LH: loop header
LB: loop body
LE: loop exit
PB: predicated region body
PF: predicated region fallthrough
CT: control target
= control target key end

     0   :  { %s8198_s0 = inlined_call_operand.hbm [shape: f32[2,8,32], index: 0, kind: input, shape index: {}]   ;;  %s8199_s1 = inlined_call_operand.hbm [shape: f32[2,8,100], index: 1, kind: input, shape index: {}]   ;;  %s8200_s2 = inlined_call_operand.hbm [shape: f32[1,32], index: 2, kind: input, shape index: {}]   ;;  %s8201_s3 = inlined_call_operand.hbm [shape: f32[1,32], index: 3, kind: input, shape index: {}]   ;;  %s8202_s4 = inlined_call_operand.vmem [shape: f32[1,100], index: 4, kind: input, shape index: {}]   ;;  %s8203_s5 = inlined_call_operand.vmem [shape: f32[1,100], index: 5, kind: input, shape index: {}]   ;;  %s8204_s6 = inlined_call_operand.vmem [shape: f32[32,512], index: 6, kind: input, shape index: {}]   ;;  %s8205_s7 = inlined_call_operand.vmem [shape: f32[32,512], index: 7, kind: input, shape index: {}]   ;;  %s8206_s8 = inlined_call_operand.vmem [shape: f32[32,512], index: 8, kind: input, shape index: {}]   ;;  %s8207_s9 = inlined_call_operand.vmem [shape: f32[512,32], index: 9, kind: input, shape index: {}]   ;;  %s8208_s10 = inlined_call_operand.hbm [shape: f32[32,512], index: 10, kind: input, shape index: {}]   ;;  %s8209_s11 = inlined_call_operand.vmem [shape: f32[100,512], index: 11, kind: input, shape index: {}]   ;;  %s8210_s12 = inlined_call_operand.vmem [shape: f32[100,512], index: 12, kind: input, shape index: {}]   ;;  %s8211_s13 = inlined_call_operand.vmem [shape: bf16[8,64,32], index: 13, kind: input, shape index: {}]   ;;  %s8212_s14 = inlined_call_operand.hbm [shape: bf16[32,512], index: 14, kind: input, shape index: {}]   ;;  %s8213_s15 = inlined_call_operand.vmem [shape: f32[1,512], index: 15, kind: input, shape index: {}]   ;;  %s8214_s16 = inlined_call_operand.vmem [shape: bf16[512,32], index: 16, kind: input, shape index: {}]   ;;  %s8215_s17 = inlined_call_operand.vmem [shape: f32[1,32], index: 17, kind: input, shape index: {}]   ;;  %s8216_s18 = inlined_call_operand.hbm [shape: f32[2,8,32], index: 18, kind: output, shape index: {}]  }
   0x1   :  { %8234 = sst [smem:[#allocation25_spill]] %s8198_s0 }
   0x2   :  { %8235 = sst [smem:[#allocation26_spill]] %s8199_s1 }
   0x3   :  { %8236 = sst [smem:[#allocation27_spill]] %s8200_s2 }
   0x4   :  { %8237 = sst [smem:[#allocation28_spill]] %s8201_s3 }
   0x5   :  { %8238 = sst [smem:[#allocation29_spill]] %s8208_s10 }
   0x6   :  { %8239 = sst [smem:[#allocation30_spill]] %s8210_s12 }
   0x7   :  { %8240 = sst [smem:[#allocation31_spill]] %s8211_s13 }
   0x8   :  { %8241 = sst [smem:[#allocation32_spill]] %s8212_s14 }
   0x9   :  { %8242 = sst [smem:[#allocation33_spill]] %s8213_s15 }
   0xa   :  { %8243 = sst [smem:[#allocation34_spill]] %s8214_s16 }
   0xb   :  { %8244 = sst [smem:[#allocation35_spill]] %s8215_s17 }
   0xc   :  { %8245 = sst [smem:[#allocation36_spill]] %s8216_s18 }
   0xd   :  { %23 = vsyncpa [#allocation3], 0 }
   0xe   :  { %25 = vsyncpa [#allocation3 + $0x1], 0 }
   0xf   :  { %26 = vsyncpa [#allocation6], 0 }
  0x10   :  { %28 = vsyncpa [#allocation6 + $0x1], 0 }
  0x11   :  { %29 = vsyncpa [#allocation9], 0 }
  0x12   :  { %30 = vsyncpa [#allocation12], 0 }
  0x13   :  { %31 = vsyncpa [#allocation4], 0 }
  0x14   :  { %33 = vsyncpa [#allocation4 + $0x1], 0  ;;  %s6590_s27 = smov 0   ;;  %s6592_s28 = smov 0  }
  0x15   :  { %s6594_s29 = smov 0   ;;  %s6596_s30 = smov 0  }
  0x16 LB: > { %8246 = sst [smem:[#allocation20_spill]] %s6466_s27  ;;  %s6480_s0 = smov [#allocation7]   ;;  %s6478_s30 = sphi %s6596_s30, %s8286_s30   ;;  %s6474_s29 = sphi %s6594_s29, %s8288_s29   ;;  %s6470_s28 = sphi %s6592_s28, %s8290_s28   ;;  %s6466_s27 = sphi %s6590_s27, %s8289_s27  }
  0x17   : > { %8247 = sst [smem:[#allocation21_spill]] %s6474_s29  ;;  %s471_s19 = sshll.u32 %s6480_s0, 4  ;;  %s6616_s19 = int_to_ptr.vmem [resolvable:$true] %s471_s19 }
  0x18   : > { %s6611_s1 = sadd.s32 4294967295, %s6478_s30   ;;  %p5161_p0 = scmp.ge.s32.totalorder %s6478_s30, 1 }
  0x19   : > { %p8225_p1 = scmp.eq.s32.totalorder %s6611_s1, 0  ;;  %p458_p2 = scmp.lt.s32.totalorder %s6478_s30, 3 }
  0x1a   : > { %s6481_s21 = smov [#allocation8]   ;;  %s6482_s2 = smov [#allocation10]  }
  0x1b   : > { %p6618_p3 = pnand %p5161_p0, %p458_p2  ;;  %s482_s22 = sshll.u32 %s6481_s21, 4  ;;  %s6625_s22 = int_to_ptr.vmem [resolvable:$true] %s482_s22 }
  0x1c   : > { %s510_s23 = sshll.u32 %s6482_s2, 4  ;;  %s8250_s0 = sld [smem:[#allocation27_spill]]  ;;  %s6633_s23 = int_to_ptr.vmem [resolvable:$true] %s510_s23 }
  0x1d   : > { %s8248_s20 = scalar_select %p6618_p3, 1, 0 }
  0x1e   : > { %p5990_p5 = pneg %p6618_p3 }
  0x20   : > { %p6629_p6 = pnand %p5990_p5, %p8225_p1 }
  0x22   : > { %s6224_s18 = scalar_lea.hbm %s8250_s0, 16  ;;  %p6643_p8 = pneg %p6629_p6 }
  0x23   : > { %p6225_p7 = scmp.ne.s32.totalorder %s8250_s0, %s6224_s18  ;;  %p6231_p11 = scmp.lt.u32.totalorder %s6224_s18, %s8250_s0 }
  0x25   : > { %p6227_p9 = pnand %p6643_p8, %p6225_p7 }
  0x27   : > { %p6228_p10 = pneg %p6227_p9 }
  0x29   : > { %p6233_p12 = pnand %p6231_p11, %p6228_p10 }
  0x2b   : > { %6236 = shalt.err (!%p6233_p12)
}
  0x2c   : > { %s6237_s15 = scalar_lea.vmem %s6616_s19, 16  ;;  %s6244_s17 = scalar_lea.vmem %s6616_s19, 32 }
  0x2d   : > { %p6238_p13 = scmp.ne.s32.totalorder %s6616_s19, %s6237_s15  ;;  %p6245_p5 = scmp.lt.s32.totalorder %s6616_s19, %s6616_s19 }
  0x2e   : > { %p6246_p7 = scmp.lt.s32.totalorder %s6244_s17, %s6237_s15 }
  0x2f   : > { %p6240_p0 = pnand %p6238_p13, %p6643_p8 }
  0x30   : > { %p6247_p9 = por %p6246_p7, %p6245_p5 }
  0x31   : > { %p6241_p2 = pneg %p6240_p0 }
  0x33   : > { %p6248_p4 = pnand %p6247_p9, %p6241_p2 }
  0x35   : > { %6251 = shalt.err (!%p6248_p4)
}
  0x36   : > { %5993 = dma.hbm_to_vmem [thread:$0]  (!%p6629_p6), %s8250_s0, 16, %s6616_s19, [#allocation6]  }
  0x37   : > { %s8252_s3 = sld [smem:[#allocation28_spill]] }
  0x3d   : > { %s6252_s2 = scalar_lea.hbm %s8252_s3, 16 }
  0x3e   : > { %p6253_p10 = scmp.ne.s32.totalorder %s8252_s3, %s6252_s2  ;;  %p6259_p4 = scmp.lt.u32.totalorder %s6252_s2, %s8252_s3 }
  0x40   : > { %p6255_p11 = pnand %p6253_p10, %p6643_p8 }
  0x42   : > { %p6256_p12 = pneg %p6255_p11 }
  0x44   : > { %p6261_p13 = pnand %p6259_p4, %p6256_p12 }
  0x46   : > { %6264 = shalt.err (!%p6261_p13)
}
  0x47   : > { %s6265_s19 = scalar_lea.vmem %s6625_s22, 16  ;;  %s6272_s12 = scalar_lea.vmem %s6625_s22, 32 }
  0x48   : > { %p6266_p0 = scmp.ne.s32.totalorder %s6625_s22, %s6265_s19  ;;  %p6273_p7 = scmp.lt.s32.totalorder %s6625_s22, %s6625_s22 }
  0x49   : > { %p6274_p9 = scmp.lt.s32.totalorder %s6272_s12, %s6265_s19 }
  0x4a   : > { %p6268_p2 = pnand %p6266_p0, %p6643_p8 }
  0x4b   : > { %p6275_p10 = por %p6274_p9, %p6273_p7 }
  0x4c   : > { %p6269_p5 = pneg %p6268_p2 }
  0x4e   : > { %p6276_p11 = pnand %p6275_p10, %p6269_p5 }
  0x50   : > { %6279 = shalt.err (!%p6276_p11)
}
  0x51   : > { %5996 = dma.hbm_to_vmem [thread:$0]  (!%p6629_p6), %s8252_s3, 16, %s6625_s22, [#allocation9]  }
  0x52   : > { %s8253_s10 = sld [smem:[#allocation29_spill]] }
  0x58   : > { %s6280_s26 = scalar_lea.hbm %s8253_s10, 2048 }
  0x59   : > { %p6281_p12 = scmp.ne.s32.totalorder %s8253_s10, %s6280_s26  ;;  %p6287_p0 = scmp.lt.u32.totalorder %s6280_s26, %s8253_s10 }
  0x5b   : > { %p6283_p4 = pnand %p6281_p12, %p6643_p8 }
  0x5d   : > { %p6284_p13 = pneg %p6283_p4 }
  0x5f   : > { %p6289_p2 = pnand %p6287_p0, %p6284_p13 }
  0x61   : > { %6292 = shalt.err (!%p6289_p2)
}
  0x62   : > { %s6293_s22 = scalar_lea.vmem %s6633_s23, 2048  ;;  %p6301_p10 = scmp.lt.s32.totalorder %s6633_s23, %s6633_s23 }
  0x63   : > { %p6294_p5 = scmp.ne.s32.totalorder %s6633_s23, %s6293_s22  ;;  %p6302_p11 = scmp.lt.s32.totalorder %s6293_s22, %s6293_s22 }
  0x65   : > { %p6296_p7 = pnand %p6294_p5, %p6643_p8  ;;  %p6303_p12 = por %p6302_p11, %p6301_p10 }
  0x67   : > { %p6297_p9 = pneg %p6296_p7 }
  0x69   : > { %p6304_p4 = pnand %p6303_p12, %p6297_p9 }
  0x6b   : > { %6307 = shalt.err (!%p6304_p4)
}
  0x6c   : > { %s6483_s12 = smov 512   ;;  %s6484_s13 = smov 32  }
  0x6d   : > { %5999 = dma.hbm_to_vmem [thread:$0]  (!%p6629_p6), %s8253_s10, 2048, %s6633_s23, [#allocation9], %s6483_s12, %s6483_s12, %s6484_s13  }
  0x6e   : > { %s6485_s25 = smov [#allocation11]   ;;  %s8254_s14 = sld [smem:[#allocation32_spill]] }
  0x6f   : > { %s532_s26 = sshll.u32 %s6485_s25, 4  ;;  %s533_s26 = int_to_ptr.vmem [resolvable:$true] %s532_s26 }
  0x74   : > { %s6308_s17 = scalar_lea.hbm %s8254_s14, 1024 }
  0x75   : > { %p6309_p13 = scmp.ne.s32.totalorder %s8254_s14, %s6308_s17  ;;  %p6315_p5 = scmp.lt.u32.totalorder %s6308_s17, %s8254_s14 }
  0x77   : > { %p6311_p0 = pnand %p6309_p13, %p6643_p8 }
  0x79   : > { %p6312_p2 = pneg %p6311_p0 }
  0x7b   : > { %p6317_p7 = pnand %p6315_p5, %p6312_p2 }
  0x7d   : > { %6320 = shalt.err (!%p6317_p7)
}
  0x7e   : > { %s6321_s23 = scalar_lea.vmem %s533_s26, 1024  ;;  %p6329_p12 = scmp.lt.s32.totalorder %s533_s26, %s533_s26 }
  0x7f   : > { %p6322_p9 = scmp.ne.s32.totalorder %s533_s26, %s6321_s23  ;;  %p6330_p4 = scmp.lt.s32.totalorder %s6321_s23, %s6321_s23 }
  0x81   : > { %p6324_p10 = pnand %p6322_p9, %p6643_p8  ;;  %p6331_p1 = por %p6330_p4, %p6329_p12 }
  0x83   : > { %p6325_p11 = pneg %p6324_p10 }
  0x85   : > { %p6332_p3 = pnand %p6331_p1, %p6325_p11 }
  0x87   : > { %6335 = shalt.err (!%p6332_p3)
}
  0x88   : > { %s6486_s12 = smov 256   ;;  %s6487_s3 = smov 16  }
  0x89   : > { %6002 = dma.hbm_to_vmem [thread:$0]  (!%p6629_p6), %s8254_s14, 1024, %s533_s26, [#allocation12], %s6486_s12, %s6486_s12, %s6487_s3  }
  0x8a   : > { %s5160_s13 = sadd.s32 4294967294, %s6478_s30   ;;  %s6732_s16 = sadd.s32 1, %s6478_s30  }
  0x8b   : > { %8255 = sst [smem:[#allocation22_spill]] %s6732_s16  ;;  %s43_s18 = ssub.s32 %s6478_s30, %s6732_s16 }
  0x8c   : > { %s46_s25 = sadd.s32 1, %s6474_s29  ;;  %p44_p1 = scmp.eq.s32.totalorder %s43_s18, 0 }
  0x8d   : > { %p53_p3 = scmp.ne.s32.totalorder %s6474_s29, %s6470_s28  ;;  %p54_p8 = scmp.eq.s32.totalorder %s6478_s30, 0 }
  0x8e   : > { %p59_p13 = scmp.ne.s32.totalorder %s6470_s28, %s6466_s27  ;;  %p8258_p2 = scmp.eq.s32.totalorder %s6611_s1, 0 }
  0x8f   : > { %s6743_s2 = scalar_select %p44_p1, %s6474_s29, %s46_s25  }
  0x90   : > { %p6745_p0 = por %p54_p8, %p53_p3  ;;  %p6751_p6 = por %p8258_p2, %p59_p13 }
  0x91   : > { %8256 = sst [smem:[#allocation23_spill]] %s6743_s2  ;;  %p445_p5 = scmp.eq.s32.totalorder %s6611_s1, 1 }
  0x92   : > { %s8259_s26 = scalar_select %p6751_p6, 1, 0 }
  0x93   : > { %p451_p7 = scmp.eq.s32.totalorder %s5160_s13, 1  ;;  %p6018_p9 = scmp.lt.s32.totalorder %s6478_s30, 2 }
  0x94   : > { %s555_s15 = sand.u32 1, %s6474_s29   ;;  %p6758_p10 = por %p445_p5, %p53_p3 }
  0x95   : > { %p6762_p11 = por %p451_p7, %p59_p13  ;;  %s6766_s22 = sshll.u32 %s555_s15, 3 }
  0x96   : > { %s8260_s17 = scalar_select %p6758_p10, 1, 0 }
  0x97   : > { %s8261_s19 = scalar_select %p6762_p11, 1, 0 }
  0x98   : > { %s5168_s23 = sshll.u32 %s6478_s30, 7  ;;  %s8263_s0 = sld [smem:[#allocation25_spill]] }
  0x99   : > { %8262 = sst [smem:[#allocation24_spill]] %s8261_s19  ;;  %s559_s13 = scalar_lea.vmem [#allocation2], %s6766_s22 }
  0x9a   : > { %s566_s18 = sshll.u32 %s559_s13, 4  ;;  %p6779_p12 = pnand %p6018_p9, %p6745_p0  ;;  %s6775_s18 = int_to_ptr.vmem [resolvable:$true] %s566_s18 }
  0x9b   : > { %s8265_s2 = sld [smem:[#allocation26_spill]]  ;;  %s573_s3 = sand.u32 1, %s6478_s30  }
  0x9c   : > { %s556_s29 = scalar_lea.sflag [#allocation3], %s555_s15  ;;  %p6338_p1 = pneg %p6779_p12 }
  0x9e   : > { %s6772_s21 = scalar_lea.hbm %s8263_s0, %s5168_s23  ;;  %s6341_s19 = scalar_lea.hbm %s8263_s0, 256 }
  0x9f   : > { %s6336_s16 = scalar_lea.hbm %s6772_s21, 128  ;;  %p6342_p13 = scmp.lt.u32.totalorder %s6772_s21, %s8263_s0 }
  0xa0   : > { %p6337_p4 = scmp.ne.s32.totalorder %s6772_s21, %s6336_s16  ;;  %p6343_p0 = scmp.lt.u32.totalorder %s6341_s19, %s6336_s16 }
  0xa1   : > { %s6786_s12 = scalar_lea.hbm %s8265_s2, %s5168_s23  ;;  %p6345_p5 = scmp.lt.u32.totalorder %s6336_s16, %s6772_s21 }
  0xa2   : > { %p6339_p3 = pnand %p6338_p1, %p6337_p4  ;;  %p6344_p2 = por %p6343_p0, %p6342_p13 }
  0xa4   : > { %p6340_p8 = pneg %p6339_p3  ;;  %p6346_p7 = por %p6345_p5, %p6344_p2 }
  0xa6   : > { %p6347_p9 = pnand %p6346_p7, %p6340_p8 }
  0xa8   : > { %6350 = shalt.err (!%p6347_p9)
}
  0xa9   : > { %s6351_s14 = scalar_lea.vmem %s6775_s18, 128  ;;  %s6488_s15 = smov [#allocation2]  }
  0xaa   : > { %p6352_p4 = scmp.ne.s32.totalorder %s6775_s18, %s6351_s14  ;;  %s6356_s23 = sshll.u32 %s6488_s15, 4  ;;  %s6357_s23 = int_to_ptr.vmem [resolvable:$false] %s6356_s23 }
  0xab   : > { %s6358_s27 = scalar_lea.vmem %s6357_s23, 256  ;;  %p6359_p10 = scmp.lt.s32.totalorder %s6775_s18, %s6357_s23 }
  0xac   : > { %p6354_p3 = pnand %p6352_p4, %p6338_p1  ;;  %p6360_p13 = scmp.lt.s32.totalorder %s6358_s27, %s6351_s14 }
  0xae   : > { %p6355_p11 = pneg %p6354_p3  ;;  %p6361_p0 = por %p6360_p13, %p6359_p10 }
  0xb0   : > { %p6362_p2 = pnand %p6361_p0, %p6355_p11 }
  0xb2   : > { %6365 = shalt.err (!%p6362_p2)
}
  0xb3   : > { %6006 = dma.hbm_to_vmem [thread:$0]  (!%p6779_p12), %s6772_s21, 128, %s6775_s18, %s556_s29  }
  0xb4   : > { %s577_s16 = scalar_lea.vmem [#allocation5], %s6766_s22  ;;  %s574_s24 = scalar_lea.sflag [#allocation6], %s573_s3 }
  0xb5   : > { %s584_s19 = sshll.u32 %s577_s16, 4  ;;  %s6366_s13 = scalar_lea.hbm %s6786_s12, 128  ;;  %s585_s19 = int_to_ptr.vmem [resolvable:$true] %s584_s19 }
  0xb6   : > { %p6367_p10 = scmp.ne.s32.totalorder %s6786_s12, %s6366_s13  ;;  %s6371_s15 = scalar_lea.hbm %s8265_s2, 256 }
  0xb7   : > { %p6372_p5 = scmp.lt.u32.totalorder %s6786_s12, %s8265_s2  ;;  %p6373_p7 = scmp.lt.u32.totalorder %s6371_s15, %s6366_s13 }
  0xb8   : > { %p6369_p11 = pnand %p6367_p10, %p6338_p1  ;;  %p6375_p4 = scmp.lt.u32.totalorder %s6366_s13, %s6786_s12 }
  0xb9   : > { %p6374_p9 = por %p6373_p7, %p6372_p5 }
  0xba   : > { %p6370_p8 = pneg %p6369_p11 }
  0xbb   : > { %p6376_p3 = por %p6375_p4, %p6374_p9 }
  0xbd   : > { %p6377_p13 = pnand %p6376_p3, %p6370_p8 }
  0xbf   : > { %6380 = shalt.err (!%p6377_p13)
}
  0xc0   : > { %s6381_s29 = scalar_lea.vmem %s585_s19, 128  ;;  %s6489_s22 = smov [#allocation5]  }
  0xc1   : > { %p6382_p0 = scmp.ne.s32.totalorder %s585_s19, %s6381_s29  ;;  %s6386_s21 = sshll.u32 %s6489_s22, 4  ;;  %s6387_s21 = int_to_ptr.vmem [resolvable:$false] %s6386_s21 }
  0xc2   : > { %s6388_s18 = scalar_lea.vmem %s6387_s21, 256  ;;  %p6389_p11 = scmp.lt.s32.totalorder %s585_s19, %s6387_s21 }
  0xc3   : > { %p6384_p2 = pnand %p6382_p0, %p6338_p1  ;;  %p6390_p6 = scmp.lt.s32.totalorder %s6388_s18, %s6381_s29 }
  0xc5   : > { %p6385_p10 = pneg %p6384_p2  ;;  %p6391_p5 = por %p6390_p6, %p6389_p11 }
  0xc7   : > { %p6392_p7 = pnand %p6391_p5, %p6385_p10 }
  0xc9   : > { %6395 = shalt.err (!%p6392_p7)
}
  0xca   : > { %6009 = dma.hbm_to_vmem [thread:$0]  (!%p6779_p12), %s6786_s12, 128, %s585_s19, %s574_s24  }
  0xcb   : > { %p8266_p8 = scmp.ne.s32.totalorder %s8248_s20, 0 }
  0xcc   : > { %s6839_s3 = sand.u32 (!%p8266_p8), 1, %s6470_s28   ;;  %p8267_p6 = scmp.ne.s32.totalorder (!%p8266_p8), %s8259_s26, 0 }
  0xcd   : > { %593 = sbr.rel (%p8266_p8) target bundleno = 4225 (0x1081), region = 92  ;;  %s6842_s16 = sshll.u32 (!%p8266_p8), %s6839_s3, 3 }
  0xce   : > { %s596_s13 = scalar_lea.sflag (!%p8266_p8), [#allocation3], %s6839_s3  ;;  %s599_s10 = scalar_lea.vmem (!%p8266_p8), [#allocation2], %s6842_s16 }
  0xd4   : > { %6441 = dma.done.wait (%p8267_p6), %s596_s13, 128  }
  0xd5   : > { %6443 = vsyncadd (%p8267_p6), %s596_s13, 4294967168  ;;  %s604_s20 = sand.u32 1, %s6611_s1   ;;  %s608_s12 = scalar_lea.vmem [#allocation5], %s6842_s16 }
  0xd6   : > { %s605_s25 = scalar_lea.sflag [#allocation6], %s604_s20 }
  0xd7   : > { %6445 = dma.done.wait (%p8267_p6), %s605_s25, 128  }
  0xd8   : > { %6447 = vsyncadd (%p8267_p6), %s605_s25, 4294967168  ;;  %p8268_p12 = scmp.eq.s32.totalorder %s6611_s1, 0 }
  0xda   : > { %6449 = dma.done.wait (%p8268_p12), [#allocation6], 16   ;;  %p8269_p1 = pmov %p8268_p12 }
  0xdc   : > { %6451 = vsyncadd (%p8269_p1), [#allocation6], 4294967280  ;;  %p8270_p9 = pmov %p8269_p1 }
  0xdd   : > { %p8271_p4 = pmov %p8269_p1 }
  0xde   : > { %6453 = dma.done.wait (%p8270_p9), [#allocation9], 2064  }
  0xdf   : > { %6455 = vsyncadd (%p8271_p4), [#allocation9], 4294965232  ;;  %p8272_p3 = pmov %p8269_p1 }
  0xe0   : > { %p8273_p13 = pmov %p8269_p1 }
  0xe1   : > { %6457 = dma.done.wait (%p8272_p3), [#allocation12], 1024  }
  0xe2   : > { %6459 = vsyncadd (%p8273_p13), [#allocation12], 4294966272  ;;  %vm689_vm0 = vcmask 261120   ;;  %v683_v0 = vld [vmem:[%s599_s10] sm:$0xff]  ;;  %v721_v9 = vld [vmem:[%s8204_s6 + $0x18] sm:$0xff]  ;;  %v6490_v37 = vmov 0.0  }
  0xe3   : > { %v690_v1 = vsel %vm689_vm0, %v683_v0, 0.0  ;;  %v719_v7 = vld [vmem:[%s8204_s6 + $0x8] sm:$0xff]  ;;  %v725_v11 = vld [vmem:[%s8204_s6 + $0x38] sm:$0xff]  ;;  %v718_v12 = vld [vmem:[%s8204_s6] sm:$0xff]  ;;  %897 = vmatprep.mubr.f32.mxu0 %v6490_v37  ;;  %968 = vmatprep.mubr.f32.mxu1 %v6490_v37  ;;  %vm6491_vm1 = vmmov 0   ;;  %vm1539_vm2 = vcmask 64512  }
  0xe4   : > { %691 = vadd.xlane.f32.xlu0 %v690_v1  ;;  %v723_v8 = vld [vmem:[%s8204_s6 + $0x28] sm:$0xff]  ;;  %v722_v13 = vld [vmem:[%s8204_s6 + $0x20] sm:$0xff]  ;;  %v5752_v14 = vpack.c.bf16 %v725_v11, %v721_v9  ;;  %v720_v16 = vld [vmem:[%s8204_s6 + $0x10] sm:$0xff]  ;;  %vm2040_vm7 = vcmask 818176   ;;  %vm2401_vm8 = vcmask 1043456   ;;  %s8274_s22 = sld [smem:[#allocation30_spill]] }
  0xe5   : > { %v5744_v10 = vpack.c.bf16 %v723_v8, %v719_v7  ;;  %v5746_v15 = vpack.c.bf16 %v722_v13, %v718_v12  ;;  %v724_v17 = vld [vmem:[%s8204_s6 + $0x30] sm:$0xff]  ;;  %v727_v19 = vld [vmem:[%s8204_s6 + $0x48] sm:$0xff]  ;;  %v729_v21 = vld [vmem:[%s8204_s6 + $0x58] sm:$0xff]  ;;  %s6492_s18 = smov 64   ;;  %vm2750_vm9 = vcmask 523264   ;;  %s8275_s25 = sld [smem:[#allocation31_spill]] }
  0xe6   : > { %v5754_v18 = vpack.c.bf16 %v724_v17, %v720_v16  ;;  %5753 = vmatprep.subr.bf16.mxu1 %v5752_v14  ;;  %v731_v20 = vld [vmem:[%s8204_s6 + $0x68] sm:$0xff]  ;;  %v733_v23 = vld [vmem:[%s8204_s6 + $0x78] sm:$0xff]  ;;  %v726_v24 = vld [vmem:[%s8204_s6 + $0x40] sm:$0xff]  ;;  %s8276_s27 = sld [smem:[#allocation34_spill]]  ;;  %s8279_s13 = sld [smem:[#allocation35_spill]] }
  0xe7   : > { %5745 = vmatprep.subr.bf16.mxu0 %v5744_v10  ;;  %v5748_v22 = vpack.c.bf16 %v731_v20, %v727_v19  ;;  %v730_v25 = vld [vmem:[%s8204_s6 + $0x60] sm:$0xff]  ;;  %v5756_v26 = vpack.c.bf16 %v733_v23, %v729_v21  ;;  %v728_v28 = vld [vmem:[%s8204_s6 + $0x50] sm:$0xff]  ;;  %v735_v31 = vld [vmem:[%s8205_s7 + $0x8] sm:$0xff]  ;;  %s5315_s20 = sshll.u32 %s6611_s1, 7  ;;  %s8280_s24 = sld [smem:[#allocation36_spill]] }
  0xe8   : > { %5747 = vmatpush1.bf16.msra.mxu0 %v5746_v15  ;;  %5755 = vmatpush1.bf16.msra.mxu1 %v5754_v18  ;;  %v5750_v27 = vpack.c.bf16 %v730_v25, %v726_v24  ;;  %v732_v29 = vld [vmem:[%s8204_s6 + $0x70] sm:$0xff]  ;;  %v739_v32 = vld [vmem:[%s8205_s7 + $0x28] sm:$0xff]  ;;  %v737_v33 = vld [vmem:[%s8205_s7 + $0x18] sm:$0xff]  ;;  %s5016_s15 = scalar_lea.sflag [#allocation4], %s6839_s3  ;;  %p8281_p2 = scmp.ne.s32.totalorder %s8260_s17, 0 }
  0xe9   : > { %5749 = vmatprep.subr.bf16.mxu0 %v5748_v22  ;;  %v5758_v30 = vpack.c.bf16 %v732_v29, %v728_v28  ;;  %5757 = vmatprep.subr.bf16.mxu1 %v5756_v26  ;;  %v5760_v34 = vpack.c.bf16 %v739_v32, %v735_v31  ;;  %v741_v35 = vld [vmem:[%s8205_s7 + $0x38] sm:$0xff]  ;;  %v6934_v41 = vld [vmem:[#allocation7] ss:$0 sm:$0xff]  ;;  %v6936_v43 = vld [vmem:[#allocation8] ss:$0 sm:$0xff]  ;;  %s6494_s1 = smov [#allocation13]  }
  0xea   : > { %v5768_v36 = vpack.c.bf16 %v741_v35, %v737_v33  ;;  %v734_v44 = vld [vmem:[%s8205_s7] sm:$0xff]  ;;  %v736_v47 = vld [vmem:[%s8205_s7 + $0x10] sm:$0xff]  ;;  %v743_v49 = vld [vmem:[%s8205_s7 + $0x48] sm:$0xff] }
  0xeb   : > { %v738_v45 = vld [vmem:[%s8205_s7 + $0x20] sm:$0xff]  ;;  %v740_v48 = vld [vmem:[%s8205_s7 + $0x30] sm:$0xff]  ;;  %v747_v50 = vld [vmem:[%s8205_s7 + $0x68] sm:$0xff] }
  0xec   : > { %5751 = vmatpush1.bf16.msra.mxu0 %v5750_v27  ;;  %5759 = vmatpush1.bf16.msra.mxu1 %v5758_v30  ;;  %v745_v51 = vld [vmem:[%s8205_s7 + $0x58] sm:$0xff]  ;;  %v5762_v54 = vpack.c.bf16 %v738_v45, %v734_v44  ;;  %v5770_v55 = vpack.c.bf16 %v740_v48, %v736_v47  ;;  %v742_v56 = vld [vmem:[%s8205_s7 + $0x40] sm:$0xff]  ;;  %v5764_v59 = vpack.c.bf16 %v747_v50, %v743_v49  ;;  %v744_v61 = vld [vmem:[%s8205_s7 + $0x50] sm:$0xff]  ;;  %s8277_s21 = smov %s8276_s27 }
  0xed   : > { %5761 = vmatprep.subr.bf16.mxu0 %v5760_v34  ;;  %5769 = vmatprep.subr.bf16.mxu1 %v5768_v36  ;;  %v749_v52 = vld [vmem:[%s8205_s7 + $0x78] sm:$0xff]  ;;  %v746_v57 = vld [vmem:[%s8205_s7 + $0x60] sm:$0xff]  ;;  %v748_v62 = vld [vmem:[%s8205_s7 + $0x70] sm:$0xff]  ;;  %s8153_s14 = scalar_lea.hbm %s8280_s24, %s5315_s20 }
  0xee   : > { %v5772_v60 = vpack.c.bf16 %v749_v52, %v745_v51  ;;  %v751_v63 = vld [vmem:[%s8206_s8 + $0x8] sm:$0xff]  ;;  %v753_v1 = vld [vmem:[%s8206_s8 + $0x18] sm:$0xff]  ;;  %v752_v9 = vld [vmem:[%s8206_s8 + $0x10] sm:$0xff] }
  0xef   : > { %v756_v10 = vld [vmem:[%s8206_s8 + $0x30] sm:$0xff]  ;;  %v759_v11 = vld [vmem:[%s8206_s8 + $0x48] sm:$0xff]  ;;  %v761_v13 = vld [vmem:[%s8206_s8 + $0x58] sm:$0xff] }
  0xf0   : > { %v763_v12 = vld [vmem:[%s8206_s8 + $0x68] sm:$0xff]  ;;  %v765_v14 = vld [vmem:[%s8206_s8 + $0x78] sm:$0xff]  ;;  %v5786_v16 = vpack.c.bf16 %v756_v10, %v752_v9  ;;  %v758_v17 = vld [vmem:[%s8206_s8 + $0x40] sm:$0xff] }
  0xf1   : > { %v5780_v18 = vpack.c.bf16 %v763_v12, %v759_v11  ;;  %v5788_v19 = vpack.c.bf16 %v765_v14, %v761_v13  ;;  %v762_v20 = vld [vmem:[%s8206_s8 + $0x60] sm:$0xff]  ;;  %v760_v21 = vld [vmem:[%s8206_s8 + $0x50] sm:$0xff]  ;;  %v815_v13 = vld [vmem:[%s8207_s9 + $0x188] sm:$0xff] }
  0xf2   : > { %v764_v22 = vld [vmem:[%s8206_s8 + $0x70] sm:$0xff]  ;;  %v5782_v23 = vpack.c.bf16 %v762_v20, %v758_v17  ;;  %v814_v12 = vld [vmem:[%s8207_s9 + $0x180] sm:$0xff] }
  0xf3   : > { %v5790_v24 = vpack.c.bf16 %v764_v22, %v760_v21  ;;  %v798_v17 = vld [vmem:[%s8207_s9 + $0x100] sm:$0xff]  ;;  %v783_v22 = vld [vmem:[%s8207_s9 + $0x88] sm:$0xff] }
  0xf4   : > { %v782_v20 = vld [vmem:[%s8207_s9 + $0x80] sm:$0xff] }
 0x171   : > { %v692_v2 = vpop.xlane.xlu0 %691 }
 0x172   : > { %v694_v3 = vmul.f32 0.03125, %v692_v2  ;;  %v757_v2 = vld [vmem:[%s8206_s8 + $0x38] sm:$0xff] }
 0x173   : > { %v5784_v8 = vpack.c.bf16 %v757_v2, %v753_v1 }
 0x174   : > { %v695_v4 = vsub.f32 %v683_v0, %v694_v3  ;;  %v755_v0 = vld [vmem:[%s8206_s8 + $0x28] sm:$0xff]  ;;  %v5766_v3 = vpack.c.bf16 %v746_v57, %v742_v56 }
 0x175   : > { %v5776_v7 = vpack.c.bf16 %v755_v0, %v751_v63 }
 0x176   : > { %v696_v5 = vmul.f32 %v695_v4, %v695_v4 }
 0x178   : > { %v697_v6 = vsel %vm689_vm0, %v696_v5, 0.0  ;;  %v750_v5 = vld [vmem:[%s8206_s8] sm:$0xff] }
 0x179   : > { %698 = vadd.xlane.f32.xlu0 %v697_v6  ;;  %v754_v6 = vld [vmem:[%s8206_s8 + $0x20] sm:$0xff] }
 0x17a   : > { %v5778_v15 = vpack.c.bf16 %v754_v6, %v750_v5 }
 0x206   : > { %v699_v38 = vpop.xlane.xlu0 %698 }
 0x207   : > { %v700_v39 = vmul.f32 0.03125, %v699_v38 }
 0x209   : > { %v701_v40 = vadd.f32 1e-05, %v700_v39 }
 0x20b   : > { %6149 = vrsqrt.f32 %v701_v40 }
 0x215   : > { %v6150_v42 = vpop.eup %6149 }
 0x216   : > { %v703_v46 = vmul.f32 %v6150_v42, %v695_v4  ;;  %v5774_v4 = vpack.c.bf16 %v748_v62, %v744_v61 }
 0x218   : > { %v710_v53 = vmul.f32 %v6934_v41, %v703_v46 }
 0x21a   : > { %v717_v58 = vadd.f32 %v6936_v43, %v710_v53 }
 0x21c   : > { %5181 = vmatmul.mubr.msk.f32.vlgmr.msra.gmra.mrb[0].mxu0 %vm689_vm0, %v717_v58  ;;  %5182 = vmatmul.mubr.msk.f32.vlgmr.msra.gmra.mrb[0].mxu1 %vm689_vm0, %v717_v58 }
 0x21d   : > { %5763 = vmatpush1.bf16.msra.mxu0 %v5762_v54  ;;  %5771 = vmatpush1.bf16.msra.mxu1 %v5770_v55 }
 0x21e   : > { %5765 = vmatprep.subr.bf16.mxu0 %v5764_v59  ;;  %5773 = vmatprep.subr.bf16.mxu1 %v5772_v60 }
 0x21f   : > { %1039 = vmatprep.mubr.f32.mxu0 %v6490_v37  ;;  %1110 = vmatprep.mubr.f32.mxu1 %v6490_v37 }
 0x221   : > { %5767 = vmatpush1.bf16.msra.mxu0 %v5766_v3  ;;  %5775 = vmatpush1.bf16.msra.mxu1 %v5774_v4 }
 0x222   : > { %5777 = vmatprep.subr.bf16.mxu0 %v5776_v7  ;;  %5785 = vmatprep.subr.bf16.mxu1 %v5784_v8 }
 0x224   : > { %5183 = vmatmul.mubr.msk.f32.vlgmr.msra.gmra.mrb[2].mxu0 %vm689_vm0, %v717_v58  ;;  %5184 = vmatmul.mubr.msk.f32.vlgmr.msra.gmra.mrb[2].mxu1 %vm689_vm0, %v717_v58 }
 0x225   : > { %5779 = vmatpush1.bf16.msra.mxu0 %v5778_v15  ;;  %5787 = vmatpush1.bf16.msra.mxu1 %v5786_v16  ;;  %v5824_v16 = vpack.c.bf16 %v815_v13, %v814_v12  ;;  %v807_v12 = vld [vmem:[%s8207_s9 + $0x148] sm:$0xff] }
 0x226   : > { %5781 = vmatprep.subr.bf16.mxu0 %v5780_v18  ;;  %5789 = vmatprep.subr.bf16.mxu1 %v5788_v19  ;;  %v799_v18 = vld [vmem:[%s8207_s9 + $0x108] sm:$0xff] }
 0x227   : > { %1181 = vmatprep.mubr.f32.mxu0 %v6490_v37  ;;  %1252 = vmatprep.mubr.f32.mxu1 %v6490_v37 }
 0x229   : > { %5783 = vmatpush1.bf16.msra.mxu0 %v5782_v23  ;;  %5791 = vmatpush1.bf16.msra.mxu1 %v5790_v24  ;;  %v816_v23 = vld [vmem:[%s8207_s9 + $0x190] sm:$0xff]  ;;  %v817_v24 = vld [vmem:[%s8207_s9 + $0x198] sm:$0xff] }
 0x22a   : > { %5520 = vmatprep.subr.mxu0 %v6490_v37  ;;  %5525 = vmatprep.subr.mxu1 %v6490_v37 }
 0x22c   : > { %5185 = vmatmul.mubr.msk.f32.vlgmr.msra.gmra.mrb[4].mxu0 %vm689_vm0, %v717_v58  ;;  %5186 = vmatmul.mubr.msk.f32.vlgmr.msra.gmra.mrb[4].mxu1 %vm689_vm0, %v717_v58 }
 0x22d   : > { %5522 = vmatprep.mubr.msk.f32.mxu0 %vm6491_vm1, %v6490_v37  ;;  %5527 = vmatprep.mubr.msk.f32.mxu1 %vm6491_vm1, %v6490_v37 }
 0x2ef   : > { %v899_v25 = vpop.f32.mrb[0].mxu0  ;;  %v970_v26 = vpop.f32.mrb[0].mxu1 }
 0x2f0   : > { %v901_v27 = vpop.f32.mrb[1].mxu0  ;;  %v972_v28 = vpop.f32.mrb[1].mxu1 }
 0x2f7   : > { %v1041_v29 = vpop.f32.mrb[2].mxu0  ;;  %v1112_v30 = vpop.f32.mrb[2].mxu1 }
 0x2f8   : > { %v1043_v31 = vpop.f32.mrb[3].mxu0  ;;  %v1114_v32 = vpop.f32.mrb[3].mxu1  ;;  %5521 = vmatpush3.xpose.msra.mxu0 %v1041_v29  ;;  %v766_v29 = vld [vmem:[%s8207_s9] sm:$0xff] }
 0x2f9   : > { %5526 = vmatpush3.xpose.msra.mxu1 %v1043_v31  ;;  %5530 = vmatprep.subr.mxu0 %v6490_v37  ;;  %v801_v31 = vld [vmem:[%s8207_s9 + $0x118] sm:$0xff] }
 0x2fa   : > { %5535 = vmatprep.subr.mxu1 %v6490_v37 }
 0x2fb   : > { %5523 = vmatmul.mubr.f32.vlgmr.msra.gmra.mrb[6].mxu0 %v899_v25 }
 0x2fc   : > { %5528 = vmatmul.mubr.f32.vlgmr.msra.gmra.mrb[6].mxu1 %v901_v27  ;;  %5531 = vmatpush3.xpose.msra.mxu0 %v1112_v30  ;;  %v5826_v27 = vpack.c.bf16 %v799_v18, %v798_v17  ;;  %v800_v30 = vld [vmem:[%s8207_s9 + $0x110] sm:$0xff]  ;;  %v790_v17 = vld [vmem:[%s8207_s9 + $0xc0] sm:$0xff]  ;;  %v791_v18 = vld [vmem:[%s8207_s9 + $0xc8] sm:$0xff] }
 0x2fd   : > { %5536 = vmatpush3.xpose.msra.mxu1 %v1114_v32  ;;  %5532 = vmatprep.mubr.msk.f32.mxu0 %vm6491_vm1, %v6490_v37 }
 0x2fe   : > { %5537 = vmatprep.mubr.msk.f32.mxu1 %vm6491_vm1, %v6490_v37  ;;  %5540 = vmatprep.subr.mxu0 %v6490_v37 }
 0x2ff   : > { %v1183_v33 = vpop.f32.mrb[4].mxu0  ;;  %v7047_v34 = vpop.f32.mrb[4].mxu1  ;;  %5533 = vmatmul.mubr.f32.vlgmr.msra.gmra.mrb[8].mxu0 %v970_v26  ;;  %5545 = vmatprep.subr.mxu1 %v6490_v37 }
 0x300   : > { %v1185_v35 = vpop.f32.mrb[5].mxu0  ;;  %v7050_v36 = vpop.f32.mrb[5].mxu1  ;;  %5538 = vmatmul.mubr.f32.vlgmr.msra.gmra.mrb[8].mxu1 %v972_v28  ;;  %5541 = vmatpush3.msra.mxu0 %v1183_v33  ;;  %v5792_v33 = vpack.c.bf16 %v783_v22, %v782_v20  ;;  %v808_v22 = vld [vmem:[%s8207_s9 + $0x150] sm:$0xff] }
 0x301   : > { %5546 = vmatpush3.msra.mxu1 %v1185_v35  ;;  %5547 = vmatprep.mubr.msk.f32.mxu1 %vm6491_vm1, %v6490_v37  ;;  %v767_v35 = vld [vmem:[%s8207_s9 + $0x8] sm:$0xff] }
 0x302   : > { %5555 = vmatprep.subr.mxu1 %v6490_v37  ;;  %5542 = vmatprep.mubr.msk.f32.mxu0 %vm6491_vm1, %v6490_v37 }
 0x303   : > { %5550 = vmatprep.subr.mxu0 %v6490_v37 }
 0x3ce   : > { %v7058_v38 = vpop.f32.mrb[6].mxu0 }
 0x3cf   : > { %v5524_v39 = vpop.f32.mrb[7].mxu0  ;;  %v1395_v40 = vpop.f32.mrb[6].mxu1  ;;  %v1540_v50 = vsel %vm1539_vm2, %v7058_v38, -inf  ;;  %vm1584_vm5 = vcmp.gt.f32.partialorder %v7058_v38, 0.0 }
 0x3d0   : > { %v5529_v42 = vpop.f32.mrb[7].mxu1  ;;  %v1543_v44 = vsel %vm1539_vm2, %v1395_v40, -inf  ;;  %vm1585_vm3 = vcmp.gt.f32.partialorder %v1395_v40, 0.0  ;;  %v818_v39 = vld [vmem:[%s8207_s9 + $0x1a0] sm:$0xff] }
 0x3d1   : > { %1544 = vmax.xlane.f32.xlu1 %v1543_v44  ;;  %v785_v44 = vld [vmem:[%s8207_s9 + $0x98] sm:$0xff] }
 0x3d2   : > { %v7061_v45 = vpop.f32.mrb[8].mxu0 }
 0x3d3   : > { %v5534_v46 = vpop.f32.mrb[9].mxu0  ;;  %v7063_v47 = vpop.f32.mrb[8].mxu1  ;;  %v1546_v51 = vsel %vm1539_vm2, %v7061_v45, -inf  ;;  %vm1586_vm6 = vcmp.gt.f32.partialorder %v7061_v45, 0.0 }
 0x3d4   : > { %v5539_v48 = vpop.f32.mrb[9].mxu1  ;;  %v1549_v49 = vsel %vm1539_vm2, %v7063_v47, -inf  ;;  %vm1587_vm4 = vcmp.gt.f32.partialorder %v7063_v47, 0.0 }
 0x3d5   : > { %1550 = vmax.xlane.f32.xlu0 %v1549_v49  ;;  %1541 = vmax.xlane.f32.xlu1 %v1540_v50  ;;  %v5794_v49 = vpack.c.bf16 %v767_v35, %v766_v29  ;;  %v768_v50 = vld [vmem:[%s8207_s9 + $0x10] sm:$0xff]  ;;  %v794_v35 = vld [vmem:[%s8207_s9 + $0xe0] sm:$0xff] }
 0x3d9   : > { %1547 = vmax.xlane.f32.xlu1 %v1546_v51 }
 0x45e   : > { %v1545_v52 = vpop.xlane.xlu1 %1544 }
 0x45f   : > { %v1553_v53 = vsub.f32 %v1395_v40, %v1545_v52  ;;  %v819_v40 = vld [vmem:[%s8207_s9 + $0x1a8] sm:$0xff]  ;;  %v802_v52 = vld [vmem:[%s8207_s9 + $0x120] sm:$0xff] }
 0x460   : > { %v5832_v51 = vpack.c.bf16 %v819_v40, %v818_v39 }
 0x461   : > { %v1558_v54 = vmul.f32 1.442695, %v1553_v53  ;;  %v803_v53 = vld [vmem:[%s8207_s9 + $0x128] sm:$0xff] }
 0x462   : > { %v1551_v55 = vpop.xlane.xlu0 %1550  ;;  %v1542_v56 = vpop.xlane.xlu1 %1541 }
 0x463   : > { %6151 = vpow2.f32 %v1558_v54  ;;  %v1555_v57 = vsub.f32 %v7063_v47, %v1551_v55  ;;  %v1552_v58 = vsub.f32 %v7058_v38, %v1542_v56  ;;  %v784_v38 = vld [vmem:[%s8207_s9 + $0x90] sm:$0xff]  ;;  %v5830_v47 = vpack.c.bf16 %v801_v31, %v800_v30  ;;  %v769_v54 = vld [vmem:[%s8207_s9 + $0x18] sm:$0xff] }
 0x464   : > { %v820_v55 = vld [vmem:[%s8207_s9 + $0x1b0] sm:$0xff]  ;;  %v821_v56 = vld [vmem:[%s8207_s9 + $0x1b8] sm:$0xff] }
 0x465   : > { %v1562_v59 = vmul.f32 1.442695, %v1555_v57  ;;  %v1556_v60 = vmul.f32 1.442695, %v1552_v58  ;;  %v787_v58 = vld [vmem:[%s8207_s9 + $0xa8] sm:$0xff] }
 0x466   : > { %v1548_v61 = vpop.xlane.xlu1 %1547 }
 0x467   : > { %6153 = vpow2.f32 %v1562_v59  ;;  %v1554_v62 = vsub.f32 %v7061_v45, %v1548_v61  ;;  %v786_v45 = vld [vmem:[%s8207_s9 + $0xa0] sm:$0xff]  ;;  %v5834_v59 = vpack.c.bf16 %v803_v53, %v802_v52  ;;  %v781_v52 = vld [vmem:[%s8207_s9 + $0x78] sm:$0xff] }
 0x468   : > { %6155 = vpow2.f32 %v1556_v60  ;;  %v5798_v60 = vpack.c.bf16 %v769_v54, %v768_v50  ;;  %v770_v61 = vld [vmem:[%s8207_s9 + $0x20] sm:$0xff]  ;;  %v827_v50 = vld [vmem:[%s8207_s9 + $0x1e8] sm:$0xff] }
 0x469   : > { %v1560_v63 = vmul.f32 1.442695, %v1554_v62  ;;  %v5836_v62 = vpack.c.bf16 %v821_v56, %v820_v55  ;;  %v810_v54 = vld [vmem:[%s8207_s9 + $0x160] sm:$0xff]  ;;  %v811_v55 = vld [vmem:[%s8207_s9 + $0x168] sm:$0xff] }
 0x46a   : > { %v5850_v56 = vpack.c.bf16 %v811_v55, %v810_v54  ;;  %v2083_v54 = vld [vmem:[#allocation10 + $0x70] sm:$0xff]  ;;  %v2086_v55 = vld [vmem:[%s8209_s11 + $0x8] sm:$0xff] }
 0x46b   : > { %6157 = vpow2.f32 %v1560_v63  ;;  %v804_v63 = vld [vmem:[%s8207_s9 + $0x130] sm:$0xff] }
 0x46d   : > { %v6152_v0 = vpop.eup %6151 }
 0x46e   : > { %v1567_v1 = vsel %vm1539_vm2, %v6152_v0, 0.0 }
 0x46f   : > { %1568 = vadd.xlane.f32.xlu0 %v1567_v1  ;;  %v5800_v1 = vpack.c.bf16 %v787_v58, %v786_v45  ;;  %v829_v45 = vld [vmem:[%s8207_s9 + $0x1f8] sm:$0xff] }
 0x471   : > { %v6154_v2 = vpop.eup %6153 }
 0x472   : > { %v6156_v3 = vpop.eup %6155  ;;  %v1573_v4 = vsel %vm1539_vm2, %v6154_v2, 0.0 }
 0x473   : > { %1574 = vadd.xlane.f32.xlu0 %v1573_v4  ;;  %v1564_v5 = vsel %vm1539_vm2, %v6156_v3, 0.0  ;;  %v823_v4 = vld [vmem:[%s8207_s9 + $0x1c8] sm:$0xff] }
 0x474   : > { %1565 = vadd.xlane.f32.xlu1 %v1564_v5  ;;  %v788_v5 = vld [vmem:[%s8207_s9 + $0xb0] sm:$0xff] }
 0x475   : > { %v6158_v6 = vpop.eup %6157 }
 0x476   : > { %v1570_v7 = vsel %vm1539_vm2, %v6158_v6, 0.0 }
 0x478   : > { %1571 = vadd.xlane.f32.xlu1 %v1570_v7 }
 0x4fc   : > { %v1569_v8 = vpop.xlane.xlu0 %1568 }
 0x4fd   : > { %6159 = vrcp.f32 %v1569_v8 }
 0x500   : > { %v1575_v9 = vpop.xlane.xlu0 %1574 }
 0x501   : > { %6161 = vrcp.f32 %v1575_v9  ;;  %v1566_v10 = vpop.xlane.xlu1 %1565  ;;  %v772_v9 = vld [vmem:[%s8207_s9 + $0x30] sm:$0xff] }
 0x502   : > { %6163 = vrcp.f32 %v1566_v10 }
 0x505   : > { %v1572_v11 = vpop.xlane.xlu1 %1571 }
 0x506   : > { %6165 = vrcp.f32 %v1572_v11  ;;  %v806_v11 = vld [vmem:[%s8207_s9 + $0x140] sm:$0xff] }
 0x507   : > { %v6160_v14 = vpop.eup %6159 }
 0x508   : > { %v1581_v15 = vmul.f32 %v6160_v14, %v6152_v0  ;;  %v805_v0 = vld [vmem:[%s8207_s9 + $0x138] sm:$0xff] }
 0x509   : > { %v5838_v7 = vpack.c.bf16 %v805_v0, %v804_v63  ;;  %v773_v14 = vld [vmem:[%s8207_s9 + $0x38] sm:$0xff] }
 0x50a   : > { %v1589_v19 = vsel %vm1585_vm3, %v1581_v15, 0.0  ;;  %v824_v15 = vld [vmem:[%s8207_s9 + $0x1d0] sm:$0xff]  ;;  %v5806_v20 = vpack.c.bf16 %v773_v14, %v772_v9 }
 0x50b   : > { %v6162_v21 = vpop.eup %6161  ;;  %5548 = vmatmul.mubr.msk.f32.vlgmr.msra.gmra.mrb[10].mxu1 %vm1539_vm2, %v1589_v19  ;;  %v5842_v19 = vpack.c.bf16 %v807_v12, %v806_v11 }
 0x50c   : > { %v6164_v25 = vpop.eup %6163  ;;  %5556 = vmatpush3.msra.mxu1 %v7050_v36  ;;  %5557 = vmatprep.mubr.msk.f32.mxu1 %vm6491_vm1, %v6490_v37  ;;  %v1583_v26 = vmul.f32 %v6162_v21, %v6154_v2  ;;  %v5828_v36 = vpack.c.bf16 %v817_v24, %v816_v23  ;;  %v771_v2 = vld [vmem:[%s8207_s9 + $0x28] sm:$0xff]  ;;  %v809_v23 = vld [vmem:[%s8207_s9 + $0x158] sm:$0xff]  ;;  %v5808_v24 = vpack.c.bf16 %v791_v18, %v790_v17 }
 0x50d   : > { %v1580_v28 = vmul.f32 %v6164_v25, %v6156_v3  ;;  %5825 = vmatprep.subr.bf16.mxu1 %v5824_v16  ;;  %v822_v3 = vld [vmem:[%s8207_s9 + $0x1c0] sm:$0xff]  ;;  %v5802_v8 = vpack.c.bf16 %v771_v2, %v770_v61  ;;  %v825_v16 = vld [vmem:[%s8207_s9 + $0x1d8] sm:$0xff]  ;;  %v5846_v29 = vpack.c.bf16 %v809_v23, %v808_v22 }
 0x50e   : > { %v1591_v32 = vsel %vm1587_vm4, %v1583_v26, 0.0  ;;  %v5840_v10 = vpack.c.bf16 %v823_v4, %v822_v3  ;;  %v5844_v21 = vpack.c.bf16 %v825_v16, %v824_v15  ;;  %v774_v25 = vld [vmem:[%s8207_s9 + $0x40] sm:$0xff]  ;;  %v775_v26 = vld [vmem:[%s8207_s9 + $0x48] sm:$0xff] }
 0x50f   : > { %v1588_v42 = vsel %vm1584_vm5, %v1580_v28, 0.0  ;;  %5558 = vmatmul.mubr.msk.f32.vlgmr.msra.gmra.mrb[12].mxu1 %vm1539_vm2, %v1591_v32  ;;  %v793_v28 = vld [vmem:[%s8207_s9 + $0xd8] sm:$0xff]  ;;  %v5810_v30 = vpack.c.bf16 %v775_v26, %v774_v25  ;;  %v776_v32 = vld [vmem:[%s8207_s9 + $0x50] sm:$0xff] }
 0x510   : > { %v6166_v46 = vpop.eup %6165  ;;  %5543 = vmatmul.mubr.msk.f32.vlgmr.msra.gmra.mrb[10].mxu0 %vm1539_vm2, %v1588_v42  ;;  %5827 = vmatpush3.bf16.msra.mxu1 %v5826_v27  ;;  %v792_v27 = vld [vmem:[%s8207_s9 + $0xd0] sm:$0xff]  ;;  %v778_v42 = vld [vmem:[%s8207_s9 + $0x60] sm:$0xff] }
 0x511   : > { %5551 = vmatpush3.msra.mxu0 %v7047_v34  ;;  %5552 = vmatprep.mubr.msk.f32.mxu0 %vm6491_vm1, %v6490_v37  ;;  %v1582_v48 = vmul.f32 %v6166_v46, %v6158_v6  ;;  %v5796_v34 = vpack.c.bf16 %v785_v44, %v784_v38  ;;  %v789_v6 = vld [vmem:[%s8207_s9 + $0xb8] sm:$0xff]  ;;  %v5812_v31 = vpack.c.bf16 %v793_v28, %v792_v27  ;;  %v779_v38 = vld [vmem:[%s8207_s9 + $0x68] sm:$0xff]  ;;  %v796_v46 = vld [vmem:[%s8207_s9 + $0xf0] sm:$0xff] }
 0x512   : > { %5793 = vmatprep.subr.bf16.mxu0 %v5792_v33  ;;  %5829 = vmatprep.subr.bf16.mxu1 %v5828_v36  ;;  %v5804_v13 = vpack.c.bf16 %v789_v6, %v788_v5  ;;  %v777_v33 = vld [vmem:[%s8207_s9 + $0x58] sm:$0xff]  ;;  %v795_v36 = vld [vmem:[%s8207_s9 + $0xe8] sm:$0xff]  ;;  %v5818_v44 = vpack.c.bf16 %v779_v38, %v778_v42 }
 0x513   : > { %v1590_v57 = vsel %vm1586_vm6, %v1582_v48, 0.0  ;;  %v5814_v39 = vpack.c.bf16 %v777_v33, %v776_v32  ;;  %v5816_v40 = vpack.c.bf16 %v795_v36, %v794_v35  ;;  %v826_v48 = vld [vmem:[%s8207_s9 + $0x1e0] sm:$0xff]  ;;  %v2070_v28 = vld [vmem:[#allocation10 + $0x8] sm:$0xff]  ;;  %v2075_v42 = vld [vmem:[#allocation10 + $0x30] sm:$0xff] }
 0x514   : > { %5553 = vmatmul.mubr.msk.f32.vlgmr.msra.gmra.mrb[12].mxu0 %vm1539_vm2, %v1590_v57  ;;  %5831 = vmatpush3.bf16.msra.mxu1 %v5830_v47  ;;  %v797_v47 = vld [vmem:[%s8207_s9 + $0xf8] sm:$0xff]  ;;  %v5848_v53 = vpack.c.bf16 %v827_v50, %v826_v48  ;;  %v828_v57 = vld [vmem:[%s8207_s9 + $0x1f0] sm:$0xff]  ;;  %v2069_v33 = vld [vmem:[#allocation10] sm:$0xff] }
 0x515   : > { %5795 = vmatpush3.bf16.msra.mxu0 %v5794_v49  ;;  %5833 = vmatprep.subr.bf16.mxu1 %v5832_v51  ;;  %v5820_v49 = vpack.c.bf16 %v797_v47, %v796_v46  ;;  %v780_v51 = vld [vmem:[%s8207_s9 + $0x70] sm:$0xff]  ;;  %v5852_v58 = vpack.c.bf16 %v829_v45, %v828_v57  ;;  %v2076_v32 = vld [vmem:[#allocation10 + $0x38] sm:$0xff]  ;;  %v2073_v35 = vld [vmem:[#allocation10 + $0x20] sm:$0xff] }
 0x516   : > { %5797 = vmatprep.subr.bf16.mxu0 %v5796_v34  ;;  %v5822_v34 = vpack.c.bf16 %v781_v52, %v780_v51  ;;  %v2082_v46 = vld [vmem:[#allocation10 + $0x68] sm:$0xff]  ;;  %v2080_v47 = vld [vmem:[#allocation10 + $0x58] sm:$0xff]  ;;  %v2077_v50 = vld [vmem:[#allocation10 + $0x40] sm:$0xff] }
 0x517   : > { %v2081_v51 = vld [vmem:[#allocation10 + $0x60] sm:$0xff]  ;;  %v2088_v45 = vld [vmem:[%s8209_s11 + $0x18] sm:$0xff] }
 0x518   : > { %5835 = vmatpush3.bf16.msra.mxu1 %v5834_v59  ;;  %v812_v59 = vld [vmem:[%s8207_s9 + $0x170] sm:$0xff]  ;;  %v2090_v57 = vld [vmem:[%s8209_s11 + $0x28] sm:$0xff] }
 0x519   : > { %5799 = vmatpush3.bf16.msra.mxu0 %v5798_v60  ;;  %5837 = vmatprep.subr.bf16.mxu1 %v5836_v62  ;;  %v813_v60 = vld [vmem:[%s8207_s9 + $0x178] sm:$0xff] }
 0x51a   : > { %5801 = vmatprep.subr.bf16.mxu0 %v5800_v1  ;;  %v5854_v61 = vpack.c.bf16 %v813_v60, %v812_v59  ;;  %v684_v62 = vld [vmem:[%s608_s12] sm:$0xff]  ;;  %v5872_v59 = vpack.c.bf16 %v2090_v57, %v2086_v55  ;;  %v2117_v57 = vld [vmem:[%s8209_s11 + $0x100] sm:$0xff] }
 0x51b   : > { %v2041_v63 = vsel %vm2040_vm7, %v684_v62, 0.0 }
 0x51c   : > { %5839 = vmatpush3.bf16.msra.mxu1 %v5838_v7  ;;  %2042 = vadd.xlane.f32.xlu1 %v2041_v63 }
 0x51d   : > { %5803 = vmatpush3.bf16.msra.mxu0 %v5802_v8  ;;  %5841 = vmatprep.subr.bf16.mxu1 %v5840_v10 }
 0x51e   : > { %5805 = vmatprep.subr.bf16.mxu0 %v5804_v13 }
 0x520   : > { %5843 = vmatpush3.bf16.msra.mxu1 %v5842_v19 }
 0x521   : > { %5807 = vmatpush3.bf16.msra.mxu0 %v5806_v20  ;;  %5845 = vmatprep.subr.bf16.mxu1 %v5844_v21  ;;  %v6221_v20 = vld [vmem:[%s599_s10] sm:$0xff]  ;;  %s681_s10 = scalar_lea.vmem [#allocation13], %s6842_s16  ;;  %s6400_s16 = sshll.u32 %s6494_s1, 4  ;;  %s6401_s16 = int_to_ptr.vmem [resolvable:$false] %s6400_s16 }
 0x522   : > { %5809 = vmatprep.subr.bf16.mxu0 %v5808_v24  ;;  %s5029_s12 = sshll.u32 %s681_s10, 4  ;;  %s8155_s12 = int_to_ptr.vmem [resolvable:$true] %s5029_s12 }
 0x523   : > { %s6396_s23 = scalar_lea.vmem %s8155_s12, 128  ;;  %p6403_p5 = scmp.lt.s32.totalorder %s8155_s12, %s6401_s16 }
 0x524   : > { %5847 = vmatpush3.bf16.msra.mxu1 %v5846_v29  ;;  %v2074_v29 = vld [vmem:[#allocation10 + $0x28] sm:$0xff]  ;;  %p6397_p0 = scmp.ne.s32.totalorder %s8155_s12, %s6396_s23 }
 0x525   : > { %5811 = vmatpush3.bf16.msra.mxu0 %v5810_v30  ;;  %5849 = vmatprep.subr.bf16.mxu1 %v5848_v53  ;;  %v2072_v30 = vld [vmem:[#allocation10 + $0x18] sm:$0xff]  ;;  %v5862_v53 = vpack.c.bf16 %v2081_v51, %v2077_v50  ;;  %v2111_v50 = vld [vmem:[%s8209_s11 + $0xd0] sm:$0xff] }
 0x526   : > { %5813 = vmatprep.subr.bf16.mxu0 %v5812_v31  ;;  %v5856_v31 = vpack.c.bf16 %v2074_v29, %v2070_v28  ;;  %v5864_v36 = vpack.c.bf16 %v2076_v32, %v2072_v30  ;;  %v2101_v29 = vld [vmem:[%s8209_s11 + $0x80] sm:$0xff]  ;;  %v2115_v51 = vld [vmem:[%s8209_s11 + $0xf0] sm:$0xff]  ;;  %p6398_p10 = pnand %p6397_p0, %p8281_p2 }
 0x527   : > { %v2105_v30 = vld [vmem:[%s8209_s11 + $0xa0] sm:$0xff] }
 0x528   : > { %5851 = vmatpush3.bf16.msra.mxu1 %v5850_v56  ;;  %p6399_p11 = pneg %p6398_p10 }
 0x529   : > { %5815 = vmatpush3.bf16.msra.mxu0 %v5814_v39  ;;  %5853 = vmatprep.subr.bf16.mxu1 %v5852_v58  ;;  %v5858_v39 = vpack.c.bf16 %v2073_v35, %v2069_v33  ;;  %v2092_v58 = vld [vmem:[%s8209_s11 + $0x38] sm:$0xff]  ;;  %v2103_v33 = vld [vmem:[%s8209_s11 + $0x90] sm:$0xff] }
 0x52a   : > { %5817 = vmatprep.subr.bf16.mxu0 %v5816_v40  ;;  %v2071_v40 = vld [vmem:[#allocation10 + $0x10] sm:$0xff]  ;;  %v5896_v60 = vpack.c.bf16 %v2092_v58, %v2088_v45  ;;  %v2121_v45 = vld [vmem:[%s8209_s11 + $0x120] sm:$0xff] }
 0x52b   : > { %v5866_v38 = vpack.c.bf16 %v2075_v42, %v2071_v40  ;;  %v2107_v35 = vld [vmem:[%s8209_s11 + $0xb0] sm:$0xff]  ;;  %v2112_v40 = vld [vmem:[%s8209_s11 + $0xd8] sm:$0xff] }
 0x52c   : > { %5855 = vmatpush3.bf16.msra.mxu1 %v5854_v61  ;;  %v2116_v42 = vld [vmem:[%s8209_s11 + $0xf8] sm:$0xff] }
 0x52d   : > { %5819 = vmatpush3.bf16.msra.mxu0 %v5818_v44  ;;  %5865 = vmatprep.subr.bf16.mxu1 %v5864_v36  ;;  %v2078_v44 = vld [vmem:[#allocation10 + $0x48] sm:$0xff] }
 0x52e   : > { %5821 = vmatprep.subr.bf16.mxu0 %v5820_v49  ;;  %v5860_v48 = vpack.c.bf16 %v2082_v46, %v2078_v44  ;;  %v2084_v49 = vld [vmem:[#allocation10 + $0x78] sm:$0xff]  ;;  %v2110_v36 = vld [vmem:[%s8209_s11 + $0xc8] sm:$0xff]  ;;  %v5906_v44 = vpack.c.bf16 %v2107_v35, %v2103_v33 }
 0x52f   : > { %v5868_v52 = vpack.c.bf16 %v2084_v49, %v2080_v47  ;;  %v2109_v46 = vld [vmem:[%s8209_s11 + $0xc0] sm:$0xff]  ;;  %v5908_v49 = vpack.c.bf16 %v2116_v42, %v2112_v40 }
 0x530   : > { %v2113_v47 = vld [vmem:[%s8209_s11 + $0xe0] sm:$0xff] }
 0x531   : > { %5823 = vmatpush3.bf16.msra.mxu0 %v5822_v34  ;;  %v2079_v34 = vld [vmem:[#allocation10 + $0x50] sm:$0xff]  ;;  %v5886_v55 = vpack.c.bf16 %v2113_v47, %v2109_v46  ;;  %v2145_v40 = vld [vmem:[%s8274_s22 + $0x40] sm:$0xff] }
 0x532   : > { %5857 = vmatprep.subr.bf16.mxu0 %v5856_v31  ;;  %v5870_v56 = vpack.c.bf16 %v2083_v54, %v2079_v34  ;;  %v2120_v34 = vld [vmem:[%s8209_s11 + $0x118] sm:$0xff]  ;;  %v2149_v42 = vld [vmem:[%s8274_s22 + $0x60] sm:$0xff]  ;;  %v2147_v46 = vld [vmem:[%s8274_s22 + $0x50] sm:$0xff] }
 0x533   : > { %v2124_v54 = vld [vmem:[%s8209_s11 + $0x138] sm:$0xff]  ;;  %v2151_v47 = vld [vmem:[%s8274_s22 + $0x70] sm:$0xff] }
 0x5a9   : > { %v2043_v8 = vpop.xlane.xlu1 %2042 }
 0x5aa   : > { %v2045_v9 = vmul.f32 0.01, %v2043_v8 }
 0x5ac   : > { %v7288_v10 = vsub.f32 %v684_v62, %v2045_v9  ;;  %v2098_v9 = vld [vmem:[%s8209_s11 + $0x68] sm:$0xff] }
 0x5ae   : > { %v2047_v11 = vmul.f32 %v7288_v10, %v7288_v10 }
 0x5b0   : > { %v2048_v12 = vsel %vm2040_vm7, %v2047_v11, 0.0  ;;  %v2096_v11 = vld [vmem:[%s8209_s11 + $0x58] sm:$0xff] }
 0x5b1   : > { %2049 = vadd.xlane.f32.xlu1 %v2048_v12  ;;  %v2100_v12 = vld [vmem:[%s8209_s11 + $0x78] sm:$0xff] }
 0x5de   : > { %v1734_v0 = vpop.f32.mrb[10].mxu1 }
 0x5df   : > { %v5549_v1 = vpop.f32.mrb[11].mxu1  ;;  %1948 = vmatprep.mubr.f32.mxu0 %v1734_v0 }
 0x5e2   : > { %v1880_v2 = vpop.f32.mrb[12].mxu1 }
 0x5e3   : > { %v1661_v3 = vpop.f32.mrb[10].mxu0  ;;  %v5559_v4 = vpop.f32.mrb[13].mxu1  ;;  %2018 = vmatprep.mubr.f32.mxu1 %v1880_v2  ;;  %v2085_v2 = vld [vmem:[%s8209_s11] sm:$0xff] }
 0x5e4   : > { %v5544_v5 = vpop.f32.mrb[11].mxu0  ;;  %1949 = vmatmul.mubr.f32.vlgmr.msra.gmra.mrb[14].mxu0 %v1661_v3  ;;  %v2089_v3 = vld [vmem:[%s8209_s11 + $0x20] sm:$0xff] }
 0x5e5   : > { %2320 = vmatprep.mubr.f32.mxu0 %v6490_v37  ;;  %5859 = vmatpush1.bf16.msra.mxu0 %v5858_v39  ;;  %v2087_v5 = vld [vmem:[%s8209_s11 + $0x10] sm:$0xff]  ;;  %v2114_v39 = vld [vmem:[%s8209_s11 + $0xe8] sm:$0xff] }
 0x5e6   : > { %5861 = vmatprep.subr.bf16.mxu0 %v5860_v48  ;;  %v5884_v48 = vpack.c.bf16 %v2114_v39, %v2110_v36 }
 0x5e7   : > { %v1807_v6 = vpop.f32.mrb[12].mxu0 }
 0x5e8   : > { %v5554_v7 = vpop.f32.mrb[13].mxu0  ;;  %2019 = vmatmul.mubr.f32.vlgmr.msra.gmra.mrb[14].mxu1 %v1807_v6  ;;  %v2091_v6 = vld [vmem:[%s8209_s11 + $0x30] sm:$0xff] }
 0x5e9   : > { %2391 = vmatprep.mubr.f32.mxu1 %v6490_v37  ;;  %5867 = vmatpush1.bf16.msra.mxu1 %v5866_v38  ;;  %v2094_v7 = vld [vmem:[%s8209_s11 + $0x48] sm:$0xff]  ;;  %v5882_v38 = vpack.c.bf16 %v2105_v30, %v2101_v29  ;;  %v2148_v30 = vld [vmem:[%s8274_s22 + $0x58] sm:$0xff] }
 0x5ea   : > { %5869 = vmatprep.subr.bf16.mxu1 %v5868_v52  ;;  %5863 = vmatpush1.bf16.msra.mxu0 %v5862_v53  ;;  %v2118_v52 = vld [vmem:[%s8209_s11 + $0x108] sm:$0xff] }
 0x5eb   : > { %5873 = vmatprep.subr.bf16.mxu0 %v5872_v59  ;;  %v2122_v53 = vld [vmem:[%s8209_s11 + $0x128] sm:$0xff]  ;;  %v5912_v59 = vpack.c.bf16 %v2124_v54, %v2120_v34  ;;  %v2153_v34 = vld [vmem:[%s8274_s22 + $0x80] sm:$0xff] }
 0x5ec   : > { %v5888_v58 = vpack.c.bf16 %v2122_v53, %v2118_v52  ;;  %v2150_v29 = vld [vmem:[%s8274_s22 + $0x68] sm:$0xff]  ;;  %v5926_v52 = vpack.c.bf16 %v2149_v42, %v2145_v40  ;;  %v5950_v53 = vpack.c.bf16 %v2151_v47, %v2147_v46  ;;  %v2157_v54 = vld [vmem:[%s8274_s22 + $0xa0] sm:$0xff] }
 0x5ed   : > { %5871 = vmatpush1.bf16.msra.mxu1 %v5870_v56  ;;  %v5910_v56 = vpack.c.bf16 %v2115_v51, %v2111_v50  ;;  %v2156_v50 = vld [vmem:[%s8274_s22 + $0x98] sm:$0xff] }
 0x5ee   : > { %5897 = vmatprep.subr.bf16.mxu1 %v5896_v60  ;;  %v2119_v60 = vld [vmem:[%s8209_s11 + $0x110] sm:$0xff]  ;;  %v2160_v51 = vld [vmem:[%s8274_s22 + $0xb8] sm:$0xff] }
 0x63e   : > { %v2050_v0 = vpop.xlane.xlu1 %2049 }
 0x63f   : > { %v2051_v8 = vmul.f32 0.01, %v2050_v0  ;;  %v2128_v0 = vld [vmem:[%s8209_s11 + $0x158] sm:$0xff] }
 0x6b7   : > { %v5366_v13 = vpop.f32.mrb[14].mxu0 }
 0x6b8   : > { %v5367_v14 = vpop.f32.mrb[15].mxu0 }
 0x6b9   : > { %v5368_v15 = vadd.f32 %v5367_v14, %v5366_v13  ;;  %v5874_v14 = vpack.c.bf16 %v2089_v3, %v2085_v2  ;;  %v5890_v3 = vpack.c.bf16 %v2121_v45, %v2117_v57  ;;  %v2155_v57 = vld [vmem:[%s8274_s22 + $0x90] sm:$0xff] }
 0x6ba   : > { %v2159_v45 = vld [vmem:[%s8274_s22 + $0xb0] sm:$0xff] }
 0x6bb   : > { %v5401_v16 = vpop.f32.mrb[14].mxu1 }
 0x6bc   : > { %v5402_v17 = vpop.f32.mrb[15].mxu1 }
 0x6bd   : > { %v5403_v18 = vadd.f32 %v5402_v17, %v5401_v16  ;;  %v2093_v16 = vld [vmem:[%s8209_s11 + $0x40] sm:$0xff] }
 0x6be   : > { %v2097_v17 = vld [vmem:[%s8209_s11 + $0x60] sm:$0xff] }
 0x6bf   : > { %v2021_v19 = vadd.f32 %v5403_v18, %v5368_v15  ;;  %v5898_v15 = vpack.c.bf16 %v2091_v6, %v2087_v5  ;;  %v2125_v5 = vld [vmem:[%s8209_s11 + $0x140] sm:$0xff] }
 0x6c1   : > { %v7295_v21 = vadd.f32 %v6221_v20, %v2021_v19  ;;  %v5876_v19 = vpack.c.bf16 %v2098_v9, %v2094_v7  ;;  %v5900_v20 = vpack.c.bf16 %v2100_v12, %v2096_v11  ;;  %v2127_v9 = vld [vmem:[%s8209_s11 + $0x150] sm:$0xff] }
 0x6c2   : > { %v2131_v11 = vld [vmem:[%s8209_s11 + $0x170] sm:$0xff] }
 0x6c3   : > { %v2025_v22 = vsel %vm689_vm0, %v7295_v21, 0.0 }
 0x6c4   : > { %2026 = vadd.xlane.f32.xlu0 %v2025_v22  ;;  %v2095_v22 = vld [vmem:[%s8209_s11 + $0x50] sm:$0xff] }
 0x751   : > { %v2027_v23 = vpop.xlane.xlu0 %2026 }
 0x752   : > { %v2028_v24 = vmul.f32 0.03125, %v2027_v23  ;;  %v2102_v23 = vld [vmem:[%s8209_s11 + $0x88] sm:$0xff] }
 0x754   : > { %v2029_v25 = vsub.f32 %v7295_v21, %v2028_v24  ;;  %v2052_v24 = vadd.f32 1e-05, %v2051_v8  ;;  %v2129_v8 = vld [vmem:[%s8209_s11 + $0x160] sm:$0xff] }
 0x756   : > { %v2030_v26 = vmul.f32 %v2029_v25, %v2029_v25 }
 0x758   : > { %v2031_v27 = vsel %vm689_vm0, %v2030_v26, 0.0  ;;  %v2108_v26 = vld [vmem:[%s8209_s11 + $0xb8] sm:$0xff] }
 0x759   : > { %2032 = vadd.xlane.f32.xlu0 %v2031_v27  ;;  %v5878_v27 = vpack.c.bf16 %v2097_v17, %v2093_v16  ;;  %v2134_v16 = vld [vmem:[%s8209_s11 + $0x188] sm:$0xf]  ;;  %v2136_v17 = vld [vmem:[%s8209_s11 + $0x198] sm:$0xf] }
 0x7e6   : > { %v2033_v61 = vpop.xlane.xlu0 %2032 }
 0x7e7   : > { %v2034_v62 = vmul.f32 0.03125, %v2033_v61  ;;  %v2123_v61 = vld [vmem:[%s8209_s11 + $0x130] sm:$0xff] }
 0x7e9   : > { %v2035_v63 = vadd.f32 1e-05, %v2034_v62  ;;  %v2126_v62 = vld [vmem:[%s8209_s11 + $0x148] sm:$0xff] }
 0x7eb   : > { %6167 = vrsqrt.f32 %v2035_v63  ;;  %v2130_v63 = vld [vmem:[%s8209_s11 + $0x168] sm:$0xff] }
 0x7ec   : > { %6169 = vrsqrt.f32 %v2052_v24  ;;  %v5892_v6 = vpack.c.bf16 %v2130_v63, %v2126_v62  ;;  %v2144_v24 = vld [vmem:[%s8274_s22 + $0x38] sm:$0xff]  ;;  %v5930_v62 = vpack.c.bf16 %v2157_v54, %v2153_v34  ;;  %v5954_v63 = vpack.c.bf16 %v2159_v45, %v2155_v57 }
 0x7f5   : > { %v6168_v1 = vpop.eup %6167 }
 0x7f6   : > { %v2037_v4 = vmul.f32 %v6168_v1, %v2029_v25  ;;  %v2106_v25 = vld [vmem:[%s8209_s11 + $0xa8] sm:$0xff]  ;;  %v2132_v1 = vld [vmem:[%s8209_s11 + $0x178] sm:$0xff]  ;;  %v6170_v2 = vpop.eup %6169 }
 0x7f7   : > { %v5880_v31 = vpack.c.bf16 %v2106_v25, %v2102_v23  ;;  %v5916_v7 = vpack.c.bf16 %v2132_v1, %v2128_v0  ;;  %v2054_v12 = vmul.f32 %v6170_v2, %v7288_v10  ;;  %v5192_v10 = vld [vmem:[%s8203_s5] ss:$0 sm:$0xff] }
 0x7f8   : > { %v2038_v13 = vmul.f32 %v6934_v41, %v2037_v4  ;;  %v2099_v41 = vld [vmem:[%s8209_s11 + $0x70] sm:$0xff]  ;;  %v5914_v4 = vpack.c.bf16 %v2123_v61, %v2119_v60  ;;  %v2137_v25 = vld [vmem:[%s8274_s22] sm:$0xff]  ;;  %v2164_v60 = vld [vmem:[%s8274_s22 + $0xd8] sm:$0xff] }
 0x7f9   : > { %v5902_v28 = vpack.c.bf16 %v2099_v41, %v2095_v22  ;;  %v2133_v22 = vld [vmem:[%s8209_s11 + $0x180] sm:$0xf]  ;;  %v2135_v41 = vld [vmem:[%s8209_s11 + $0x190] sm:$0xf]  ;;  %v2168_v61 = vld [vmem:[%s8274_s22 + $0xf8] sm:$0xff] }
 0x7fa   : > { %v2039_v18 = vadd.f32 %v6936_v43, %v2038_v13  ;;  %v2104_v43 = vld [vmem:[%s8209_s11 + $0x98] sm:$0xff]  ;;  %v5894_v13 = vpack.c.bf16 %v2129_v8, %v2125_v5  ;;  %v2161_v0 = vld [vmem:[%s8274_s22 + $0xc0] sm:$0xff]  ;;  %v2167_v5 = vld [vmem:[%s8274_s22 + $0xf0] sm:$0xff] }
 0x7fb   : > { %v5904_v32 = vpack.c.bf16 %v2108_v26, %v2104_v43  ;;  %v2141_v43 = vld [vmem:[%s8274_s22 + $0x20] sm:$0xff]  ;;  %v2139_v26 = vld [vmem:[%s8274_s22 + $0x10] sm:$0xff]  ;;  %v2172_v8 = vld [vmem:[%s8274_s22 + $0x118] sm:$0xff] }
 0x7fc   : > { %5193 = vmatmul.mubr.msk.f32.vlgmr.msra.gmra.mrb[16].mxu0 %vm689_vm0, %v2039_v18  ;;  %5194 = vmatmul.mubr.msk.f32.vlgmr.msra.gmra.mrb[16].mxu1 %vm689_vm0, %v2039_v18  ;;  %v2138_v18 = vld [vmem:[%s8274_s22 + $0x8] sm:$0xff]  ;;  %v5922_v36 = vpack.c.bf16 %v2141_v43, %v2137_v25  ;;  %v2165_v1 = vld [vmem:[%s8274_s22 + $0xe0] sm:$0xff] }
 0x7fd   : > { %5875 = vmatpush1.bf16.msra.mxu0 %v5874_v14  ;;  %5899 = vmatpush1.bf16.msra.mxu1 %v5898_v15  ;;  %v5918_v14 = vpack.c.bf16 %v2131_v11, %v2127_v9  ;;  %v5191_v15 = vld [vmem:[%s8202_s4] ss:$0 sm:$0xff]  ;;  %v2176_v9 = vld [vmem:[%s8274_s22 + $0x138] sm:$0xff]  ;;  %v5934_v11 = vpack.c.bf16 %v2165_v1, %v2161_v0 }
 0x7fe   : > { %5877 = vmatprep.subr.bf16.mxu0 %v5876_v19  ;;  %5901 = vmatprep.subr.bf16.mxu1 %v5900_v20  ;;  %v2142_v19 = vld [vmem:[%s8274_s22 + $0x28] sm:$0xff]  ;;  %v2140_v20 = vld [vmem:[%s8274_s22 + $0x18] sm:$0xff]  ;;  %v2061_v23 = vmul.f32 %v5191_v15, %v2054_v12 }
 0x7ff   : > { %2478 = vmatprep.mubr.f32.mxu0 %v6490_v37  ;;  %2549 = vmatprep.mubr.f32.mxu1 %v6490_v37  ;;  %v5944_v33 = vpack.c.bf16 %v2144_v24, %v2140_v20  ;;  %v2180_v20 = vld [vmem:[%s8274_s22 + $0x158] sm:$0xff]  ;;  %v2177_v24 = vld [vmem:[%s8274_s22 + $0x140] sm:$0xff] }
 0x800   : > { %v7508_v35 = vadd.f32 %v5192_v10, %v2061_v23  ;;  %v2175_v10 = vld [vmem:[%s8274_s22 + $0x130] sm:$0xff] }
 0x801   : > { %5879 = vmatpush1.bf16.msra.mxu0 %v5878_v27  ;;  %5903 = vmatpush1.bf16.msra.mxu1 %v5902_v28  ;;  %v2143_v27 = vld [vmem:[%s8274_s22 + $0x30] sm:$0xff]  ;;  %v2146_v28 = vld [vmem:[%s8274_s22 + $0x48] sm:$0xff] }
 0x802   : > { %5881 = vmatprep.subr.bf16.mxu0 %v5880_v31  ;;  %5905 = vmatprep.subr.bf16.mxu1 %v5904_v32  ;;  %v2152_v31 = vld [vmem:[%s8274_s22 + $0x78] sm:$0xff]  ;;  %v5920_v32 = vpack.c.bf16 %v2142_v19, %v2138_v18  ;;  %v5946_v39 = vpack.c.bf16 %v2143_v27, %v2139_v26  ;;  %v2178_v18 = vld [vmem:[%s8274_s22 + $0x148] sm:$0xff]  ;;  %v2181_v26 = vld [vmem:[%s8274_s22 + $0x160] sm:$0xff] }
 0x803   : > { %v2182_v19 = vld [vmem:[%s8274_s22 + $0x168] sm:$0xff]  ;;  %v2179_v27 = vld [vmem:[%s8274_s22 + $0x150] sm:$0xff] }
 0x804   : > { %v5940_v25 = vpack.c.bf16 %v2182_v19, %v2178_v18 }
 0x805   : > { %5883 = vmatpush1.bf16.msra.mxu0 %v5882_v38  ;;  %5907 = vmatpush1.bf16.msra.mxu1 %v5906_v44  ;;  %v5924_v38 = vpack.c.bf16 %v2150_v29, %v2146_v28  ;;  %v5948_v44 = vpack.c.bf16 %v2152_v31, %v2148_v30  ;;  %v2183_v28 = vld [vmem:[%s8274_s22 + $0x170] sm:$0xff]  ;;  %v5942_v29 = vpack.c.bf16 %v2181_v26, %v2177_v24  ;;  %v2186_v31 = vld [vmem:[%s8274_s22 + $0x188] sm:$0xf] }
 0x806   : > { %5885 = vmatprep.subr.bf16.mxu0 %v5884_v48  ;;  %5909 = vmatprep.subr.bf16.mxu1 %v5908_v49  ;;  %v2154_v48 = vld [vmem:[%s8274_s22 + $0x88] sm:$0xff]  ;;  %v5966_v30 = vpack.c.bf16 %v2183_v28, %v2179_v27 }
 0x807   : > { %v2158_v49 = vld [vmem:[%s8274_s22 + $0xa8] sm:$0xff] }
 0x809   : > { %5887 = vmatpush1.bf16.msra.mxu0 %v5886_v55  ;;  %5911 = vmatpush1.bf16.msra.mxu1 %v5910_v56  ;;  %v5928_v55 = vpack.c.bf16 %v2158_v49, %v2154_v48  ;;  %v5952_v56 = vpack.c.bf16 %v2160_v51, %v2156_v50 }
 0x80a   : > { %5889 = vmatprep.subr.bf16.mxu0 %v5888_v58  ;;  %5913 = vmatprep.subr.bf16.mxu1 %v5912_v59  ;;  %v2162_v58 = vld [vmem:[%s8274_s22 + $0xc8] sm:$0xff] }
 0x80b   : > { %v2166_v59 = vld [vmem:[%s8274_s22 + $0xe8] sm:$0xff] }
 0x80c   : > { %v5932_v2 = vpack.c.bf16 %v2166_v59, %v2162_v58 }
 0x80d   : > { %5891 = vmatpush1.bf16.msra.mxu0 %v5890_v3  ;;  %5915 = vmatpush1.bf16.msra.mxu1 %v5914_v4  ;;  %v5956_v3 = vpack.c.bf16 %v2168_v61, %v2164_v60  ;;  %v2163_v4 = vld [vmem:[%s8274_s22 + $0xd0] sm:$0xff] }
 0x80e   : > { %5893 = vmatprep.subr.bf16.mxu0 %v5892_v6  ;;  %5917 = vmatprep.subr.bf16.mxu1 %v5916_v7  ;;  %v2170_v6 = vld [vmem:[%s8274_s22 + $0x108] sm:$0xff]  ;;  %v5958_v12 = vpack.c.bf16 %v2167_v5, %v2163_v4 }
 0x80f   : > { %v2174_v7 = vld [vmem:[%s8274_s22 + $0x128] sm:$0xff] }
 0x810   : > { %v5936_v15 = vpack.c.bf16 %v2174_v7, %v2170_v6 }
 0x811   : > { %5895 = vmatpush1.bf16.msra.mxu0 %v5894_v13  ;;  %5919 = vmatpush1.bf16.msra.mxu1 %v5918_v14  ;;  %v2169_v13 = vld [vmem:[%s8274_s22 + $0x100] sm:$0xff] }
 0x812   : > { %5195 = vmatprep.subr.msk.mxu0 %vm2401_vm8, %v2134_v16  ;;  %5198 = vmatprep.subr.msk.mxu1 %vm2401_vm8, %v2136_v17  ;;  %v2173_v14 = vld [vmem:[%s8274_s22 + $0x120] sm:$0xff]  ;;  %v5960_v16 = vpack.c.bf16 %v2176_v9, %v2172_v8  ;;  %v2171_v17 = vld [vmem:[%s8274_s22 + $0x110] sm:$0xff] }
 0x813   : > { %v5962_v23 = vpack.c.bf16 %v2175_v10, %v2171_v17 }
 0x815   : > { %5196 = vmatpush1.msk.msra.mxu0 %vm2401_vm8, %v2133_v22  ;;  %5199 = vmatpush1.msk.msra.mxu1 %vm2401_vm8, %v2135_v41  ;;  %v2184_v22 = vld [vmem:[%s8274_s22 + $0x178] sm:$0xff]  ;;  %v5938_v41 = vpack.c.bf16 %v2173_v14, %v2169_v13 }
 0x816   : > { %5197 = vmatmul.mubr.msk.f32.vlgmr.msra.gmra.mrb[18].mxu0 %vm2040_vm7, %v7508_v35  ;;  %5200 = vmatmul.mubr.msk.f32.vlgmr.msra.gmra.mrb[18].mxu1 %vm2040_vm7, %v7508_v35  ;;  %v5964_v43 = vpack.c.bf16 %v2184_v22, %v2180_v20 }
 0x817   : > { %5921 = vmatprep.subr.bf16.mxu0 %v5920_v32  ;;  %5945 = vmatprep.subr.bf16.mxu1 %v5944_v33  ;;  %v2188_v32 = vld [vmem:[%s8274_s22 + $0x198] sm:$0xf]  ;;  %v2185_v33 = vld [vmem:[%s8274_s22 + $0x180] sm:$0xf] }
 0x818   : > { %5923 = vmatpush1.bf16.msra.mxu0 %v5922_v36  ;;  %5947 = vmatpush1.bf16.msra.mxu1 %v5946_v39  ;;  %v2187_v36 = vld [vmem:[%s8274_s22 + $0x190] sm:$0xf] }
 0x819   : > { %5925 = vmatprep.subr.bf16.mxu0 %v5924_v38  ;;  %5949 = vmatprep.subr.bf16.mxu1 %v5948_v44 }
 0x81a   : > { %2632 = vmatprep.mubr.f32.mxu0 %v6490_v37  ;;  %2703 = vmatprep.mubr.f32.mxu1 %v6490_v37 }
 0x81c   : > { %5927 = vmatpush1.bf16.msra.mxu0 %v5926_v52  ;;  %5951 = vmatpush1.bf16.msra.mxu1 %v5950_v53 }
 0x81d   : > { %5929 = vmatprep.subr.bf16.mxu0 %v5928_v55  ;;  %5953 = vmatprep.subr.bf16.mxu1 %v5952_v56 }
 0x820   : > { %5931 = vmatpush1.bf16.msra.mxu0 %v5930_v62  ;;  %5955 = vmatpush1.bf16.msra.mxu1 %v5954_v63 }
 0x821   : > { %5933 = vmatprep.subr.bf16.mxu0 %v5932_v2  ;;  %5957 = vmatprep.subr.bf16.mxu1 %v5956_v3 }
 0x824   : > { %5935 = vmatpush1.bf16.msra.mxu0 %v5934_v11  ;;  %5959 = vmatpush1.bf16.msra.mxu1 %v5958_v12 }
 0x825   : > { %5937 = vmatprep.subr.bf16.mxu0 %v5936_v15  ;;  %5961 = vmatprep.subr.bf16.mxu1 %v5960_v16 }
 0x828   : > { %5939 = vmatpush1.bf16.msra.mxu0 %v5938_v41  ;;  %5963 = vmatpush1.bf16.msra.mxu1 %v5962_v23 }
 0x829   : > { %5941 = vmatprep.subr.bf16.mxu0 %v5940_v25  ;;  %5965 = vmatprep.subr.bf16.mxu1 %v5964_v43 }
 0x82c   : > { %5943 = vmatpush1.bf16.msra.mxu0 %v5942_v29  ;;  %5967 = vmatpush1.bf16.msra.mxu1 %v5966_v30 }
 0x82d   : > { %5201 = vmatprep.subr.msk.mxu0 %vm2401_vm8, %v2186_v31  ;;  %5204 = vmatprep.subr.msk.mxu1 %vm2401_vm8, %v2188_v32 }
 0x830   : > { %5202 = vmatpush1.msk.msra.mxu0 %vm2401_vm8, %v2185_v33  ;;  %5205 = vmatpush1.msk.msra.mxu1 %vm2401_vm8, %v2187_v36 }
 0x831   : > { %5203 = vmatmul.mubr.msk.f32.vlgmr.msra.gmra.mrb[20].mxu0 %vm2040_vm7, %v7508_v35  ;;  %5206 = vmatmul.mubr.msk.f32.vlgmr.msra.gmra.mrb[20].mxu1 %vm2040_vm7, %v7508_v35 }
 0x832   : > { %5560 = vmatprep.subr.mxu0 %v6490_v37  ;;  %5562 = vmatprep.mubr.msk.f32.mxu0 %vm6491_vm1, %v6490_v37 }
 0x833   : > { %5565 = vmatprep.subr.mxu1 %v6490_v37  ;;  %5567 = vmatprep.mubr.msk.f32.mxu1 %vm6491_vm1, %v6490_v37 }
 0x8cf   : > { %v2322_v39 = vpop.f32.mrb[16].mxu0  ;;  %v2393_v40 = vpop.f32.mrb[16].mxu1 }
 0x8d0   : > { %v2395_v42 = vpop.f32.mrb[17].mxu1  ;;  %2711 = vrot.lane.b32.xlu1 %v2322_v39, %s6492_s18  ;;  %v2324_v38 = vpop.f32.mrb[17].mxu0 }
 0x8e9   : > { %v2480_v44 = vpop.f32.mrb[18].mxu0  ;;  %v2551_v35 = vpop.f32.mrb[18].mxu1 }
 0x8ea   : > { %v2553_v46 = vpop.f32.mrb[19].mxu1  ;;  %2723 = vrot.lane.b32.xlu0 %v2480_v44, %s6492_s18  ;;  %v2482_v47 = vpop.f32.mrb[19].mxu0  ;;  %5561 = vmatpush3.xpose.msk.msra.mxu0 %vm2750_vm9, %v2480_v44 }
 0x8eb   : > { %2726 = vrot.lane.b32.xlu1 %v2482_v47, %s6492_s18  ;;  %5570 = vmatprep.subr.mxu0 %v6490_v37 }
 0x8ed   : > { %5563 = vmatmul.mubr.msk.f32.vlgmr.msra.gmra.mrb[22].mxu0 %vm2750_vm9, %v2322_v39 }
 0x8ee   : > { %2729 = vrot.lane.b32.xlu0 %v2551_v35, %s6492_s18  ;;  %5571 = vmatpush3.xpose.msk.msra.mxu0 %vm2750_vm9, %v2482_v47 }
 0x8ef   : > { %2714 = vrot.lane.b32.xlu1 %v2324_v38, %s6492_s18  ;;  %5572 = vmatprep.mubr.msk.f32.mxu0 %vm6491_vm1, %v6490_v37 }
 0x8f0   : > { %5580 = vmatprep.subr.mxu0 %v6490_v37 }
 0x8f1   : > { %5573 = vmatmul.mubr.msk.f32.vlgmr.msra.gmra.mrb[24].mxu0 %vm2750_vm9, %v2324_v38 }
 0x8f2   : > { %2732 = vrot.lane.b32.xlu0 %v2553_v46, %s6492_s18  ;;  %5581 = vmatpush3.xpose.msk.msra.mxu0 %vm2750_vm9, %v2551_v35 }
 0x8f3   : > { %2717 = vrot.lane.b32.xlu1 %v2393_v40, %s6492_s18  ;;  %5582 = vmatprep.mubr.msk.f32.mxu0 %vm6491_vm1, %v6490_v37 }
 0x8f4   : > { %5590 = vmatprep.subr.mxu0 %v6490_v37 }
 0x8f5   : > { %5583 = vmatmul.mubr.msk.f32.vlgmr.msra.gmra.mrb[26].mxu0 %vm2750_vm9, %v2393_v40 }
 0x8f6   : > { %5591 = vmatpush3.xpose.msk.msra.mxu0 %vm2750_vm9, %v2553_v46  ;;  %5592 = vmatprep.mubr.msk.f32.mxu0 %vm6491_vm1, %v6490_v37 }
 0x8f7   : > { %2720 = vrot.lane.b32.xlu1 %v2395_v42, %s6492_s18  ;;  %5600 = vmatprep.subr.bf16.mxu0 %v6490_v37 }
 0x8f9   : > { %5593 = vmatmul.mubr.msk.f32.vlgmr.msra.gmra.mrb[28].mxu0 %vm2750_vm9, %v2395_v42 }
 0x8fa   : > { %5602 = vmatprep.mubr.msk.bf16.mxu0 %vm6491_vm1, %v6490_v37 }
 0x904   : > { %v7680_v48 = vpop.f32.mrb[20].mxu0  ;;  %v7682_v49 = vpop.f32.mrb[20].mxu1 }
 0x905   : > { %v3455_v50 = vpack.c.bf16 %v7680_v48, %v7680_v48  ;;  %v7686_v51 = vpop.f32.mrb[21].mxu0  ;;  %v7688_v52 = vpop.f32.mrb[21].mxu1 }
 0x906   : > { %v6068_v53 = vpack.i.bf16 %v7686_v51, %v7680_v48 }
 0x907   : > { %v3467_v34 = vsel %vm2401_vm8, %v3455_v50, 0 }
 0x908   : > { %5601 = vmatpush3.bf16.msra.mxu0 %v3467_v34 }
 0x909   : > { %5612 = vmatprep.subr.bf16.mxu0 %v6490_v37 }
 0x942   : > { %v2712_v54 = vpop.permute.xlu1 %2711 }
 0x95c   : > { %v2724_v55 = vpop.permute.xlu0 %2723 }
 0x95d   : > { %5566 = vmatpush3.xpose.msk.msra.mxu1 %vm2750_vm9, %v2724_v55  ;;  %v2727_v56 = vpop.permute.xlu1 %2726 }
 0x95e   : > { %5575 = vmatprep.subr.mxu1 %v6490_v37 }
 0x960   : > { %5568 = vmatmul.mubr.msk.f32.vlgmr.msra.gmra.mrb[22].mxu1 %vm2750_vm9, %v2712_v54  ;;  %v2730_v45 = vpop.permute.xlu0 %2729 }
 0x961   : > { %5576 = vmatpush3.xpose.msk.msra.mxu1 %vm2750_vm9, %v2727_v56  ;;  %v2715_v57 = vpop.permute.xlu1 %2714  ;;  %5577 = vmatprep.mubr.msk.f32.mxu1 %vm6491_vm1, %v6490_v37 }
 0x962   : > { %5585 = vmatprep.subr.mxu1 %v6490_v37 }
 0x964   : > { %5578 = vmatmul.mubr.msk.f32.vlgmr.msra.gmra.mrb[24].mxu1 %vm2750_vm9, %v2715_v57  ;;  %v2733_v59 = vpop.permute.xlu0 %2732 }
 0x965   : > { %5586 = vmatpush3.xpose.msk.msra.mxu1 %vm2750_vm9, %v2730_v45  ;;  %v2718_v58 = vpop.permute.xlu1 %2717  ;;  %5587 = vmatprep.mubr.msk.f32.mxu1 %vm6491_vm1, %v6490_v37 }
 0x966   : > { %5595 = vmatprep.subr.mxu1 %v6490_v37 }
 0x968   : > { %5588 = vmatmul.mubr.msk.f32.vlgmr.msra.gmra.mrb[26].mxu1 %vm2750_vm9, %v2718_v58 }
 0x969   : > { %5596 = vmatpush3.xpose.msk.msra.mxu1 %vm2750_vm9, %v2733_v59  ;;  %5597 = vmatprep.mubr.msk.f32.mxu1 %vm6491_vm1, %v6490_v37  ;;  %v2721_v60 = vpop.permute.xlu1 %2720 }
 0x96a   : > { %5606 = vmatprep.subr.bf16.mxu1 %v6490_v37 }
 0x96c   : > { %5598 = vmatmul.mubr.msk.f32.vlgmr.msra.gmra.mrb[28].mxu1 %vm2750_vm9, %v2721_v60 }
 0x96d   : > { %5608 = vmatprep.mubr.msk.bf16.mxu1 %vm6491_vm1, %v6490_v37 }
 0x9c0   : > { %v7714_v61 = vpop.f32.mrb[22].mxu0 }
 0x9c1   : > { %v5564_v62 = vpop.f32.mrb[23].mxu0  ;;  %v3343_v63 = vsel %vm1539_vm2, %v7714_v61, -inf  ;;  %vm3431_vm10 = vcmp.gt.f32.partialorder %v7714_v61, 0.0 }
 0x9c2   : > { %3344 = vmax.xlane.f32.xlu0 %v3343_v63 }
 0x9c4   : > { %v7718_v0 = vpop.f32.mrb[24].mxu0 }
 0x9c5   : > { %v5574_v1 = vpop.f32.mrb[25].mxu0  ;;  %v3349_v2 = vsel %vm1539_vm2, %v7718_v0, -inf  ;;  %vm3433_vm11 = vcmp.gt.f32.partialorder %v7718_v0, 0.0 }
 0x9c6   : > { %3350 = vmax.xlane.f32.xlu0 %v3349_v2 }
 0x9c8   : > { %v7722_v3 = vpop.f32.mrb[26].mxu0 }
 0x9c9   : > { %v5584_v4 = vpop.f32.mrb[27].mxu0  ;;  %v3355_v17 = vsel %vm1539_vm2, %v7722_v3, -inf  ;;  %vm3435_vm13 = vcmp.gt.f32.partialorder %v7722_v3, 0.0 }
 0x9cc   : > { %v7724_v5 = vpop.f32.mrb[28].mxu0 }
 0x9cd   : > { %v5594_v6 = vpop.f32.mrb[29].mxu0  ;;  %v3361_v20 = vsel %vm1539_vm2, %v7724_v5, -inf  ;;  %vm3437_vm14 = vcmp.gt.f32.partialorder %v7724_v5, 0.0 }
 0xa33   : > { %v7726_v7 = vpop.f32.mrb[22].mxu1 }
 0xa34   : > { %v5569_v8 = vpop.f32.mrb[23].mxu1  ;;  %v3346_v9 = vsel %vm1539_vm2, %v7726_v7, -inf  ;;  %vm3432_vm12 = vcmp.gt.f32.partialorder %v7726_v7, 0.0 }
 0xa35   : > { %3347 = vmax.xlane.f32.xlu1 %v3346_v9 }
 0xa37   : > { %v7730_v11 = vpop.f32.mrb[24].mxu1 }
 0xa38   : > { %v5579_v12 = vpop.f32.mrb[25].mxu1  ;;  %v3352_v13 = vsel %vm1539_vm2, %v7730_v11, -inf  ;;  %vm3434_vm15 = vcmp.gt.f32.partialorder %v7730_v11, 0.0 }
 0xa39   : > { %3353 = vmax.xlane.f32.xlu0 %v3352_v13 }
 0xa3b   : > { %v7734_v14 = vpop.f32.mrb[26].mxu1 }
 0xa3c   : > { %v5589_v15 = vpop.f32.mrb[27].mxu1  ;;  %v3358_v16 = vsel %vm1539_vm2, %v7734_v14, -inf  ;;  %vm3436_vm3 = vcmp.gt.f32.partialorder %v7734_v14, 0.0 }
 0xa3d   : > { %3359 = vmax.xlane.f32.xlu1 %v3358_v16  ;;  %3356 = vmax.xlane.f32.xlu0 %v3355_v17  ;;  %v3457_v17 = vpack.c.bf16 %v7686_v51, %v7686_v51 }
 0xa3f   : > { %v7740_v10 = vpop.f32.mrb[28].mxu1 }
 0xa40   : > { %v5599_v18 = vpop.f32.mrb[29].mxu1  ;;  %v3364_v19 = vsel %vm1539_vm2, %v7740_v10, -inf  ;;  %vm3438_vm4 = vcmp.gt.f32.partialorder %v7740_v10, 0.0 }
 0xa41   : > { %3365 = vmax.xlane.f32.xlu1 %v3364_v19  ;;  %3362 = vmax.xlane.f32.xlu0 %v3361_v20 }
 0xa4f   : > { %v3345_v22 = vpop.xlane.xlu0 %3344 }
 0xa50   : > { %v3367_v41 = vsub.f32 %v7714_v61, %v3345_v22  ;;  %v3459_v61 = vpack.c.bf16 %v7682_v49, %v7682_v49 }
 0xa52   : > { %v3375_v23 = vmul.f32 1.442695, %v3367_v41 }
 0xa53   : > { %v3351_v24 = vpop.xlane.xlu0 %3350 }
 0xa54   : > { %6171 = vpow2.f32 %v3375_v23  ;;  %v3369_v25 = vsub.f32 %v7718_v0, %v3351_v24  ;;  %v3559_v23 = vsel %vm2401_vm8, %v3457_v17, 0 }
 0xa56   : > { %v3379_v43 = vmul.f32 1.442695, %v3369_v25  ;;  %v3651_v25 = vsel %vm2401_vm8, %v3459_v61, 0 }
 0xa58   : > { %6173 = vpow2.f32 %v3379_v43 }
 0xa5e   : > { %v6172_v26 = vpop.eup %6171 }
 0xa5f   : > { %v3391_v27 = vsel %vm1539_vm2, %v6172_v26, 0.0 }
 0xa60   : > { %3392 = vadd.xlane.f32.xlu0 %v3391_v27 }
 0xa62   : > { %v7749_v28 = vpop.eup %6173 }
 0xa63   : > { %v3397_v29 = vsel %vm1539_vm2, %v7749_v28, 0.0 }
 0xa64   : > { %3398 = vadd.xlane.f32.xlu0 %v3397_v29 }
 0xa7a   : > { %6069 = vrot.lane.b32.xlu0 %v6068_v53, %s6492_s18 }
 0xa7e   : > { %2747 = vrot.lane.b32.xlu0 %v7688_v52, %s6492_s18 }
 0xac2   : > { %v3348_v30 = vpop.xlane.xlu1 %3347 }
 0xac3   : > { %v3368_v31 = vsub.f32 %v7726_v7, %v3348_v30 }
 0xac5   : > { %v3377_v32 = vmul.f32 1.442695, %v3368_v31 }
 0xac6   : > { %v3354_v33 = vpop.xlane.xlu0 %3353 }
 0xac7   : > { %6175 = vpow2.f32 %v3377_v32  ;;  %v3370_v38 = vsub.f32 %v7730_v11, %v3354_v33  ;;  %v6074_v11 = vld [vmem:[%s8275_s25 + $0x8] sm:$0xff]  }
 0xac9   : > { %v3381_v48 = vmul.f32 1.442695, %v3370_v38 }
 0xaca   : > { %v3357_v36 = vpop.xlane.xlu0 %3356  ;;  %v3360_v40 = vpop.xlane.xlu1 %3359 }
 0xacb   : > { %v3371_v39 = vsub.f32 %v7722_v3, %v3357_v36  ;;  %v3372_v50 = vsub.f32 %v7734_v14, %v3360_v40  ;;  %v3461_v40 = vpack.c.bf16 %v7688_v52, %v7688_v52  ;;  %v6075_v14 = vld [vmem:[%s8275_s25 + $0x10] sm:$0xff]  }
 0xacd   : > { %v3383_v42 = vmul.f32 1.442695, %v3371_v39  ;;  %v3385_v54 = vmul.f32 1.442695, %v3372_v50 }
 0xace   : > { %v3363_v44 = vpop.xlane.xlu0 %3362  ;;  %v3366_v34 = vpop.xlane.xlu1 %3365 }
 0xacf   : > { %v3373_v35 = vsub.f32 %v7724_v5, %v3363_v44  ;;  %6177 = vpow2.f32 %v3383_v42  ;;  %v3374_v55 = vsub.f32 %v7740_v10, %v3366_v34  ;;  %v6073_v5 = vld [vmem:[%s8275_s25] sm:$0xff]   ;;  %v6082_v10 = vld [vmem:[%s8275_s25 + $0x28] sm:$0xff]  }
 0xad1   : > { %v7763_v46 = vpop.eup %6175  ;;  %v3387_v47 = vmul.f32 1.442695, %v3373_v35  ;;  %v3389_v57 = vmul.f32 1.442695, %v3374_v55 }
 0xad2   : > { %v3394_v53 = vsel %vm1539_vm2, %v7763_v46, 0.0 }
 0xad3   : > { %3395 = vadd.xlane.f32.xlu1 %v3394_v53  ;;  %6179 = vpow2.f32 %v3387_v47  ;;  %v3743_v47 = vsel %vm2401_vm8, %v3461_v40, 0  ;;  %v6092_v40 = vld [vmem:[%s8275_s25 + $0xc0] sm:$0xff]  }
 0xad4   : > { %6181 = vpow2.f32 %v3381_v48 }
 0xad5   : > { %6183 = vpow2.f32 %v3385_v54 }
 0xad6   : > { %6185 = vpow2.f32 %v3389_v57 }
 0xad9   : > { %v7769_v56 = vpop.eup %6177 }
 0xada   : > { %v3403_v45 = vsel %vm1539_vm2, %v7769_v56, 0.0 }
 0xadb   : > { %3404 = vadd.xlane.f32.xlu1 %v3403_v45 }
 0xadd   : > { %v7773_v58 = vpop.eup %6179 }
 0xade   : > { %v3409_v59 = vsel %vm1539_vm2, %v7773_v58, 0.0  ;;  %v7777_v60 = vpop.eup %6181 }
 0xadf   : > { %3410 = vadd.xlane.f32.xlu1 %v3409_v59  ;;  %v3400_v62 = vsel %vm1539_vm2, %v7777_v60, 0.0  ;;  %v7781_v63 = vpop.eup %6183 }
 0xae0   : > { %v3406_v1 = vsel %vm1539_vm2, %v7781_v63, 0.0  ;;  %v7785_v2 = vpop.eup %6185 }
 0xae1   : > { %v3412_v4 = vsel %vm1539_vm2, %v7785_v2, 0.0 }
 0xae3   : > { %3401 = vadd.xlane.f32.xlu1 %v3400_v62 }
 0xae7   : > { %3407 = vadd.xlane.f32.xlu1 %v3406_v1 }
 0xaeb   : > { %3413 = vadd.xlane.f32.xlu1 %v3412_v4 }
 0xaed   : > { %v3393_v6 = vpop.xlane.xlu0 %3392 }
 0xaee   : > { %6187 = vrcp.f32 %v3393_v6  ;;  %v6076_v6 = vld [vmem:[%s8275_s25 + $0x18] sm:$0xff]  }
 0xaf1   : > { %v3399_v8 = vpop.xlane.xlu0 %3398 }
 0xaf2   : > { %6189 = vrcp.f32 %v3399_v8  ;;  %v6081_v8 = vld [vmem:[%s8275_s25 + $0x20] sm:$0xff]  }
 0xaf5   : > { %v6070_v9 = vpop.permute.xlu0 %6069 }
 0xaf6   : > { %v6071_v12 = vunpack.i.l.bf16 %v6070_v9  ;;  %v6072_v0 = vunpack.i.h.bf16 %v6070_v9 }
 0xaf8   : > { %v6188_v13 = vpop.eup %6187  ;;  %v3456_v15 = vpack.c.bf16 %v6071_v12, %v6071_v12  ;;  %v6083_v12 = vld [vmem:[%s8275_s25 + $0x30] sm:$0xff]  }
 0xaf9   : > { %v3423_v16 = vmul.f32 %v6188_v13, %v6172_v26  ;;  %v6085_v13 = vld [vmem:[%s8275_s25 + $0x38] sm:$0xff]  }
 0xafa   : > { %v3513_v18 = vsel %vm2401_vm8, %v3456_v15, 0 }
 0xafb   : > { %5607 = vmatpush3.bf16.msra.mxu1 %v3513_v18  ;;  %v3439_v19 = vsel %vm3431_vm10, %v3423_v16, 0.0  ;;  %v6077_v16 = vld [vmem:[%s8275_s25 + $0x40] sm:$0xff]  }
 0xafc   : > { %v6190_v20 = vpop.eup %6189  ;;  %v3447_v22 = vpack.c.bf16 %v3439_v19, %v3439_v19  ;;  %5618 = vmatprep.subr.bf16.mxu1 %v6490_v37  ;;  %2743 = vrot.lane.b32.xlu1 %v7682_v49, %s6492_s18  ;;  %v3458_v49 = vpack.c.bf16 %v6072_v0, %v6072_v0 }
 0xafd   : > { %v3425_v41 = vmul.f32 %v6190_v20, %v7749_v28 }
 0xafe   : > { %5603 = vmatmul.mubr.msk.bf16.vlgmr.msra.gmra.mrb[32].mxu0 %vm1539_vm2, %v3447_v22  ;;  %v3605_v33 = vsel %vm2401_vm8, %v3458_v49, 0  ;;  %v6078_v22 = vld [vmem:[%s8275_s25 + $0x48] sm:$0xff]  }
 0xaff   : > { %5613 = vmatpush3.bf16.msra.mxu0 %v3559_v23  ;;  %5614 = vmatprep.mubr.msk.bf16.mxu0 %vm6491_vm1, %v6490_v37  ;;  %v3441_v51 = vsel %vm3433_vm11, %v3425_v41, 0.0  ;;  %v6079_v23 = vld [vmem:[%s8275_s25 + $0x50] sm:$0xff]  }
 0xb00   : > { %5624 = vmatprep.subr.bf16.mxu0 %v6490_v37  ;;  %v3449_v24 = vpack.c.bf16 %v3441_v51, %v3441_v51 }
 0xb06   : > { %5615 = vmatmul.mubr.msk.bf16.vlgmr.msra.gmra.mrb[36].mxu0 %vm1539_vm2, %v3449_v24 }
 0xb07   : > { %5625 = vmatpush3.bf16.msra.mxu0 %v3651_v25  ;;  %5626 = vmatprep.mubr.msk.bf16.mxu0 %vm6491_vm1, %v6490_v37  ;;  %v6080_v25 = vld [vmem:[%s8275_s25 + $0x58] sm:$0xff]  }
 0xb08   : > { %5636 = vmatprep.subr.bf16.mxu0 %v6490_v37 }
 0xb60   : > { %v3396_v43 = vpop.xlane.xlu1 %3395 }
 0xb61   : > { %6191 = vrcp.f32 %v3396_v43  ;;  %v6084_v43 = vld [vmem:[%s8275_s25 + $0x80] sm:$0xff]  }
 0xb68   : > { %v3405_v26 = vpop.xlane.xlu1 %3404 }
 0xb69   : > { %6193 = vrcp.f32 %v3405_v26  ;;  %v6086_v26 = vld [vmem:[%s8275_s25 + $0x88] sm:$0xff]  }
 0xb6b   : > { %v6192_v27 = vpop.eup %6191 }
 0xb6c   : > { %v3424_v28 = vmul.f32 %v6192_v27, %v7763_v46  ;;  %v3411_v29 = vpop.xlane.xlu1 %3410  ;;  %v6088_v27 = vld [vmem:[%s8275_s25 + $0x90] sm:$0xff]  }
 0xb6d   : > { %6195 = vrcp.f32 %v3411_v29  ;;  %v6087_v29 = vld [vmem:[%s8275_s25 + $0x60] sm:$0xff]  }
 0xb6e   : > { %v3440_v30 = vsel %vm3432_vm12, %v3424_v28, 0.0  ;;  %v6090_v28 = vld [vmem:[%s8275_s25 + $0x98] sm:$0xff]  }
 0xb6f   : > { %v3448_v31 = vpack.c.bf16 %v3440_v30, %v3440_v30 }
 0xb70   : > { %v3402_v32 = vpop.xlane.xlu1 %3401 }
 0xb71   : > { %5609 = vmatmul.mubr.msk.bf16.vlgmr.msra.gmra.mrb[32].mxu1 %vm1539_vm2, %v3448_v31  ;;  %6197 = vrcp.f32 %v3402_v32 }
 0xb72   : > { %5619 = vmatpush3.bf16.msra.mxu1 %v3605_v33  ;;  %5620 = vmatprep.mubr.msk.bf16.mxu1 %vm6491_vm1, %v6490_v37 }
 0xb73   : > { %5630 = vmatprep.subr.bf16.mxu1 %v6490_v37  ;;  %v6194_v36 = vpop.eup %6193 }
 0xb74   : > { %v3427_v7 = vmul.f32 %v6194_v36, %v7769_v56  ;;  %v3408_v39 = vpop.xlane.xlu1 %3407  ;;  %v6089_v36 = vld [vmem:[%s8275_s25 + $0x68] sm:$0xff]  }
 0xb75   : > { %6199 = vrcp.f32 %v3408_v39 }
 0xb76   : > { %v3443_v42 = vsel %vm3435_vm13, %v3427_v7, 0.0  ;;  %v6091_v7 = vld [vmem:[%s8275_s25 + $0x70] sm:$0xff]  }
 0xb77   : > { %v6196_v38 = vpop.eup %6195  ;;  %v3451_v44 = vpack.c.bf16 %v3443_v42, %v3443_v42 }
 0xb78   : > { %v3429_v35 = vmul.f32 %v6196_v38, %v7773_v58  ;;  %v3414_v46 = vpop.xlane.xlu1 %3413  ;;  %v2748_v58 = vpop.permute.xlu0 %2747 }
 0xb79   : > { %5627 = vmatmul.mubr.msk.bf16.vlgmr.msra.gmra.mrb[40].mxu0 %vm1539_vm2, %v3451_v44  ;;  %6201 = vrcp.f32 %v3414_v46  ;;  %v3462_v62 = vpack.c.bf16 %v2748_v58, %v2748_v58  ;;  %v6093_v46 = vld [vmem:[%s8275_s25 + $0x78] sm:$0xff]  }
 0xb7a   : > { %5637 = vmatpush3.bf16.msra.mxu0 %v3743_v47  ;;  %5638 = vmatprep.mubr.msk.bf16.mxu0 %vm6491_vm1, %v6490_v37  ;;  %v3445_v50 = vsel %vm3437_vm14, %v3429_v35, 0.0  ;;  %v6094_v47 = vld [vmem:[%s8275_s25 + $0xc8] sm:$0xff]   ;;  %v6098_v58 = vld [vmem:[%s8275_s25 + $0xd8] sm:$0xff]  }
 0xb7b   : > { %v6198_v48 = vpop.eup %6197  ;;  %5648 = vmatprep.subr.bf16.mxu0 %v6490_v37  ;;  %v3453_v57 = vpack.c.bf16 %v3445_v50, %v3445_v50  ;;  %v3789_v4 = vsel %vm2401_vm8, %v3462_v62, 0  ;;  %v6096_v50 = vld [vmem:[%s8275_s25 + $0xd0] sm:$0xff]  }
 0xb7c   : > { %v3426_v52 = vmul.f32 %v6198_v48, %v7777_v60  ;;  %v2744_v3 = vpop.permute.xlu1 %2743 }
 0xb7d   : > { %v3460_v53 = vpack.c.bf16 %v2744_v3, %v2744_v3  ;;  %v6095_v3 = vld [vmem:[%s8275_s25 + $0xa0] sm:$0xff]  }
 0xb7e   : > { %v3442_v34 = vsel %vm3434_vm15, %v3426_v52, 0.0 }
 0xb7f   : > { %v6200_v54 = vpop.eup %6199  ;;  %v3697_v55 = vsel %vm2401_vm8, %v3460_v53, 0  ;;  %v3450_v56 = vpack.c.bf16 %v3442_v34, %v3442_v34 }
 0xb80   : > { %v3428_v45 = vmul.f32 %v6200_v54, %v7781_v63 }
 0xb81   : > { %5621 = vmatmul.mubr.msk.bf16.vlgmr.msra.gmra.mrb[36].mxu1 %vm1539_vm2, %v3450_v56  ;;  %5639 = vmatmul.mubr.msk.bf16.vlgmr.msra.gmra.mrb[44].mxu0 %vm1539_vm2, %v3453_v57 }
 0xb82   : > { %5631 = vmatpush3.bf16.msra.mxu1 %v3697_v55  ;;  %5632 = vmatprep.mubr.msk.bf16.mxu1 %vm6491_vm1, %v6490_v37  ;;  %v3444_v59 = vsel %vm3436_vm3, %v3428_v45, 0.0  ;;  %v6097_v45 = vld [vmem:[%s8275_s25 + $0xa8] sm:$0xff]  }
 0xb83   : > { %5642 = vmatprep.subr.bf16.mxu1 %v6490_v37  ;;  %5649 = vmatpush3.bf16.msra.mxu0 %v6073_v5  ;;  %v6202_v60 = vpop.eup %6201  ;;  %v3452_v63 = vpack.c.bf16 %v3444_v59, %v3444_v59  ;;  %v6099_v59 = vld [vmem:[%s8275_s25 + $0xb0] sm:$0xff]  }
 0xb84   : > { %5650 = vmatprep.subr.bf16.mxu0 %v6490_v37  ;;  %5656 = vmatprep.mubr.msk.bf16.mxu0 %vm6491_vm1, %v6490_v37  ;;  %v3430_v1 = vmul.f32 %v6202_v60, %v7785_v2 }
 0xb86   : > { %v3446_v2 = vsel %vm3438_vm4, %v3430_v1, 0.0  ;;  %v6100_v1 = vld [vmem:[%s8275_s25 + $0xb8] sm:$0xff]  }
 0xb87   : > { %5651 = vmatpush3.bf16.msra.mxu0 %v6074_v11  ;;  %v3454_v9 = vpack.c.bf16 %v3446_v2, %v3446_v2 }
 0xb88   : > { %5652 = vmatprep.subr.bf16.mxu0 %v6490_v37 }
 0xb89   : > { %5633 = vmatmul.mubr.msk.bf16.vlgmr.msra.gmra.mrb[40].mxu1 %vm1539_vm2, %v3452_v63 }
 0xb8a   : > { %5643 = vmatpush3.bf16.msra.mxu1 %v3789_v4  ;;  %5644 = vmatprep.mubr.msk.bf16.mxu1 %vm6491_vm1, %v6490_v37 }
 0xb8b   : > { %5653 = vmatpush3.bf16.msra.mxu0 %v6075_v14  ;;  %5660 = vmatprep.subr.bf16.mxu1 %v6490_v37 }
 0xb8c   : > { %5654 = vmatprep.subr.bf16.mxu0 %v6490_v37 }
 0xb8f   : > { %5655 = vmatpush3.bf16.msra.mxu0 %v6076_v6  ;;  %v6101_v6 = vld [vmem:[%s8275_s25 + $0xe0] sm:$0xff]  }
 0xb90   : > { %5672 = vmatprep.subr.bf16.mxu0 %v6490_v37 }
 0xb91   : > { %5645 = vmatmul.mubr.msk.bf16.vlgmr.msra.gmra.mrb[44].mxu1 %vm1539_vm2, %v3454_v9 }
 0xb92   : > { %5661 = vmatpush3.bf16.msra.mxu1 %v6081_v8  ;;  %5668 = vmatprep.mubr.msk.bf16.mxu1 %vm6491_vm1, %v6490_v37 }
 0xb93   : > { %5662 = vmatprep.subr.bf16.mxu1 %v6490_v37 }
 0xb96   : > { %5663 = vmatpush3.bf16.msra.mxu1 %v6082_v10 }
 0xb97   : > { %5664 = vmatprep.subr.bf16.mxu1 %v6490_v37 }
 0xb9a   : > { %5665 = vmatpush3.bf16.msra.mxu1 %v6083_v12  ;;  %v6102_v12 = vld [vmem:[%s8275_s25 + $0xe8] sm:$0xff]  }
 0xb9b   : > { %5666 = vmatprep.subr.bf16.mxu1 %v6490_v37 }
 0xb9e   : > { %5667 = vmatpush3.bf16.msra.mxu1 %v6085_v13  ;;  %v6103_v13 = vld [vmem:[%s8275_s25 + $0xf0] sm:$0xff]  }
 0xb9f   : > { %5684 = vmatprep.subr.bf16.mxu1 %v6490_v37 }
 0xbd1   : > { %v3503_v15 = vpop.f32.mrb[32].mxu0 }
 0xbd2   : > { %v3831_v17 = vpack.c.bf16 %v3503_v15, %v3503_v15  ;;  %v5604_v18 = vpop.f32.mrb[33].mxu0  ;;  %v6104_v15 = vld [vmem:[%s8275_s25 + $0xf8] sm:$0xff]  }
 0xbd3   : > { %v3506_v19 = vpop.f32.mrb[34].mxu0 }
 0xbd4   : > { %v5605_v20 = vpop.f32.mrb[35].mxu0  ;;  %5657 = vmatmul.mubr.msk.bf16.vlgmr.msra.gmra.mrb[48].mxu0 %vm2750_vm9, %v3831_v17 }
 0xbd5   : > { %5673 = vmatpush3.bf16.msra.mxu0 %v6077_v16  ;;  %5680 = vmatprep.mubr.msk.bf16.mxu0 %vm6491_vm1, %v6490_v37 }
 0xbd6   : > { %5674 = vmatprep.subr.bf16.mxu0 %v6490_v37 }
 0xbd9   : > { %5675 = vmatpush3.bf16.msra.mxu0 %v6078_v22  ;;  %v3595_v41 = vpop.f32.mrb[36].mxu0 }
 0xbda   : > { %v5616_v51 = vpop.f32.mrb[37].mxu0  ;;  %5676 = vmatprep.subr.bf16.mxu0 %v6490_v37  ;;  %v3833_v0 = vpack.c.bf16 %v3595_v41, %v3595_v41 }
 0xbdb   : > { %v3598_v61 = vpop.f32.mrb[38].mxu0 }
 0xbdc   : > { %v5617_v24 = vpop.f32.mrb[39].mxu0 }
 0xbdd   : > { %5677 = vmatpush3.bf16.msra.mxu0 %v6079_v23 }
 0xbde   : > { %5678 = vmatprep.subr.bf16.mxu0 %v6490_v37 }
 0xbe1   : > { %5679 = vmatpush3.bf16.msra.mxu0 %v6080_v25 }
 0xbe2   : > { %5696 = vmatprep.subr.bf16.mxu0 %v6490_v37 }
 0xbe4   : > { %5681 = vmatmul.mubr.msk.bf16.vlgmr.msra.gmra.mrb[52].mxu0 %vm2750_vm9, %v3833_v0 }
 0xbe5   : > { %5697 = vmatpush3.bf16.msra.mxu0 %v6084_v43  ;;  %5704 = vmatprep.mubr.msk.bf16.mxu0 %vm6491_vm1, %v6490_v37 }
 0xbe6   : > { %5698 = vmatprep.subr.bf16.mxu0 %v6490_v37 }
 0xbe9   : > { %5699 = vmatpush3.bf16.msra.mxu0 %v6086_v26 }
 0xbea   : > { %5700 = vmatprep.subr.bf16.mxu0 %v6490_v37 }
 0xbed   : > { %5701 = vmatpush3.bf16.msra.mxu0 %v6088_v27 }
 0xbee   : > { %5702 = vmatprep.subr.bf16.mxu0 %v6490_v37 }
 0xbf1   : > { %5703 = vmatpush3.bf16.msra.mxu0 %v6090_v28 }
 0xbf2   : > { %5720 = vmatprep.subr.bf16.mxu0 %v6490_v37 }
 0xc44   : > { %v3549_v49 = vpop.f32.mrb[32].mxu1 }
 0xc45   : > { %v3832_v30 = vpack.c.bf16 %v3549_v49, %v3549_v49  ;;  %v5610_v31 = vpop.f32.mrb[33].mxu1 }
 0xc46   : > { %v3552_v32 = vpop.f32.mrb[34].mxu1 }
 0xc47   : > { %v5611_v33 = vpop.f32.mrb[35].mxu1  ;;  %5669 = vmatmul.mubr.msk.bf16.vlgmr.msra.gmra.mrb[48].mxu1 %vm2750_vm9, %v3832_v30 }
 0xc48   : > { %5685 = vmatpush3.bf16.msra.mxu1 %v6087_v29  ;;  %5692 = vmatprep.mubr.msk.bf16.mxu1 %vm6491_vm1, %v6490_v37 }
 0xc49   : > { %5686 = vmatprep.subr.bf16.mxu1 %v6490_v37 }
 0xc4c   : > { %5687 = vmatpush3.bf16.msra.mxu1 %v6089_v36  ;;  %v3687_v39 = vpop.f32.mrb[40].mxu0 }
 0xc4d   : > { %5688 = vmatprep.subr.bf16.mxu1 %v6490_v37  ;;  %v3835_v42 = vpack.c.bf16 %v3687_v39, %v3687_v39  ;;  %v5628_v38 = vpop.f32.mrb[41].mxu0 }
 0xc4e   : > { %v3690_v44 = vpop.f32.mrb[42].mxu0 }
 0xc4f   : > { %v5629_v35 = vpop.f32.mrb[43].mxu0  ;;  %5705 = vmatmul.mubr.msk.bf16.vlgmr.msra.gmra.mrb[56].mxu0 %vm2750_vm9, %v3835_v42 }
 0xc50   : > { %5689 = vmatpush3.bf16.msra.mxu1 %v6091_v7  ;;  %5721 = vmatpush3.bf16.msra.mxu0 %v6092_v40 }
 0xc51   : > { %5690 = vmatprep.subr.bf16.mxu1 %v6490_v37  ;;  %5722 = vmatprep.subr.bf16.mxu0 %v6490_v37 }
 0xc52   : > { %5728 = vmatprep.mubr.msk.bf16.mxu0 %vm6491_vm1, %v6490_v37 }
 0xc54   : > { %5691 = vmatpush3.bf16.msra.mxu1 %v6093_v46  ;;  %5723 = vmatpush3.bf16.msra.mxu0 %v6094_v47  ;;  %v3641_v48 = vpop.f32.mrb[36].mxu1  ;;  %v3779_v52 = vpop.f32.mrb[44].mxu0 }
 0xc55   : > { %5708 = vmatprep.subr.bf16.mxu1 %v6490_v37  ;;  %v3834_v53 = vpack.c.bf16 %v3641_v48, %v3641_v48  ;;  %v5622_v34 = vpop.f32.mrb[37].mxu1  ;;  %v5640_v54 = vpop.f32.mrb[45].mxu0  ;;  %5724 = vmatprep.subr.bf16.mxu0 %v6490_v37  ;;  %v3837_v60 = vpack.c.bf16 %v3779_v52, %v3779_v52 }
 0xc56   : > { %v3644_v55 = vpop.f32.mrb[38].mxu1  ;;  %v3782_v56 = vpop.f32.mrb[46].mxu0 }
 0xc57   : > { %v5623_v57 = vpop.f32.mrb[39].mxu1  ;;  %v5641_v5 = vpop.f32.mrb[47].mxu0  ;;  %5693 = vmatmul.mubr.msk.bf16.vlgmr.msra.gmra.mrb[52].mxu1 %vm2750_vm9, %v3834_v53 }
 0xc58   : > { %5709 = vmatpush3.bf16.msra.mxu1 %v6095_v3  ;;  %5725 = vmatpush3.bf16.msra.mxu0 %v6096_v50 }
 0xc59   : > { %5710 = vmatprep.subr.bf16.mxu1 %v6490_v37  ;;  %5726 = vmatprep.subr.bf16.mxu0 %v6490_v37 }
 0xc5a   : > { %5716 = vmatprep.mubr.msk.bf16.mxu1 %vm6491_vm1, %v6490_v37 }
 0xc5c   : > { %5711 = vmatpush3.bf16.msra.mxu1 %v6097_v45  ;;  %5727 = vmatpush3.bf16.msra.mxu0 %v6098_v58  ;;  %v3733_v11 = vpop.f32.mrb[40].mxu1 }
 0xc5d   : > { %v5634_v62 = vpop.f32.mrb[41].mxu1  ;;  %5712 = vmatprep.subr.bf16.mxu1 %v6490_v37  ;;  %v3836_v2 = vpack.c.bf16 %v3733_v11, %v3733_v11 }
 0xc5e   : > { %v3736_v63 = vpop.f32.mrb[42].mxu1 }
 0xc5f   : > { %5729 = vmatmul.mubr.msk.bf16.vlgmr.msra.gmra.mrb[60].mxu0 %vm2750_vm9, %v3837_v60  ;;  %v5635_v14 = vpop.f32.mrb[43].mxu1 }
 0xc60   : > { %5713 = vmatpush3.bf16.msra.mxu1 %v6099_v59 }
 0xc61   : > { %5714 = vmatprep.subr.bf16.mxu1 %v6490_v37 }
 0xc64   : > { %5715 = vmatpush3.bf16.msra.mxu1 %v6100_v1  ;;  %v3825_v4 = vpop.f32.mrb[44].mxu1 }
 0xc65   : > { %v5646_v8 = vpop.f32.mrb[45].mxu1  ;;  %5732 = vmatprep.subr.bf16.mxu1 %v6490_v37  ;;  %v3838_v16 = vpack.c.bf16 %v3825_v4, %v3825_v4 }
 0xc66   : > { %v3828_v9 = vpop.f32.mrb[46].mxu1  ;;  %v6105_v8 = vld [vmem:[#allocation11] ss:$16 sps:$4 sm:$0xff]  }
 0xc67   : > { %5717 = vmatmul.mubr.msk.bf16.vlgmr.msra.gmra.mrb[56].mxu1 %vm2750_vm9, %v3836_v2  ;;  %v5647_v10 = vpop.f32.mrb[47].mxu1  ;;  %v6110_v2 = vld [vmem:[#allocation11 + $0xc] ss:$16 sps:$4 sm:$0xff]   ;;  %v6108_v9 = vld [vmem:[#allocation11 + $0x8] ss:$16 sps:$4 sm:$0xff]  }
 0xc68   : > { %5733 = vmatpush3.bf16.msra.mxu1 %v6101_v6  ;;  %5740 = vmatprep.mubr.msk.bf16.mxu1 %vm6491_vm1, %v6490_v37  ;;  %v6107_v6 = vld [vmem:[#allocation11 + $0x4] ss:$16 sps:$4 sm:$0xff]  }
 0xc69   : > { %5734 = vmatprep.subr.bf16.mxu1 %v6490_v37  ;;  %4480 = vmatprep.subr.bf16.mxu0 %v6107_v6  ;;  %v6113_v10 = vld [vmem:[#allocation11 + $0x24] ss:$16 sps:$4 sm:$0xff]  }
 0xc6a   : > { %4481 = vmatpush1.bf16.msra.mxu0 %v6105_v8 }
 0xc6b   : > { %4482 = vmatprep.subr.bf16.mxu0 %v6113_v10 }
 0xc6c   : > { %5735 = vmatpush3.bf16.msra.mxu1 %v6102_v12  ;;  %v6114_v12 = vld [vmem:[#allocation11 + $0x28] ss:$16 sps:$4 sm:$0xff]  }
 0xc6d   : > { %5736 = vmatprep.subr.bf16.mxu1 %v6490_v37 }
 0xc70   : > { %5737 = vmatpush3.bf16.msra.mxu1 %v6103_v13  ;;  %v6116_v13 = vld [vmem:[#allocation11 + $0x2c] ss:$16 sps:$4 sm:$0xff]  }
 0xc71   : > { %5738 = vmatprep.subr.bf16.mxu1 %v6490_v37 }
 0xc74   : > { %5739 = vmatpush3.bf16.msra.mxu1 %v6104_v15  ;;  %v6493_v15 = vmov 0  }
 0xc75   : > { %4521 = vmatprep.subr.bf16.mxu1 %v6110_v2  ;;  %4512 = vmatprep.mubr.bf16.mxu0 %v6493_v15 }
 0xc77   : > { %5741 = vmatmul.mubr.msk.bf16.vlgmr.msra.gmra.mrb[60].mxu1 %vm2750_vm9, %v3838_v16 }
 0xc78   : > { %4522 = vmatpush1.bf16.msra.mxu1 %v6108_v9  ;;  %4553 = vmatprep.mubr.bf16.mxu1 %v6493_v15 }
 0xc79   : > { %4523 = vmatprep.subr.bf16.mxu1 %v6116_v13 }
 0xc7c   : > { %4524 = vmatpush1.bf16.msra.mxu1 %v6114_v12 }
 0xca7   : > { %v3900_v17 = vpop.f32.mrb[48].mxu0 }
 0xca8   : > { %v5658_v18 = vpop.f32.mrb[49].mxu0  ;;  %v4375_v24 = vsel %vm689_vm0, %v3900_v17, 0.0 }
 0xca9   : > { %v3903_v19 = vpop.f32.mrb[50].mxu0 }
 0xcaa   : > { %v5659_v20 = vpop.f32.mrb[51].mxu0 }
 0xcb7   : > { %v4034_v22 = vpop.f32.mrb[52].mxu0 }
 0xcb8   : > { %v5682_v41 = vpop.f32.mrb[53].mxu0  ;;  %v4378_v26 = vsel %vm689_vm0, %v4034_v22, 0.0  ;;  %v6222_v22 = vld [vmem:[#allocation7] ss:$0 sm:$0xff] }
 0xcb9   : > { %v4037_v23 = vpop.f32.mrb[54].mxu0 }
 0xcba   : > { %v5683_v51 = vpop.f32.mrb[55].mxu0  ;;  %v6223_v23 = vld [vmem:[#allocation8] ss:$0 sm:$0xff] }
 0xd1a   : > { %v3967_v61 = vpop.f32.mrb[48].mxu1 }
 0xd1b   : > { %v4376_v25 = vsel %vm689_vm0, %v3967_v61, 0.0  ;;  %v5670_v43 = vpop.f32.mrb[49].mxu1 }
 0xd1c   : > { %v4377_v0 = vadd.f32 %v4376_v25, %v4375_v24  ;;  %v3970_v37 = vpop.f32.mrb[50].mxu1  ;;  %v6117_v24 = vld [vmem:[%s8276_s27 + $0x40] sm:$0xff]   ;;  %s8278_s27 = sld [smem:[#allocation33_spill]] }
 0xd1d   : > { %v5671_v27 = vpop.f32.mrb[51].mxu1  ;;  %v6118_v25 = vld [vmem:[%s8277_s21 + $0xc0] sm:$0xff]   ;;  %v6121_v37 = vld [vmem:[%s8277_s21 + $0x48] sm:$0xff]  }
 0xd1e   : > { %v4379_v28 = vadd.f32 %v4378_v26, %v4377_v0  ;;  %v6119_v43 = vld [vmem:[%s8277_s21] sm:$0xff]   ;;  %5498 = vmatprep.subr.bf16.mxu1 %v6118_v25  ;;  %v6122_v26 = vld [vmem:[%s8277_s21 + $0xc8] sm:$0xff]  }
 0xd1f   : > { %v6120_v0 = vld [vmem:[%s8277_s21 + $0x80] sm:$0xff]   ;;  %v6123_v27 = vld [vmem:[%s8277_s21 + $0x8] sm:$0xff]  }
 0xd22   : > { %v4168_v49 = vpop.f32.mrb[56].mxu0 }
 0xd23   : > { %v5706_v29 = vpop.f32.mrb[57].mxu0  ;;  %v4382_v40 = vsel %vm689_vm0, %v4168_v49, 0.0  ;;  %v6125_v49 = vld [vmem:[%s8277_s21 + $0x50] sm:$0xff]  }
 0xd24   : > { %v4171_v30 = vpop.f32.mrb[58].mxu0  ;;  %v6126_v29 = vld [vmem:[%s8277_s21 + $0xd0] sm:$0xff]  }
 0xd25   : > { %v5707_v31 = vpop.f32.mrb[59].mxu0  ;;  %v6127_v30 = vld [vmem:[%s8277_s21 + $0x10] sm:$0xff]  }
 0xd26   : > { %v6128_v31 = vld [vmem:[%s8277_s21 + $0x90] sm:$0xff]  }
 0xd2a   : > { %v4101_v32 = vpop.f32.mrb[52].mxu1 }
 0xd2b   : > { %v4380_v33 = vsel %vm689_vm0, %v4101_v32, 0.0  ;;  %v5694_v36 = vpop.f32.mrb[53].mxu1  ;;  %v6129_v32 = vld [vmem:[%s8277_s21 + $0x58] sm:$0xff]  }
 0xd2c   : > { %v4381_v7 = vadd.f32 %v4380_v33, %v4379_v28  ;;  %v4104_v39 = vpop.f32.mrb[54].mxu1  ;;  %v6124_v28 = vld [vmem:[%s8277_s21 + $0x88] sm:$0xff]   ;;  %v6130_v33 = vld [vmem:[%s8277_s21 + $0xd8] sm:$0xff]  }
 0xd2d   : > { %v5695_v42 = vpop.f32.mrb[55].mxu1  ;;  %v6131_v36 = vld [vmem:[%s8277_s21 + $0x18] sm:$0xff]   ;;  %v6133_v39 = vld [vmem:[%s8277_s21 + $0x60] sm:$0xff]  }
 0xd2e   : > { %v4383_v38 = vadd.f32 %v4382_v40, %v4381_v7  ;;  %v6132_v7 = vld [vmem:[%s8277_s21 + $0x98] sm:$0xff]   ;;  %v6134_v40 = vld [vmem:[%s8277_s21 + $0xe0] sm:$0xff]  }
 0xd2f   : > { %v6135_v42 = vld [vmem:[%s8277_s21 + $0x20] sm:$0xff]  }
 0xd32   : > { %v4302_v44 = vpop.f32.mrb[60].mxu0 }
 0xd33   : > { %v5730_v35 = vpop.f32.mrb[61].mxu0  ;;  %v4386_v34 = vsel %vm689_vm0, %v4302_v44, 0.0  ;;  %v6137_v44 = vld [vmem:[%s8277_s21 + $0x68] sm:$0xff]  }
 0xd34   : > { %v4305_v46 = vpop.f32.mrb[62].mxu0  ;;  %v6138_v35 = vld [vmem:[%s8277_s21 + $0xe8] sm:$0xff]  }
 0xd35   : > { %v5731_v47 = vpop.f32.mrb[63].mxu0  ;;  %v6139_v46 = vld [vmem:[%s8277_s21 + $0x28] sm:$0xff]  }
 0xd36   : > { %v6140_v47 = vld [vmem:[%s8277_s21 + $0xa8] sm:$0xff]  }
 0xd3a   : > { %v4235_v48 = vpop.f32.mrb[56].mxu1 }
 0xd3b   : > { %v4384_v52 = vsel %vm689_vm0, %v4235_v48, 0.0  ;;  %v5718_v3 = vpop.f32.mrb[57].mxu1  ;;  %v6141_v48 = vld [vmem:[%s8277_s21 + $0x70] sm:$0xff]  }
 0xd3c   : > { %v4385_v50 = vadd.f32 %v4384_v52, %v4383_v38  ;;  %v4238_v53 = vpop.f32.mrb[58].mxu1  ;;  %v6136_v38 = vld [vmem:[%s8277_s21 + $0xa0] sm:$0xff]   ;;  %v6142_v52 = vld [vmem:[%s8277_s21 + $0xf0] sm:$0xff]  }
 0xd3d   : > { %v5719_v54 = vpop.f32.mrb[59].mxu1  ;;  %v6143_v3 = vld [vmem:[%s8277_s21 + $0x30] sm:$0xff]   ;;  %v6145_v53 = vld [vmem:[%s8277_s21 + $0x78] sm:$0xff]  }
 0xd3e   : > { %v4387_v55 = vadd.f32 %v4386_v34, %v4385_v50  ;;  %v6144_v50 = vld [vmem:[%s8277_s21 + $0xb0] sm:$0xff]   ;;  %v6146_v34 = vld [vmem:[%s8277_s21 + $0xf8] sm:$0xff]  }
 0xd3f   : > { %v6147_v54 = vld [vmem:[%s8277_s21 + $0x38] sm:$0xff]  }
 0xd4a   : > { %v4369_v56 = vpop.f32.mrb[60].mxu1 }
 0xd4b   : > { %v4388_v57 = vsel %vm689_vm0, %v4369_v56, 0.0  ;;  %v5742_v5 = vpop.f32.mrb[61].mxu1  ;;  %v4417_v56 = vlaneseq }
 0xd4c   : > { %v4389_v45 = vadd.f32 %v4388_v57, %v4387_v55  ;;  %v4372_v58 = vpop.f32.mrb[62].mxu1  ;;  %v6148_v55 = vld [vmem:[%s8277_s21 + $0xb8] sm:$0xff]  }
 0xd4d   : > { %v5743_v11 = vpop.f32.mrb[63].mxu1  ;;  %v4418_v57 = vshrl.u32 %v4417_v56, 7  ;;  %v4415_v58 = vld [vmem:[%s8278_s27] sm:$0xf]  ;;  %s6402_s27 = scalar_lea.vmem %s6401_s16, 256 }
 0xd4e   : > { %v8005_v59 = vadd.f32 %v4389_v45, %v7295_v21  ;;  %v6111_v21 = vld [vmem:[#allocation11 + $0x20] ss:$16 sps:$4 sm:$0xff]   ;;  %p6404_p7 = scmp.lt.s32.totalorder %s6402_s27, %s6396_s23 }
 0xd4f   : > { %4483 = vmatpush1.bf16.msra.mxu0 %v6111_v21  ;;  %v4419_v5 = vsub.s32 0, %v4418_v57  ;;  %v4427_v45 = vsub.s32 2, %v4418_v57  ;;  %v4423_v11 = vsub.s32 1, %v4418_v57 }
 0xd50   : > { %v4391_v60 = vsel %vm689_vm0, %v8005_v59, 0.0  ;;  %5476 = vmatprep.subr.bf16.mxu0 %v6117_v24  ;;  %p6405_p8 = por %p6404_p7, %p6403_p5 }
 0xd51   : > { %4392 = vadd.xlane.f32.xlu0 %v4391_v60  ;;  %v4431_v60 = vsub.s32 3, %v4418_v57 }
 0xd52   : > { %p6406_p6 = pnand %p6405_p8, %p6399_p11 }
 0xdde   : > { %v4393_v62 = vpop.xlane.xlu0 %4392 }
 0xddf   : > { %v4394_v63 = vmul.f32 0.03125, %v4393_v62  ;;  %v4420_v62 = vrot.slane %v4415_v58, %v4419_v5 }
 0xde1   : > { %v4395_v14 = vsub.f32 %v8005_v59, %v4394_v63  ;;  %v4428_v63 = vrot.slane %v4415_v58, %v4427_v45 }
 0xde3   : > { %v4396_v1 = vmul.f32 %v4395_v14, %v4395_v14 }
 0xde5   : > { %v4397_v4 = vsel %vm689_vm0, %v4396_v1, 0.0  ;;  %v4432_v1 = vrot.slane %v4415_v58, %v4431_v60 }
 0xde6   : > { %4398 = vadd.xlane.f32.xlu1 %v4397_v4 }
 0xe73   : > { %v4399_v16 = vpop.xlane.xlu1 %4398 }
 0xe74   : > { %v4400_v17 = vmul.f32 0.03125, %v4399_v16 }
 0xe76   : > { %v4401_v18 = vadd.f32 1e-05, %v4400_v17 }
 0xe78   : > { %6203 = vrsqrt.f32 %v4401_v18 }
 0xe82   : > { %v6204_v19 = vpop.eup %6203 }
 0xe83   : > { %v4403_v20 = vmul.f32 %v6204_v19, %v4395_v14  ;;  %v4424_v14 = vrot.slane %v4415_v58, %v4423_v11 }
 0xe85   : > { %v4404_v41 = vmul.f32 %v6222_v22, %v4403_v20 }
 0xe87   : > { %v4405_v51 = vadd.f32 %v6223_v23, %v4404_v41 }
 0xe89   : > { %v4406_v61 = vpack.c.bf16 %v4405_v51, %v4405_v51 }
 0xe8b   : > { %5279 = vmatmul.mubr.msk.bf16.vlgmr.msra.gmra.mrb[64].mxu0 %vm689_vm0, %v4406_v61  ;;  %5280 = vmatmul.mubr.msk.bf16.vlgmr.msra.gmra.mrb[64].mxu1 %vm689_vm0, %v4406_v61 }
 0xe8c   : > { %5477 = vmatpush3.bf16.msra.mxu0 %v6119_v43  ;;  %5499 = vmatpush3.bf16.msra.mxu1 %v6120_v0 }
 0xe8d   : > { %5478 = vmatprep.subr.bf16.mxu0 %v6121_v37  ;;  %5500 = vmatprep.subr.bf16.mxu1 %v6122_v26 }
 0xe90   : > { %5479 = vmatpush3.bf16.msra.mxu0 %v6123_v27  ;;  %5501 = vmatpush3.bf16.msra.mxu1 %v6124_v28 }
 0xe91   : > { %5480 = vmatprep.subr.bf16.mxu0 %v6125_v49  ;;  %5502 = vmatprep.subr.bf16.mxu1 %v6126_v29 }
 0xe94   : > { %5481 = vmatpush3.bf16.msra.mxu0 %v6127_v30  ;;  %5503 = vmatpush3.bf16.msra.mxu1 %v6128_v31 }
 0xe95   : > { %5482 = vmatprep.subr.bf16.mxu0 %v6129_v32  ;;  %5504 = vmatprep.subr.bf16.mxu1 %v6130_v33 }
 0xe98   : > { %5483 = vmatpush3.bf16.msra.mxu0 %v6131_v36  ;;  %5505 = vmatpush3.bf16.msra.mxu1 %v6132_v7 }
 0xe99   : > { %5484 = vmatprep.subr.bf16.mxu0 %v6133_v39  ;;  %5506 = vmatprep.subr.bf16.mxu1 %v6134_v40 }
 0xe9c   : > { %5485 = vmatpush3.bf16.msra.mxu0 %v6135_v42  ;;  %5507 = vmatpush3.bf16.msra.mxu1 %v6136_v38 }
 0xe9d   : > { %5486 = vmatprep.subr.bf16.mxu0 %v6137_v44  ;;  %5508 = vmatprep.subr.bf16.mxu1 %v6138_v35 }
 0xea0   : > { %5487 = vmatpush3.bf16.msra.mxu0 %v6139_v46  ;;  %5509 = vmatpush3.bf16.msra.mxu1 %v6140_v47 }
 0xea1   : > { %5488 = vmatprep.subr.bf16.mxu0 %v6141_v48  ;;  %5510 = vmatprep.subr.bf16.mxu1 %v6142_v52 }
 0xea4   : > { %5489 = vmatpush3.bf16.msra.mxu0 %v6143_v3  ;;  %5511 = vmatpush3.bf16.msra.mxu1 %v6144_v50 }
 0xea5   : > { %5490 = vmatprep.subr.bf16.mxu0 %v6145_v53  ;;  %5512 = vmatprep.subr.bf16.mxu1 %v6146_v34 }
 0xea8   : > { %5491 = vmatpush3.bf16.msra.mxu0 %v6147_v54  ;;  %5513 = vmatpush3.bf16.msra.mxu1 %v6148_v55 }
 0xf5e   : > { %v4514_v4 = vpop.f32.mrb[64].mxu0  ;;  %v4555_v6 = vpop.f32.mrb[64].mxu1 }
 0xf5f   : > { %v8112_v2 = vadd.f32 %v4514_v4, %v4420_v62  ;;  %v8114_v8 = vadd.f32 %v4555_v6, %v4428_v63  ;;  %v4516_v9 = vpop.f32.mrb[65].mxu0  ;;  %v4557_v21 = vpop.f32.mrb[65].mxu1 }
 0xf60   : > { %v8116_v10 = vadd.f32 %v4516_v9, %v4424_v14  ;;  %v8118_v12 = vadd.f32 %v4557_v21, %v4432_v1  ;;  %v4518_v13 = vpop.f32.mrb[66].mxu0  ;;  %v4559_v15 = vpop.f32.mrb[66].mxu1 }
 0xf61   : > { %v8121_v16 = vmul.f32 0.70710677, %v8112_v2  ;;  %v8124_v17 = vmul.f32 0.70710677, %v8114_v8  ;;  %v4519_v37 = vpop.f32.mrb[67].mxu0  ;;  %v4560_v26 = vpop.f32.mrb[67].mxu1 }
 0xf62   : > { %v8127_v18 = vmul.f32 0.70710677, %v8116_v10  ;;  %v8130_v19 = vmul.f32 0.70710677, %v8118_v12 }
 0xf63   : > { %v4570_v20 = vand.u32 2147483647, %v8121_v16  ;;  %v4572_v22 = vand.u32 2147483647, %v8124_v17  ;;  %vm4646_vm1 = vcmp.lt.f32.partialorder %v8121_v16, 0.0  ;;  %vm4648_vm2 = vcmp.lt.f32.partialorder %v8124_v17, 0.0 }
 0xf64   : > { %v4571_v41 = vand.u32 2147483647, %v8127_v18  ;;  %v4573_v23 = vand.u32 2147483647, %v8130_v19  ;;  %vm4647_vm5 = vcmp.lt.f32.partialorder %v8127_v18, 0.0  ;;  %vm4649_vm6 = vcmp.lt.f32.partialorder %v8130_v19, 0.0 }
 0xf65   : > { %v4574_v51 = vmul.f32 0.3275911, %v4570_v20  ;;  %v4576_v61 = vmul.f32 0.3275911, %v4572_v22  ;;  %v4622_v49 = vsub.f32 0.0, %v4570_v20  ;;  %v4624_v29 = vsub.f32 0.0, %v4572_v22 }
 0xf66   : > { %v4575_v24 = vmul.f32 0.3275911, %v4571_v41  ;;  %v4577_v0 = vmul.f32 0.3275911, %v4573_v23  ;;  %v4623_v32 = vsub.f32 0.0, %v4571_v41  ;;  %v4625_v40 = vsub.f32 0.0, %v4573_v23 }
 0xf67   : > { %v4578_v25 = vadd.f32 1.0, %v4574_v51  ;;  %v4580_v43 = vadd.f32 1.0, %v4576_v61  ;;  %v4626_v31 = vmul.f32 %v4622_v49, %v4570_v20  ;;  %v4628_v7 = vmul.f32 %v4624_v29, %v4572_v22 }
 0xf68   : > { %v4579_v27 = vadd.f32 1.0, %v4575_v24  ;;  %v4581_v28 = vadd.f32 1.0, %v4577_v0  ;;  %v4627_v46 = vmul.f32 %v4623_v32, %v4571_v41  ;;  %v4629_v53 = vmul.f32 %v4625_v40, %v4573_v23 }
 0xf69   : > { %6205 = vrcp.f32 %v4578_v25  ;;  %v4630_v44 = vmul.f32 1.442695, %v4626_v31  ;;  %v4634_v48 = vmul.f32 1.442695, %v4628_v7  ;;  %v4564_v17 = vmul.f32 0.5, %v8114_v8 }
 0xf6a   : > { %6207 = vrcp.f32 %v4580_v43  ;;  %v4632_v57 = vmul.f32 1.442695, %v4627_v46  ;;  %v4636_v60 = vmul.f32 1.442695, %v4629_v53  ;;  %v5281_v8 = vld [vmem:[%s8279_s13] ss:$0 sm:$0xff] }
 0xf6b   : > { %6209 = vrcp.f32 %v4579_v27 }
 0xf6c   : > { %6211 = vrcp.f32 %v4581_v28 }
 0xf6d   : > { %6213 = vpow2.f32 %v4630_v44 }
 0xf6e   : > { %6215 = vpow2.f32 %v4634_v48 }
 0xf6f   : > { %6217 = vpow2.f32 %v4632_v57 }
 0xf70   : > { %6219 = vpow2.f32 %v4636_v60 }
 0xf73   : > { %v6206_v30 = vpop.eup %6205 }
 0xf74   : > { %v6208_v33 = vpop.eup %6207  ;;  %v4586_v36 = vmul.f32 1.0614054, %v6206_v30 }
 0xf75   : > { %v4588_v39 = vmul.f32 1.0614054, %v6208_v33  ;;  %v6210_v38 = vpop.eup %6209 }
 0xf76   : > { %v4590_v42 = vadd.f32 -1.4531521, %v4586_v36  ;;  %v4587_v52 = vmul.f32 1.0614054, %v6210_v38  ;;  %v6212_v3 = vpop.eup %6211 }
 0xf77   : > { %v4592_v35 = vadd.f32 -1.4531521, %v4588_v39  ;;  %v4589_v55 = vmul.f32 1.0614054, %v6212_v3  ;;  %v6214_v61 = vpop.eup %6213 }
 0xf78   : > { %v4594_v47 = vmul.f32 %v6206_v30, %v4590_v42  ;;  %v4591_v54 = vadd.f32 -1.4531521, %v4587_v52  ;;  %v6216_v25 = vpop.eup %6215 }
 0xf79   : > { %v4596_v50 = vmul.f32 %v6208_v33, %v4592_v35  ;;  %v4593_v58 = vadd.f32 -1.4531521, %v4589_v55  ;;  %v6218_v29 = vpop.eup %6217 }
 0xf7a   : > { %v4598_v34 = vadd.f32 1.4214138, %v4594_v47  ;;  %v4595_v45 = vmul.f32 %v6210_v38, %v4591_v54  ;;  %v6220_v39 = vpop.eup %6219  ;;  %v4565_v54 = vmul.f32 0.5, %v8118_v12 }
 0xf7b   : > { %v4600_v56 = vadd.f32 1.4214138, %v4596_v50  ;;  %v4597_v14 = vmul.f32 %v6212_v3, %v4593_v58  ;;  %v4563_v50 = vmul.f32 0.5, %v8116_v10 }
 0xf7c   : > { %v4602_v5 = vmul.f32 %v6206_v30, %v4598_v34  ;;  %v4599_v63 = vadd.f32 1.4214138, %v4595_v45 }
 0xf7d   : > { %v4604_v11 = vmul.f32 %v6208_v33, %v4600_v56  ;;  %v4601_v9 = vadd.f32 1.4214138, %v4597_v14 }
 0xf7e   : > { %v4606_v62 = vadd.f32 -0.28449672, %v4602_v5  ;;  %v4603_v6 = vmul.f32 %v6210_v38, %v4599_v63 }
 0xf7f   : > { %v4608_v1 = vadd.f32 -0.28449672, %v4604_v11  ;;  %v4605_v20 = vmul.f32 %v6212_v3, %v4601_v9 }
 0xf80   : > { %v4610_v4 = vmul.f32 %v6206_v30, %v4606_v62  ;;  %v4607_v15 = vadd.f32 -0.28449672, %v4603_v6 }
 0xf81   : > { %v4612_v21 = vmul.f32 %v6208_v33, %v4608_v1  ;;  %v4609_v51 = vadd.f32 -0.28449672, %v4605_v20 }
 0xf82   : > { %v4614_v13 = vadd.f32 0.2548296, %v4610_v4  ;;  %v4611_v23 = vmul.f32 %v6210_v38, %v4607_v15 }
 0xf83   : > { %v4616_v22 = vadd.f32 0.2548296, %v4612_v21  ;;  %v4613_v37 = vmul.f32 %v6212_v3, %v4609_v51 }
 0xf84   : > { %v4618_v41 = vmul.f32 %v6206_v30, %v4614_v13  ;;  %v4615_v0 = vadd.f32 0.2548296, %v4611_v23 }
 0xf85   : > { %v4620_v24 = vmul.f32 %v6208_v33, %v4616_v22  ;;  %v4617_v49 = vadd.f32 0.2548296, %v4613_v37 }
 0xf86   : > { %v4638_v43 = vmul.f32 %v6214_v61, %v4618_v41  ;;  %v4619_v28 = vmul.f32 %v6210_v38, %v4615_v0  ;;  %v4562_v38 = vmul.f32 0.5, %v8112_v2 }
 0xf87   : > { %v4640_v26 = vmul.f32 %v6216_v25, %v4620_v24  ;;  %v4621_v7 = vmul.f32 %v6212_v3, %v4617_v49 }
 0xf88   : > { %v4642_v27 = vsub.f32 1.0, %v4638_v43  ;;  %v4639_v36 = vmul.f32 %v6218_v29, %v4619_v28 }
 0xf89   : > { %v4644_v31 = vsub.f32 1.0, %v4640_v26  ;;  %v4641_v42 = vmul.f32 %v6220_v39, %v4621_v7 }
 0xf8a   : > { %v4650_v32 = vsub.f32 0.0, %v4642_v27  ;;  %v4643_v33 = vsub.f32 1.0, %v4639_v36 }
 0xf8b   : > { %v4652_v30 = vsub.f32 0.0, %v4644_v31  ;;  %v4645_v47 = vsub.f32 1.0, %v4641_v42 }
 0xf8c   : > { %v4654_v40 = vsel %vm4646_vm1, %v4650_v32, %v4642_v27  ;;  %v4651_v46 = vsub.f32 0.0, %v4643_v33 }
 0xf8d   : > { %v4656_v44 = vsel %vm4648_vm2, %v4652_v30, %v4644_v31  ;;  %v4658_v35 = vadd.f32 1.0, %v4654_v40  ;;  %v4653_v3 = vsub.f32 0.0, %v4645_v47 }
 0xf8e   : > { %v4660_v48 = vadd.f32 1.0, %v4656_v44  ;;  %v4655_v52 = vsel %vm4647_vm5, %v4651_v46, %v4643_v33 }
 0xf8f   : > { %v4659_v16 = vadd.f32 1.0, %v4655_v52  ;;  %v4662_v53 = vmul.f32 %v4658_v35, %v4562_v38  ;;  %v4657_v34 = vsel %vm4649_vm6, %v4653_v3, %v4645_v47 }
 0xf90   : > { %v4661_v56 = vadd.f32 1.0, %v4657_v34  ;;  %v4664_v57 = vmul.f32 %v4660_v48, %v4564_v17 }
 0xf91   : > { %v4663_v55 = vmul.f32 %v4659_v16, %v4563_v50  ;;  %v4666_v2 = vpack.c.bf16 %v4662_v53, %v4662_v53 }
 0xf92   : > { %v4665_v5 = vmul.f32 %v4661_v56, %v4565_v54  ;;  %v4668_v58 = vpack.c.bf16 %v4664_v57, %v4664_v57 }
 0xf93   : > { %v4667_v18 = vpack.c.bf16 %v4663_v55, %v4663_v55 }
 0xf94   : > { %v4669_v45 = vpack.c.bf16 %v4665_v5, %v4665_v5 }
 0xf95   : > { %4965 = vmatprep.mubr.bf16.mxu0 %v4667_v18 }
 0xf96   : > { %4966 = vmatmul.mubr.bf16.vlgmr.msra.gmra.mrb[68].mxu0 %v4666_v2  ;;  %5005 = vmatprep.mubr.bf16.mxu1 %v4669_v45 }
 0xf97   : > { %5006 = vmatmul.mubr.bf16.vlgmr.msra.gmra.mrb[68].mxu1 %v4668_v58 }
0x1069   : > { %v5492_v10 = vpop.f32.mrb[68].mxu0 }
0x106a   : > { %v5493_v12 = vpop.f32.mrb[69].mxu0  ;;  %v5514_v19 = vpop.f32.mrb[68].mxu1 }
0x106b   : > { %v5494_v11 = vadd.f32 %v5493_v12, %v5492_v10  ;;  %v5495_v60 = vpop.f32.mrb[70].mxu0  ;;  %v5515_v62 = vpop.f32.mrb[69].mxu1 }
0x106c   : > { %v5496_v63 = vpop.f32.mrb[71].mxu0  ;;  %v5516_v1 = vadd.f32 %v5515_v62, %v5514_v19  ;;  %v5517_v4 = vpop.f32.mrb[70].mxu1 }
0x106d   : > { %v4968_v14 = vadd.f32 %v5494_v11, %v5281_v8  ;;  %v5518_v6 = vpop.f32.mrb[71].mxu1 }
0x106f   : > { %v5008_v9 = vadd.f32 %v5516_v1, %v4968_v14 }
0x1071   : > { %v5013_v21 = vadd.f32 %v5008_v9, %v8005_v59 }
0x1073   : > { %5014 = vst.msk [vmem:[%s681_s10] sm:$0xff] %vm689_vm0, %v5013_v21 }
0x1074   : > { %6409 = shalt.err (!%p6406_p6)
}
0x1075   : > { %s6410_s3 = scalar_lea.hbm %s8153_s14, 128  ;;  %s6414_s13 = scalar_lea.hbm %s8280_s24, 256 }
0x1076   : > { %p6411_p12 = scmp.ne.s32.totalorder %s8153_s14, %s6410_s3  ;;  %p6415_p4 = scmp.lt.u32.totalorder %s8153_s14, %s8280_s24 }
0x1077   : > { %p6416_p3 = scmp.lt.u32.totalorder %s6414_s13, %s6410_s3  ;;  %p6418_p0 = scmp.lt.u32.totalorder %s6410_s3, %s8153_s14 }
0x1078   : > { %p6412_p1 = pnand %p6411_p12, %p8281_p2 }
0x1079   : > { %p6417_p13 = por %p6416_p3, %p6415_p4 }
0x107a   : > { %p6413_p9 = pneg %p6412_p1 }
0x107b   : > { %p6419_p10 = por %p6418_p0, %p6417_p13 }
0x107d   : > { %p6420_p11 = pnand %p6419_p10, %p6413_p9 }
0x107f   : > { %6423 = shalt.err (!%p6420_p11)
}
0x1080   : > { %5988 = dma.vmem_to_hbm [thread:$0]  (%p8281_p2), %s8155_s12, 128, %s8153_s14, %s5016_s15  }
0x1081 PF: > { %s8282_s26 = sld [smem:[#allocation20_spill]]  ;;  %s8283_s19 = sld [smem:[#allocation24_spill]] }
0x1082   : > { %p8285_p7 = scmp.ge.s32.totalorder %s6478_s30, 2 }
0x1087   : > { %s5041_s23 = sand.u32 1, %s8282_s26   ;;  %p8284_p5 = scmp.ne.s32.totalorder %s8283_s19, 0 }
0x1088   : > { %s5042_s1 = scalar_lea.sflag [#allocation4], %s5041_s23 }
0x1089   : > { %p6011_p8 = pnand %p8285_p7, %p8284_p5 }
0x108b   : > { %6461 = dma.done.wait (!%p6011_p8), %s5042_s1, 128  }
0x108c   : > { %6463 = vsyncadd (!%p6011_p8), %s5042_s1, 4294967168  ;;  %s8286_s30 = sld [smem:[#allocation22_spill]]  ;;  %s8287_s16 = sld [smem:[#allocation21_spill]] }
0x108d   : > { %s8288_s29 = sld [smem:[#allocation23_spill]]  ;;  %s8289_s27 = smov %s6470_s28 }
0x1092   : > { %p36_p6 = scmp.ge.s32.totalorder %s8286_s30, 4   ;;  %s8290_s28 = smov %s8287_s16 }
0x1094   :  { %38 = sbr.rel (!%p36_p6) target bundleno = 22 (0x16), region = 166 }
0x109b   :  { %5047 = vsyncpa [#allocation3], 1 }
0x109c   :  { %5049 = vsyncpa [#allocation3 + $0x1], 1 }
0x109d   :  { %5050 = vsyncpa [#allocation6], 1 }
0x109e   :  { %5052 = vsyncpa [#allocation6 + $0x1], 1 }
0x109f   :  { %5053 = vsyncpa [#allocation9], 1 }
0x10a0   :  { %5054 = vsyncpa [#allocation12], 1 }
0x10a1   :  { %5055 = vsyncpa [#allocation4], 1 }
0x10a2   :  { %5057 = vsyncpa [#allocation4 + $0x1], 1 }

</bundles_post_ra>
